<compile_context>
chip_gen: v7x
topology: tpu7x:2x2x1
jax: 0.10.0
libtpu: 0.0.40
codegen_flags: <defaults>
</compile_context>

<pallas_src>
import functools

import numpy as np
import jax
import jax.numpy as jnp
from jax.experimental import pallas as pl
from jax.experimental.pallas import tpu as pltpu

EPS = 1e-5  # nn.InstanceNorm3d default (affine=False, biased variance)


def _round_up(v, m):
    return (v + m - 1) // m * m


def _fused_kernel(mask_ref, xp_ref, wc_ref, w2_ref, *rest,
                  offs, base, valid_len, right_pad, inv_s, has_proj, cop):
    """One batch element per grid step.

    mask_ref : (1, V)            1.0 on lanes that are real output voxels
    xp_ref   : (1, Cp, P_pad)    zero-padded input, channels-first, spatial flat
    wc_ref   : (Cop or 2*Cop, 27*Cp)  conv1 taps (+ fused 1x1x1 projection rows)
    w2_ref   : (Cop, 27*Cop)     conv2 taps stacked along the contraction dim
    bm_ref   : (Cop, 1)          [only if has_proj] projection bias
    o_ref    : (1, Cop, V)
    """
    if has_proj:
        bm_ref, o_ref = rest
    else:
        (o_ref,) = rest

    vmask = mask_ref[...]            # (1, V)
    xp = xp_ref[0]                   # (Cp, P_pad)

    def im2col(inp):
        # 27 lane-shifted views of the padded volume stacked along K, so the whole
        # 3x3x3 conv is a single MXU matmul (K = 27*C). Shifts are XLU work and
        # overlap with the MXU.
        return jnp.concatenate([inp[:, o:o + valid_len] for o in offs], axis=0)

    def inst_norm(y):
        # statistics over the D*H*W valid lanes only (biased variance, eps=1e-5)
        mean = jnp.sum(y * vmask, axis=1, keepdims=True) * inv_s
        cent = (y - mean) * vmask                           # also zeroes garbage lanes
        var = jnp.sum(cent * cent, axis=1, keepdims=True) * inv_s
        return cent * jax.lax.rsqrt(var + EPS)

    # ---- stage 1 (+ fused skip projection): one MXU matmul ----
    rhs1 = im2col(xp)                                                 # (27*Cp, V)
    out1 = jnp.dot(wc_ref[...], rhs1, preferred_element_type=jnp.float32)
    y1 = out1[:cop, :]                                                # conv1 output
    if has_proj:
        res = out1[cop:, :] + bm_ref[...]                             # 1x1x1 proj + bias
    else:
        res = xp[:, base:base + valid_len]                            # identity skip

    a1 = jnp.maximum(inst_norm(y1), 0.0)                              # (Cop, V), 0 off-grid
    # re-embed at the interior lanes of the padded volume; halo lanes are exact zeros
    z1 = jnp.pad(a1, ((0, 0), (base, right_pad)))                     # (Cop, P_pad)

    # ---- stage 2: conv2 -> norm2 ----
    y2 = inst_norm(jnp.dot(w2_ref[...], im2col(z1),
                           preferred_element_type=jnp.float32))       # (Cop, V)

    o_ref[0] = jnp.maximum(y2 + res, 0.0)


def residual_block(x, w1, w2, wm=None, bm=None):
    """Forward pass of the PyTorch ResidualBlock.

    x  : (N, Cin, D, H, W) float32 (NCDHW, as in PyTorch)
    w1 : (Cout, Cin, 3, 3, 3)   conv1 weight (bias=False)
    w2 : (Cout, Cout, 3, 3, 3)  conv2 weight (bias=False)
    wm : (Cout, Cin, 1, 1, 1), bm: (Cout,)  -- only when Cin != Cout
    returns (N, Cout, D, H, W) float32
    """
    N, Cin, D, H, W = x.shape
    Cout = w1.shape[0]
    has_proj = Cin != Cout

    Dp, Hp, Wp = D + 2, H + 2, W + 2
    P = Dp * Hp * Wp                  # flattened zero-padded volume
    base = Hp * Wp + Wp + 1           # lane offset of voxel (0,0,0) inside the padding
    V = P - 2 * base                  # working width: covers every valid output lane
    Cp = _round_up(Cin, 8)
    Cop = _round_up(Cout, 8)
    P_pad = _round_up(P, 128)         # lane-align the padded volume (extra lanes never read)

    # ---- lane-dense, channels-first prep (tiny one-pass XLA ops) ----
    xp = jnp.pad(x, ((0, 0), (0, Cp - Cin), (1, 1), (1, 1), (1, 1)))
    xp = xp.reshape(N, Cp, P)
    xp = jnp.pad(xp, ((0, 0), (0, 0), (0, P_pad - P)))

    def stack_weight(w, cin, cin_p):
        # (Cout, cin, 3,3,3) -> (Cop, 27*cin_p); tap-major / channel-minor columns,
        # matching the in-kernel tap stacking order.
        wt = jnp.transpose(w, (0, 2, 3, 4, 1))
        wt = jnp.pad(wt, ((0, Cop - Cout), (0, 0), (0, 0), (0, 0), (0, cin_p - cin)))
        return wt.reshape(Cop, 27 * cin_p)

    w1s = stack_weight(w1, Cin, Cp)       # (Cop, 27*Cp)
    w2s = stack_weight(w2, Cout, Cop)     # (Cop, 27*Cop)

    if has_proj:
        # Fold the 1x1x1 skip projection into the stage-1 matmul: it only reads the
        # centre tap (offset == base, tap index 13), so stack it as extra output
        # rows of a combined weight that is zero on all other taps.
        wm2 = jnp.pad(wm.reshape(Cout, Cin), ((0, Cop - Cout), (0, Cp - Cin)))
        proj_rows = jnp.zeros((Cop, 27 * Cp), jnp.float32)
        proj_rows = proj_rows.at[:, 13 * Cp:14 * Cp].set(wm2)
        wc = jnp.concatenate([w1s, proj_rows], axis=0)        # (2*Cop, 27*Cp)
        bmp = jnp.pad(bm.reshape(Cout, 1), ((0, Cop - Cout), (0, 0)))
        m_rows = 2 * Cop
    else:
        wc = w1s
        m_rows = Cop

    # lanes (within the V-wide window) that correspond to real output voxels
    m = np.zeros((Dp, Hp, Wp), np.float32)
    m[:D, :H, :W] = 1.0
    vmask = jnp.asarray(m.reshape(P)[:V].reshape(1, V))

    offs = tuple(kd * Hp * Wp + kh * Wp + kw
                 for kd in range(3) for kh in range(3) for kw in range(3))

    kernel = functools.partial(
        _fused_kernel, offs=offs, base=base, valid_len=V,
        right_pad=P_pad - V - base, inv_s=1.0 / float(D * H * W),
        has_proj=has_proj, cop=Cop)

    in_specs = [
        pl.BlockSpec((1, V), lambda n: (0, 0)),              # valid-lane mask
        pl.BlockSpec((1, Cp, P_pad), lambda n: (n, 0, 0)),   # padded input (lane-dense)
        pl.BlockSpec((m_rows, 27 * Cp), lambda n: (0, 0)),   # conv1 (+ proj) weight stack
        pl.BlockSpec((Cop, 27 * Cop), lambda n: (0, 0)),     # conv2 weight stack
    ]
    args = [vmask, xp, wc, w2s]
    if has_proj:
        in_specs.append(pl.BlockSpec((Cop, 1), lambda n: (0, 0)))
        args.append(bmp)

    # TODO(synk): for large D*H*W or channel counts, tile the grid over D with a
    # 1-voxel halo so each block stays within the 64 MiB v7x VMEM budget.
    out = pl.pallas_call(
        kernel,
        out_shape=jax.ShapeDtypeStruct((N, Cop, V), jnp.float32),
        grid=(N,),
        in_specs=in_specs,
        out_specs=pl.BlockSpec((1, Cop, V), lambda n: (n, 0, 0)),
        compiler_params=pltpu.CompilerParams(dimension_semantics=("parallel",)),
    )(*args)

    # lanes -> (d, h, w); drop halo lanes and channel padding
    out = jnp.pad(out, ((0, 0), (0, 0), (0, P - V)))
    out = out.reshape(N, Cop, Dp, Hp, Wp)[:, :Cout, :D, :H, :W]
    return out


# ---------------- pure-JAX reference (for correctness check) ----------------

def _reference(x, w1, w2, wm=None, bm=None):
    dn = ("NCDHW", "OIDHW", "NCDHW")

    def inorm(y):
        mean = jnp.mean(y, axis=(2, 3, 4), keepdims=True)
        var = jnp.mean((y - mean) ** 2, axis=(2, 3, 4), keepdims=True)
        return (y - mean) * jax.lax.rsqrt(var + EPS)

    out = jax.nn.relu(inorm(jax.lax.conv_general_dilated(
        x, w1, (1, 1, 1), "SAME", dimension_numbers=dn)))
    out = inorm(jax.lax.conv_general_dilated(
        out, w2, (1, 1, 1), "SAME", dimension_numbers=dn))
    if wm is not None:
        res = jax.lax.conv_general_dilated(
            x, wm, (1, 1, 1), "VALID", dimension_numbers=dn)
        res = res + bm.reshape(1, -1, 1, 1, 1)
    else:
        res = x
    return jax.nn.relu(out + res)


if __name__ == "__main__":
    key = jax.random.PRNGKey(0)
    k = jax.random.split(key, 5)

    # --- case 1: Cin != Cout -> learned 1x1x1 projection fused into stage 1 ---
    N, Cin, Cout, D, H, W = 2, 4, 8, 8, 8, 8
    x = jax.random.normal(k[0], (N, Cin, D, H, W), dtype=jnp.float32)
    w1 = 0.1 * jax.random.normal(k[1], (Cout, Cin, 3, 3, 3), dtype=jnp.float32)
    w2 = 0.1 * jax.random.normal(k[2], (Cout, Cout, 3, 3, 3), dtype=jnp.float32)
    wm = 0.1 * jax.random.normal(k[3], (Cout, Cin, 1, 1, 1), dtype=jnp.float32)
    bm = 0.1 * jax.random.normal(k[4], (Cout,), dtype=jnp.float32)

    out = jax.block_until_ready(residual_block(x, w1, w2, wm, bm))
    ref = _reference(x, w1, w2, wm, bm)
    assert out.shape == (N, Cout, D, H, W)
    assert jnp.allclose(out, ref, atol=1e-4, rtol=1e-4), "projection case mismatch"

    # --- case 2: Cin == Cout -> identity skip (no projection matmul) ---
    Cio = 4
    x2 = jax.random.normal(k[0], (N, Cio, D, H, W), dtype=jnp.float32)
    w1b = 0.1 * jax.random.normal(k[1], (Cio, Cio, 3, 3, 3), dtype=jnp.float32)
    w2b = 0.1 * jax.random.normal(k[2], (Cio, Cio, 3, 3, 3), dtype=jnp.float32)

    out2 = jax.block_until_ready(residual_block(x2, w1b, w2b))
    ref2 = _reference(x2, w1b, w2b)
    assert out2.shape == (N, Cio, D, H, W)
    assert jnp.allclose(out2, ref2, atol=1e-4, rtol=1e-4), "identity case mismatch"

    print("KERNEL_OK")
</pallas_src>

<mosaic_0001>
module attributes {stable_mosaic.version = 11 : i64} {
  func.func @_fused_kernel(%arg0: i32, %arg1: memref<1x778xf32, #tpu.memory_space<vmem>>, %arg2: memref<1x8x1024xf32, #tpu.memory_space<vmem>>, %arg3: memref<16x216xf32, #tpu.memory_space<vmem>>, %arg4: memref<8x216xf32, #tpu.memory_space<vmem>>, %arg5: memref<8x1xf32, #tpu.memory_space<vmem>>, %arg6: memref<1x8x778xf32, #tpu.memory_space<vmem>>) attributes {dimension_semantics = [#tpu.dimension_semantics<parallel>], iteration_bounds = array<i64: 2>, scalar_prefetch = 0 : i64, scratch_operands = 0 : i64, tpu.core_type = #tpu.core_type<tc>, window_params = [{pipeline_mode = #tpu.pipeline_mode<synchronous>, transform_indices = @transform_0, window_bounds = array<i64: 1, 778>}, {transform_indices = @transform_1, window_bounds = array<i64: 1, 8, 1024>}, {pipeline_mode = #tpu.pipeline_mode<synchronous>, transform_indices = @transform_2, window_bounds = array<i64: 16, 216>}, {pipeline_mode = #tpu.pipeline_mode<synchronous>, transform_indices = @transform_3, window_bounds = array<i64: 8, 216>}, {pipeline_mode = #tpu.pipeline_mode<synchronous>, transform_indices = @transform_4, window_bounds = array<i64: 8, 1>}, {transform_indices = @transform_5, window_bounds = array<i64: 1, 8, 778>}]} {
    %c0 = arith.constant 0 : index
    %c0_0 = arith.constant 0 : index
    %0 = vector.load %arg1[%c0, %c0_0] : memref<1x778xf32, #tpu.memory_space<vmem>>, vector<1x778xf32>
    %c0_1 = arith.constant 0 : index
    %c0_2 = arith.constant 0 : index
    %c0_3 = arith.constant 0 : index
    %1 = vector.load %arg2[%c0_1, %c0_2, %c0_3] : memref<1x8x1024xf32, #tpu.memory_space<vmem>>, vector<1x8x1024xf32>
    %2 = vector.shape_cast %1 : vector<1x8x1024xf32> to vector<8x1024xf32>
    %3 = vector.extract_strided_slice %2 {offsets = [0, 0], sizes = [8, 778], strides = [1, 1]} : vector<8x1024xf32> to vector<8x778xf32>
    %4 = vector.extract_strided_slice %2 {offsets = [0, 1], sizes = [8, 778], strides = [1, 1]} : vector<8x1024xf32> to vector<8x778xf32>
    %5 = vector.extract_strided_slice %2 {offsets = [0, 2], sizes = [8, 778], strides = [1, 1]} : vector<8x1024xf32> to vector<8x778xf32>
    %6 = vector.extract_strided_slice %2 {offsets = [0, 10], sizes = [8, 778], strides = [1, 1]} : vector<8x1024xf32> to vector<8x778xf32>
    %7 = vector.extract_strided_slice %2 {offsets = [0, 11], sizes = [8, 778], strides = [1, 1]} : vector<8x1024xf32> to vector<8x778xf32>
    %8 = vector.extract_strided_slice %2 {offsets = [0, 12], sizes = [8, 778], strides = [1, 1]} : vector<8x1024xf32> to vector<8x778xf32>
    %9 = vector.extract_strided_slice %2 {offsets = [0, 20], sizes = [8, 778], strides = [1, 1]} : vector<8x1024xf32> to vector<8x778xf32>
    %10 = vector.extract_strided_slice %2 {offsets = [0, 21], sizes = [8, 778], strides = [1, 1]} : vector<8x1024xf32> to vector<8x778xf32>
    %11 = vector.extract_strided_slice %2 {offsets = [0, 22], sizes = [8, 778], strides = [1, 1]} : vector<8x1024xf32> to vector<8x778xf32>
    %12 = vector.extract_strided_slice %2 {offsets = [0, 100], sizes = [8, 778], strides = [1, 1]} : vector<8x1024xf32> to vector<8x778xf32>
    %13 = vector.extract_strided_slice %2 {offsets = [0, 101], sizes = [8, 778], strides = [1, 1]} : vector<8x1024xf32> to vector<8x778xf32>
    %14 = vector.extract_strided_slice %2 {offsets = [0, 102], sizes = [8, 778], strides = [1, 1]} : vector<8x1024xf32> to vector<8x778xf32>
    %15 = vector.extract_strided_slice %2 {offsets = [0, 110], sizes = [8, 778], strides = [1, 1]} : vector<8x1024xf32> to vector<8x778xf32>
    %16 = vector.extract_strided_slice %2 {offsets = [0, 111], sizes = [8, 778], strides = [1, 1]} : vector<8x1024xf32> to vector<8x778xf32>
    %17 = vector.extract_strided_slice %2 {offsets = [0, 112], sizes = [8, 778], strides = [1, 1]} : vector<8x1024xf32> to vector<8x778xf32>
    %18 = vector.extract_strided_slice %2 {offsets = [0, 120], sizes = [8, 778], strides = [1, 1]} : vector<8x1024xf32> to vector<8x778xf32>
    %19 = vector.extract_strided_slice %2 {offsets = [0, 121], sizes = [8, 778], strides = [1, 1]} : vector<8x1024xf32> to vector<8x778xf32>
    %20 = vector.extract_strided_slice %2 {offsets = [0, 122], sizes = [8, 778], strides = [1, 1]} : vector<8x1024xf32> to vector<8x778xf32>
    %21 = vector.extract_strided_slice %2 {offsets = [0, 200], sizes = [8, 778], strides = [1, 1]} : vector<8x1024xf32> to vector<8x778xf32>
    %22 = vector.extract_strided_slice %2 {offsets = [0, 201], sizes = [8, 778], strides = [1, 1]} : vector<8x1024xf32> to vector<8x778xf32>
    %23 = vector.extract_strided_slice %2 {offsets = [0, 202], sizes = [8, 778], strides = [1, 1]} : vector<8x1024xf32> to vector<8x778xf32>
    %24 = vector.extract_strided_slice %2 {offsets = [0, 210], sizes = [8, 778], strides = [1, 1]} : vector<8x1024xf32> to vector<8x778xf32>
    %25 = vector.extract_strided_slice %2 {offsets = [0, 211], sizes = [8, 778], strides = [1, 1]} : vector<8x1024xf32> to vector<8x778xf32>
    %26 = vector.extract_strided_slice %2 {offsets = [0, 212], sizes = [8, 778], strides = [1, 1]} : vector<8x1024xf32> to vector<8x778xf32>
    %27 = vector.extract_strided_slice %2 {offsets = [0, 220], sizes = [8, 778], strides = [1, 1]} : vector<8x1024xf32> to vector<8x778xf32>
    %28 = vector.extract_strided_slice %2 {offsets = [0, 221], sizes = [8, 778], strides = [1, 1]} : vector<8x1024xf32> to vector<8x778xf32>
    %29 = vector.extract_strided_slice %2 {offsets = [0, 222], sizes = [8, 778], strides = [1, 1]} : vector<8x1024xf32> to vector<8x778xf32>
    %30 = tpu.concatenate %3, %4, %5, %6, %7, %8, %9, %10, %11, %12, %13, %14, %15, %16, %17, %18 in 0 : vector<8x778xf32>, vector<8x778xf32>, vector<8x778xf32>, vector<8x778xf32>, vector<8x778xf32>, vector<8x778xf32>, vector<8x778xf32>, vector<8x778xf32>, vector<8x778xf32>, vector<8x778xf32>, vector<8x778xf32>, vector<8x778xf32>, vector<8x778xf32>, vector<8x778xf32>, vector<8x778xf32>, vector<8x778xf32> -> vector<128x778xf32>
    %31 = tpu.concatenate %19, %20, %21, %22, %23, %24, %25, %26, %27, %28, %29 in 0 : vector<8x778xf32>, vector<8x778xf32>, vector<8x778xf32>, vector<8x778xf32>, vector<8x778xf32>, vector<8x778xf32>, vector<8x778xf32>, vector<8x778xf32>, vector<8x778xf32>, vector<8x778xf32>, vector<8x778xf32> -> vector<88x778xf32>
    %32 = tpu.concatenate %30, %31 in 0 : vector<128x778xf32>, vector<88x778xf32> -> vector<216x778xf32>
    %c0_4 = arith.constant 0 : index
    %c0_5 = arith.constant 0 : index
    %33 = vector.load %arg3[%c0_4, %c0_5] : memref<16x216xf32, #tpu.memory_space<vmem>>, vector<16x216xf32>
    %cst = arith.constant dense<0.000000e+00> : vector<16x778xf32>
    %34 = tpu.matmul %33, %32, %cst {dimension_numbers = #tpu.dot_dimension_numbers<[1], [0], [0], [1], [0, 0, 1, 1], [], []>} : vector<16x216xf32>, vector<216x778xf32>, vector<16x778xf32> -> vector<16x778xf32>
    %35 = vector.extract_strided_slice %34 {offsets = [0, 0], sizes = [8, 778], strides = [1, 1]} : vector<16x778xf32> to vector<8x778xf32>
    %36 = vector.extract_strided_slice %34 {offsets = [8, 0], sizes = [8, 778], strides = [1, 1]} : vector<16x778xf32> to vector<8x778xf32>
    %c0_6 = arith.constant 0 : index
    %c0_7 = arith.constant 0 : index
    %37 = vector.load %arg5[%c0_6, %c0_7] : memref<8x1xf32, #tpu.memory_space<vmem>>, vector<8x1xf32>
    %38 = vector.broadcast %37 : vector<8x1xf32> to vector<8x778xf32>
    %39 = arith.addf %36, %38 : vector<8x778xf32>
    %40 = vector.broadcast %0 : vector<1x778xf32> to vector<8x778xf32>
    %41 = arith.mulf %35, %40 : vector<8x778xf32>
    %cst_8 = arith.constant dense<0.000000e+00> : vector<8xf32>
    %42 = vector.multi_reduction <add>, %41, %cst_8 [1] : vector<8x778xf32> to vector<8xf32>
    %43 = vector.shape_cast %42 : vector<8xf32> to vector<8x1xf32>
    %cst_9 = arith.constant 0.001953125 : f32
    %44 = vector.broadcast %cst_9 : f32 to vector<8x1xf32>
    %45 = arith.mulf %43, %44 : vector<8x1xf32>
    %46 = vector.broadcast %45 : vector<8x1xf32> to vector<8x778xf32>
    %47 = arith.subf %35, %46 : vector<8x778xf32>
    %48 = vector.broadcast %0 : vector<1x778xf32> to vector<8x778xf32>
    %49 = arith.mulf %47, %48 : vector<8x778xf32>
    %50 = arith.mulf %49, %49 : vector<8x778xf32>
    %cst_10 = arith.constant dense<0.000000e+00> : vector<8xf32>
    %51 = vector.multi_reduction <add>, %50, %cst_10 [1] : vector<8x778xf32> to vector<8xf32>
    %52 = vector.shape_cast %51 : vector<8xf32> to vector<8x1xf32>
    %cst_11 = arith.constant 0.001953125 : f32
    %53 = vector.broadcast %cst_11 : f32 to vector<8x1xf32>
    %54 = arith.mulf %52, %53 : vector<8x1xf32>
    %cst_12 = arith.constant 9.99999974E-6 : f32
    %55 = vector.broadcast %cst_12 : f32 to vector<8x1xf32>
    %56 = arith.addf %54, %55 : vector<8x1xf32>
    %57 = math.rsqrt %56 : vector<8x1xf32>
    %58 = vector.broadcast %57 : vector<8x1xf32> to vector<8x778xf32>
    %59 = arith.mulf %49, %58 : vector<8x778xf32>
    %cst_13 = arith.constant 0.000000e+00 : f32
    %60 = vector.broadcast %cst_13 : f32 to vector<8x778xf32>
    %61 = arith.maximumf %59, %60 : vector<8x778xf32>
    %c0_i32 = arith.constant 0 : i32
    %62 = arith.sitofp %c0_i32 : i32 to f32
    %63 = vector.broadcast %62 : f32 to vector<8x111xf32>
    %64 = tpu.concatenate %63, %61 in 1 : vector<8x111xf32>, vector<8x778xf32> -> vector<8x889xf32>
    %65 = vector.broadcast %62 : f32 to vector<8x135xf32>
    %66 = tpu.concatenate %64, %65 in 1 : vector<8x889xf32>, vector<8x135xf32> -> vector<8x1024xf32>
    %c0_14 = arith.constant 0 : index
    %c0_15 = arith.constant 0 : index
    %67 = vector.load %arg4[%c0_14, %c0_15] : memref<8x216xf32, #tpu.memory_space<vmem>>, vector<8x216xf32>
    %68 = vector.extract_strided_slice %66 {offsets = [0, 0], sizes = [8, 778], strides = [1, 1]} : vector<8x1024xf32> to vector<8x778xf32>
    %69 = vector.extract_strided_slice %66 {offsets = [0, 1], sizes = [8, 778], strides = [1, 1]} : vector<8x1024xf32> to vector<8x778xf32>
    %70 = vector.extract_strided_slice %66 {offsets = [0, 2], sizes = [8, 778], strides = [1, 1]} : vector<8x1024xf32> to vector<8x778xf32>
    %71 = vector.extract_strided_slice %66 {offsets = [0, 10], sizes = [8, 778], strides = [1, 1]} : vector<8x1024xf32> to vector<8x778xf32>
    %72 = vector.extract_strided_slice %66 {offsets = [0, 11], sizes = [8, 778], strides = [1, 1]} : vector<8x1024xf32> to vector<8x778xf32>
    %73 = vector.extract_strided_slice %66 {offsets = [0, 12], sizes = [8, 778], strides = [1, 1]} : vector<8x1024xf32> to vector<8x778xf32>
    %74 = vector.extract_strided_slice %66 {offsets = [0, 20], sizes = [8, 778], strides = [1, 1]} : vector<8x1024xf32> to vector<8x778xf32>
    %75 = vector.extract_strided_slice %66 {offsets = [0, 21], sizes = [8, 778], strides = [1, 1]} : vector<8x1024xf32> to vector<8x778xf32>
    %76 = vector.extract_strided_slice %66 {offsets = [0, 22], sizes = [8, 778], strides = [1, 1]} : vector<8x1024xf32> to vector<8x778xf32>
    %77 = vector.extract_strided_slice %66 {offsets = [0, 100], sizes = [8, 778], strides = [1, 1]} : vector<8x1024xf32> to vector<8x778xf32>
    %78 = vector.extract_strided_slice %66 {offsets = [0, 101], sizes = [8, 778], strides = [1, 1]} : vector<8x1024xf32> to vector<8x778xf32>
    %79 = vector.extract_strided_slice %66 {offsets = [0, 102], sizes = [8, 778], strides = [1, 1]} : vector<8x1024xf32> to vector<8x778xf32>
    %80 = vector.extract_strided_slice %66 {offsets = [0, 110], sizes = [8, 778], strides = [1, 1]} : vector<8x1024xf32> to vector<8x778xf32>
    %81 = vector.extract_strided_slice %66 {offsets = [0, 111], sizes = [8, 778], strides = [1, 1]} : vector<8x1024xf32> to vector<8x778xf32>
    %82 = vector.extract_strided_slice %66 {offsets = [0, 112], sizes = [8, 778], strides = [1, 1]} : vector<8x1024xf32> to vector<8x778xf32>
    %83 = vector.extract_strided_slice %66 {offsets = [0, 120], sizes = [8, 778], strides = [1, 1]} : vector<8x1024xf32> to vector<8x778xf32>
    %84 = vector.extract_strided_slice %66 {offsets = [0, 121], sizes = [8, 778], strides = [1, 1]} : vector<8x1024xf32> to vector<8x778xf32>
    %85 = vector.extract_strided_slice %66 {offsets = [0, 122], sizes = [8, 778], strides = [1, 1]} : vector<8x1024xf32> to vector<8x778xf32>
    %86 = vector.extract_strided_slice %66 {offsets = [0, 200], sizes = [8, 778], strides = [1, 1]} : vector<8x1024xf32> to vector<8x778xf32>
    %87 = vector.extract_strided_slice %66 {offsets = [0, 201], sizes = [8, 778], strides = [1, 1]} : vector<8x1024xf32> to vector<8x778xf32>
    %88 = vector.extract_strided_slice %66 {offsets = [0, 202], sizes = [8, 778], strides = [1, 1]} : vector<8x1024xf32> to vector<8x778xf32>
    %89 = vector.extract_strided_slice %66 {offsets = [0, 210], sizes = [8, 778], strides = [1, 1]} : vector<8x1024xf32> to vector<8x778xf32>
    %90 = vector.extract_strided_slice %66 {offsets = [0, 211], sizes = [8, 778], strides = [1, 1]} : vector<8x1024xf32> to vector<8x778xf32>
    %91 = vector.extract_strided_slice %66 {offsets = [0, 212], sizes = [8, 778], strides = [1, 1]} : vector<8x1024xf32> to vector<8x778xf32>
    %92 = vector.extract_strided_slice %66 {offsets = [0, 220], sizes = [8, 778], strides = [1, 1]} : vector<8x1024xf32> to vector<8x778xf32>
    %93 = vector.extract_strided_slice %66 {offsets = [0, 221], sizes = [8, 778], strides = [1, 1]} : vector<8x1024xf32> to vector<8x778xf32>
    %94 = vector.extract_strided_slice %66 {offsets = [0, 222], sizes = [8, 778], strides = [1, 1]} : vector<8x1024xf32> to vector<8x778xf32>
    %95 = tpu.concatenate %68, %69, %70, %71, %72, %73, %74, %75, %76, %77, %78, %79, %80, %81, %82, %83 in 0 : vector<8x778xf32>, vector<8x778xf32>, vector<8x778xf32>, vector<8x778xf32>, vector<8x778xf32>, vector<8x778xf32>, vector<8x778xf32>, vector<8x778xf32>, vector<8x778xf32>, vector<8x778xf32>, vector<8x778xf32>, vector<8x778xf32>, vector<8x778xf32>, vector<8x778xf32>, vector<8x778xf32>, vector<8x778xf32> -> vector<128x778xf32>
    %96 = tpu.concatenate %84, %85, %86, %87, %88, %89, %90, %91, %92, %93, %94 in 0 : vector<8x778xf32>, vector<8x778xf32>, vector<8x778xf32>, vector<8x778xf32>, vector<8x778xf32>, vector<8x778xf32>, vector<8x778xf32>, vector<8x778xf32>, vector<8x778xf32>, vector<8x778xf32>, vector<8x778xf32> -> vector<88x778xf32>
    %97 = tpu.concatenate %95, %96 in 0 : vector<128x778xf32>, vector<88x778xf32> -> vector<216x778xf32>
    %cst_16 = arith.constant dense<0.000000e+00> : vector<8x778xf32>
    %98 = tpu.matmul %67, %97, %cst_16 {dimension_numbers = #tpu.dot_dimension_numbers<[1], [0], [0], [1], [0, 0, 1, 1], [], []>} : vector<8x216xf32>, vector<216x778xf32>, vector<8x778xf32> -> vector<8x778xf32>
    %99 = vector.broadcast %0 : vector<1x778xf32> to vector<8x778xf32>
    %100 = arith.mulf %98, %99 : vector<8x778xf32>
    %cst_17 = arith.constant dense<0.000000e+00> : vector<8xf32>
    %101 = vector.multi_reduction <add>, %100, %cst_17 [1] : vector<8x778xf32> to vector<8xf32>
    %102 = vector.shape_cast %101 : vector<8xf32> to vector<8x1xf32>
    %cst_18 = arith.constant 0.001953125 : f32
    %103 = vector.broadcast %cst_18 : f32 to vector<8x1xf32>
    %104 = arith.mulf %102, %103 : vector<8x1xf32>
    %105 = vector.broadcast %104 : vector<8x1xf32> to vector<8x778xf32>
    %106 = arith.subf %98, %105 : vector<8x778xf32>
    %107 = vector.broadcast %0 : vector<1x778xf32> to vector<8x778xf32>
    %108 = arith.mulf %106, %107 : vector<8x778xf32>
    %109 = arith.mulf %108, %108 : vector<8x778xf32>
    %cst_19 = arith.constant dense<0.000000e+00> : vector<8xf32>
    %110 = vector.multi_reduction <add>, %109, %cst_19 [1] : vector<8x778xf32> to vector<8xf32>
    %111 = vector.shape_cast %110 : vector<8xf32> to vector<8x1xf32>
    %cst_20 = arith.constant 0.001953125 : f32
    %112 = vector.broadcast %cst_20 : f32 to vector<8x1xf32>
    %113 = arith.mulf %111, %112 : vector<8x1xf32>
    %cst_21 = arith.constant 9.99999974E-6 : f32
    %114 = vector.broadcast %cst_21 : f32 to vector<8x1xf32>
    %115 = arith.addf %113, %114 : vector<8x1xf32>
    %116 = math.rsqrt %115 : vector<8x1xf32>
    %117 = vector.broadcast %116 : vector<8x1xf32> to vector<8x778xf32>
    %118 = arith.mulf %108, %117 : vector<8x778xf32>
    %119 = arith.addf %118, %39 : vector<8x778xf32>
    %cst_22 = arith.constant 0.000000e+00 : f32
    %120 = vector.broadcast %cst_22 : f32 to vector<8x778xf32>
    %121 = arith.maximumf %119, %120 : vector<8x778xf32>
    %c0_23 = arith.constant 0 : index
    %c0_24 = arith.constant 0 : index
    %c0_25 = arith.constant 0 : index
    %122 = vector.load %arg6[%c0_23, %c0_24, %c0_25] : memref<1x8x778xf32, #tpu.memory_space<vmem>>, vector<1x8x778xf32>
    %123 = vector.shape_cast %122 : vector<1x8x778xf32> to vector<8x778xf32>
    %124 = vector.shape_cast %121 : vector<8x778xf32> to vector<1x8x778xf32>
    tpu.vector_store %arg6[%c0_23, %c0_24, %c0_25], %124 {strides = array<i32>} : memref<1x8x778xf32, #tpu.memory_space<vmem>>, vector<1x8x778xf32>,
    return
  }
  func.func @transform_0(%arg0: i32) -> (i32, i32) {
    %c0_i32 = arith.constant 0 : i32
    %c0_i32_0 = arith.constant 0 : i32
    %c0_i32_1 = arith.constant 0 : i32
    return %c0_i32, %c0_i32_0 : i32, i32
  }
  func.func @transform_1(%arg0: i32) -> (i32, i32, i32) {
    %c0_i32 = arith.constant 0 : i32
    %c0_i32_0 = arith.constant 0 : i32
    %c0_i32_1 = arith.constant 0 : i32
    return %arg0, %c0_i32, %c0_i32_0 : i32, i32, i32
  }
  func.func @transform_2(%arg0: i32) -> (i32, i32) {
    %c0_i32 = arith.constant 0 : i32
    %c0_i32_0 = arith.constant 0 : i32
    %c0_i32_1 = arith.constant 0 : i32
    return %c0_i32, %c0_i32_0 : i32, i32
  }
  func.func @transform_3(%arg0: i32) -> (i32, i32) {
    %c0_i32 = arith.constant 0 : i32
    %c0_i32_0 = arith.constant 0 : i32
    %c0_i32_1 = arith.constant 0 : i32
    return %c0_i32, %c0_i32_0 : i32, i32
  }
  func.func @transform_4(%arg0: i32) -> (i32, i32) {
    %c0_i32 = arith.constant 0 : i32
    %c0_i32_0 = arith.constant 0 : i32
    %c0_i32_1 = arith.constant 0 : i32
    return %c0_i32, %c0_i32_0 : i32, i32
  }
  func.func @transform_5(%arg0: i32) -> (i32, i32, i32) {
    %c0_i32 = arith.constant 0 : i32
    %c0_i32_0 = arith.constant 0 : i32
    %c0_i32_1 = arith.constant 0 : i32
    return %arg0, %c0_i32, %c0_i32_0 : i32, i32, i32
  }
}

</mosaic_0001>

<bundles_post_ra>
// kernel: tpu_custom_call.1
= control target key start
LH: loop header
LB: loop body
LE: loop exit
PB: predicated region body
PF: predicated region fallthrough
CT: control target
= control target key end

     0   :  { %s7273_s0 = inlined_call_operand.hbm [shape: f32[1,778], index: 0, kind: input, shape index: {}]   ;;  %s7274_s1 = inlined_call_operand.hbm [shape: f32[2,8,1024], index: 1, kind: input, shape index: {}]   ;;  %s7275_s2 = inlined_call_operand.hbm [shape: f32[16,216], index: 2, kind: input, shape index: {}]   ;;  %s7276_s3 = inlined_call_operand.vmem [shape: f32[8,216], index: 3, kind: input, shape index: {}]   ;;  %s7277_s4 = inlined_call_operand.vmem [shape: f32[8,1], index: 4, kind: input, shape index: {}]   ;;  %s7278_s5 = inlined_call_operand.hbm [shape: f32[2,8,778], index: 5, kind: output, shape index: {}]  }
   0x1   :  { %7425 = sst [smem:[#allocation52_spill]] %s7273_s0 }
   0x2   :  { %7426 = sst [smem:[#allocation53_spill]] %s7274_s1 }
   0x3   :  { %7427 = sst [smem:[#allocation54_spill]] %s7275_s2 }
   0x4   :  { %10 = vsyncpa [#allocation3], 0 }
   0x5   :  { %11 = vsyncpa [#allocation6], 0 }
   0x6   :  { %13 = vsyncpa [#allocation6 + $0x1], 0 }
   0x7   :  { %14 = vsyncpa [#allocation4], 0 }
   0x8   :  { %16 = vsyncpa [#allocation4 + $0x1], 0  ;;  %s4837_s18 = smov 0   ;;  %s4839_s19 = smov 0  }
   0x9   :  { %s4841_s20 = smov 0   ;;  %s4843_s21 = smov 0  }
   0xa LB: > { %7428 = sst [smem:[#allocation13_spill]] %s4763_s19  ;;  %s4858_s22 = sadd.s32 4294967295, %s4771_s21   ;;  %s4771_s21 = sphi %s4843_s21, %s7764_s21   ;;  %s4767_s20 = sphi %s4841_s20, %s7767_s20   ;;  %s4763_s19 = sphi %s4839_s19, %s7766_s19   ;;  %s4759_s18 = sphi %s4837_s18, %s7765_s18  }
   0xb   : > { %7429 = sst [smem:[#allocation14_spill]] %s4767_s20  ;;  %s3026_s23 = sadd.s32 4294967294, %s4771_s21  }
   0xc   : > { %7430 = sst [smem:[#allocation15_spill]] %s4771_s21  ;;  %p63_p0 = scmp.ne.s32.totalorder %s4763_s19, %s4759_s18 }
   0xd   : > { %p7279_p1 = scmp.eq.s32.totalorder %s4858_s22, 0  ;;  %p156_p3 = scmp.eq.s32.totalorder %s3026_s23, 1 }
   0xe   : > { %p3027_p5 = scmp.ge.s32.totalorder %s4771_s21, 1  ;;  %p163_p7 = scmp.lt.s32.totalorder %s4771_s21, 3 }
   0xf   : > { %p4867_p4 = por %p7279_p1, %p63_p0  ;;  %p4872_p6 = por %p156_p3, %p63_p0 }
  0x10   : > { %p4877_p8 = pnand %p3027_p5, %p163_p7  ;;  %s4773_s27 = smov [#allocation7]  }
  0x11   : > { %s7431_s24 = scalar_select %p4867_p4, 1, 0 }
  0x12   : > { %s7432_s25 = scalar_select %p4872_p6, 1, 0 }
  0x13   : > { %s186_s28 = sshll.u32 %s4773_s27, 4  ;;  %p3463_p9 = pneg %p4877_p8  ;;  %s4881_s28 = int_to_ptr.vmem [resolvable:$true] %s186_s28 }
  0x14   : > { %s4774_s30 = smov [#allocation2]   ;;  %s7435_s2 = sld [smem:[#allocation54_spill]] }
  0x15   : > { %p4888_p11 = pnand %p3463_p9, %p7279_p1  ;;  %s176_s6 = sshll.u32 %s4774_s30, 4  ;;  %s4892_s6 = int_to_ptr.vmem [resolvable:$true] %s176_s6 }
  0x17   : > { %p4613_p13 = pneg %p4888_p11 }
  0x1a   : > { %s4611_s9 = scalar_lea.hbm %s7435_s2, 512 }
  0x1b   : > { %p4612_p12 = scmp.ne.s32.totalorder %s7435_s2, %s4611_s9  ;;  %p4618_p5 = scmp.lt.u32.totalorder %s4611_s9, %s7435_s2 }
  0x1d   : > { %p4614_p0 = pnand %p4613_p13, %p4612_p12 }
  0x1f   : > { %p4615_p3 = pneg %p4614_p0 }
  0x21   : > { %p4620_p7 = pnand %p4618_p5, %p4615_p3 }
  0x23   : > { %4623 = shalt.err (!%p4620_p7)
}
  0x24   : > { %s4624_s14 = scalar_lea.vmem %s4881_s28, 512  ;;  %p4632_p2 = scmp.lt.s32.totalorder %s4881_s28, %s4881_s28 }
  0x25   : > { %p4625_p9 = scmp.ne.s32.totalorder %s4881_s28, %s4624_s14  ;;  %p4633_p12 = scmp.lt.s32.totalorder %s4624_s14, %s4624_s14 }
  0x27   : > { %p4627_p10 = pnand %p4625_p9, %p4613_p13  ;;  %p4634_p0 = por %p4633_p12, %p4632_p2 }
  0x29   : > { %p4628_p1 = pneg %p4627_p10 }
  0x2b   : > { %p4635_p6 = pnand %p4634_p0, %p4628_p1 }
  0x2d   : > { %4638 = shalt.err (!%p4635_p6)
}
  0x2e   : > { %s4775_s15 = smov 256   ;;  %s4776_s16 = smov 16  }
  0x2f   : > { %3469 = dma.hbm_to_vmem [thread:$0]  (!%p4888_p11), %s7435_s2, 512, %s4881_s28, [#allocation6], %s4775_s15, %s4775_s15, %s4776_s16  }
  0x30   : > { %s7436_s0 = sld [smem:[#allocation52_spill]] }
  0x36   : > { %s4639_s7 = scalar_lea.hbm %s7436_s0, 112 }
  0x37   : > { %p4640_p2 = scmp.ne.s32.totalorder %s7436_s0, %s4639_s7  ;;  %p4646_p10 = scmp.lt.u32.totalorder %s4639_s7, %s7436_s0 }
  0x39   : > { %p4642_p1 = pnand %p4640_p2, %p4613_p13 }
  0x3b   : > { %p4643_p6 = pneg %p4642_p1 }
  0x3d   : > { %p4648_p3 = pnand %p4646_p10, %p4643_p6 }
  0x3f   : > { %4651 = shalt.err (!%p4648_p3)
}
  0x40   : > { %s4652_s28 = scalar_lea.vmem %s4892_s6, 112  ;;  %s4659_s12 = scalar_lea.vmem %s4892_s6, 128 }
  0x41   : > { %p4653_p5 = scmp.ne.s32.totalorder %s4892_s6, %s4652_s28  ;;  %p4660_p12 = scmp.lt.s32.totalorder %s4892_s6, %s4892_s6 }
  0x42   : > { %p4661_p0 = scmp.lt.s32.totalorder %s4659_s12, %s4652_s28 }
  0x43   : > { %p4655_p7 = pnand %p4653_p5, %p4613_p13 }
  0x44   : > { %p4662_p2 = por %p4661_p0, %p4660_p12 }
  0x45   : > { %p4656_p9 = pneg %p4655_p7 }
  0x47   : > { %p4663_p1 = pnand %p4662_p2, %p4656_p9 }
  0x49   : > { %4666 = shalt.err (!%p4663_p1)
}
  0x4a   : > { %3466 = dma.hbm_to_vmem [thread:$0]  (!%p4888_p11), %s7436_s0, 112, %s4892_s6, [#allocation3]  }
  0x4b   : > { %s4948_s15 = sadd.s32 1, %s4771_s21   ;;  %s50_s29 = sadd.s32 1, %s4767_s20 }
  0x4c   : > { %7437 = sst [smem:[#allocation16_spill]] %s4948_s15  ;;  %s47_s16 = ssub.s32 %s4771_s21, %s4948_s15 }
  0x4d   : > { %p57_p13 = scmp.ne.s32.totalorder %s4767_s20, %s4763_s19  ;;  %p48_p6 = scmp.eq.s32.totalorder %s47_s16, 0 }
  0x4e   : > { %p58_p10 = scmp.eq.s32.totalorder %s4771_s21, 0  ;;  %p7438_p3 = scmp.eq.s32.totalorder %s4858_s22, 1 }
  0x4f   : > { %p3480_p7 = scmp.lt.s32.totalorder %s4771_s21, 2  ;;  %s206_s27 = sand.u32 1, %s4771_s21  }
  0x50   : > { %p4958_p5 = por %p7438_p3, %p57_p13  ;;  %p59_p9 = por %p58_p10, %p57_p13 }
  0x51   : > { %s4964_s23 = scalar_select %p48_p6, %s4767_s20, %s50_s29  }
  0x52   : > { %s7439_s17 = scalar_select %p4958_p5, 1, 0 }
  0x53   : > { %7440 = sst [smem:[#allocation17_spill]] %s4964_s23  ;;  %s208_s30 = sand.u32 1, %s4767_s20  }
  0x54   : > { %s3031_s6 = sshll.u32 %s208_s30, 6  ;;  %s3056_s7 = sshll.u32 %s4771_s21, 10 }
  0x55   : > { %s7441_s1 = sld [smem:[#allocation53_spill]]  ;;  %s210_s11 = scalar_lea.vmem [#allocation5], %s3031_s6 }
  0x56   : > { %s218_s28 = sshll.u32 %s210_s11, 4  ;;  %p4974_p11 = pnand %p3480_p7, %p59_p9  ;;  %s4978_s28 = int_to_ptr.vmem [resolvable:$true] %s218_s28 }
  0x57   : > { %s207_s13 = scalar_lea.sflag [#allocation6], %s206_s27 }
  0x58   : > { %p4669_p0 = pneg %p4974_p11 }
  0x5b   : > { %s4972_s10 = scalar_lea.hbm %s7441_s1, %s3056_s7  ;;  %s4672_s30 = scalar_lea.hbm %s7441_s1, 2048 }
  0x5c   : > { %s4667_s14 = scalar_lea.hbm %s4972_s10, 1024  ;;  %p4673_p13 = scmp.lt.u32.totalorder %s4972_s10, %s7441_s1 }
  0x5d   : > { %p4668_p12 = scmp.ne.s32.totalorder %s4972_s10, %s4667_s14  ;;  %p4674_p6 = scmp.lt.u32.totalorder %s4672_s30, %s4667_s14 }
  0x5e   : > { %p4676_p3 = scmp.lt.u32.totalorder %s4667_s14, %s4972_s10 }
  0x5f   : > { %p4670_p2 = pnand %p4669_p0, %p4668_p12  ;;  %p4675_p10 = por %p4674_p6, %p4673_p13 }
  0x61   : > { %p4671_p1 = pneg %p4670_p2  ;;  %p4677_p7 = por %p4676_p3, %p4675_p10 }
  0x63   : > { %p4678_p9 = pnand %p4677_p7, %p4671_p1 }
  0x65   : > { %4681 = shalt.err (!%p4678_p9)
}
  0x66   : > { %s4682_s27 = scalar_lea.vmem %s4978_s28, 1024  ;;  %s4777_s8 = smov [#allocation5]  }
  0x67   : > { %p4683_p12 = scmp.ne.s32.totalorder %s4978_s28, %s4682_s27  ;;  %s4687_s9 = sshll.u32 %s4777_s8, 4  ;;  %s4688_s9 = int_to_ptr.vmem [resolvable:$false] %s4687_s9 }
  0x68   : > { %s4689_s11 = scalar_lea.vmem %s4688_s9, 2048  ;;  %p4690_p4 = scmp.lt.s32.totalorder %s4978_s28, %s4688_s9 }
  0x69   : > { %p4685_p2 = pnand %p4683_p12, %p4669_p0  ;;  %p4691_p13 = scmp.lt.s32.totalorder %s4689_s11, %s4682_s27 }
  0x6b   : > { %p4686_p5 = pneg %p4685_p2  ;;  %p4692_p6 = por %p4691_p13, %p4690_p4 }
  0x6d   : > { %p4693_p10 = pnand %p4692_p6, %p4686_p5 }
  0x6f   : > { %4696 = shalt.err (!%p4693_p10)
}
  0x70   : > { %3473 = dma.hbm_to_vmem [thread:$0]  (!%p4974_p11), %s4972_s10, 1024, %s4978_s28, %s207_s13  }
  0x71   : > { %227 = sbr.rel (%p4877_p8) target bundleno = 2252 (0x8cc), region = 40 }
  0x78   : > { %p7443_p0 = scmp.eq.s32.totalorder %s4858_s22, 0 }
  0x7a   : > { %4742 = dma.done.wait (%p7443_p0), [#allocation3], 112   ;;  %p7444_p1 = pmov %p7443_p0 }
  0x7b   : > { %s233_s14 = sand.u32 1, %s4858_s22   ;;  %s5013_s29 = sand.u32 1, %s4763_s19  }
  0x7c   : > { %4744 = vsyncadd (%p7444_p1), [#allocation3], 4294967184  ;;  %s3036_s12 = sshll.u32 %s5013_s29, 6  ;;  %s234_s16 = scalar_lea.sflag [#allocation6], %s233_s14 }
  0x7d   : > { %s5016_s30 = scalar_lea.vmem [#allocation5], %s3036_s12  ;;  %p7445_p4 = scmp.ne.s32.totalorder %s7431_s24, 0 }
  0x7f   : > { %4746 = dma.done.wait (%p7445_p4), %s234_s16, 1024  }
  0x80   : > { %4748 = vsyncadd (%p7445_p4), %s234_s16, 4294966272  ;;  %p7446_p8 = pmov %p7443_p0 }
  0x81   : > { %p7447_p5 = pmov %p7443_p0 }
  0x82   : > { %4750 = dma.done.wait (%p7446_p8), [#allocation6], 512  }
  0x83   : > { %4752 = vsyncadd (%p7447_p5), [#allocation6], 4294966784  ;;  %v5027_v0 = vld [vmem:[%s5016_s30 + $0x20] sm:$0xff]  ;;  %v274_v1 = vld [vmem:[%s5016_s30 + $0x28] sm:$0xff]  ;;  %s7294_s24 = smov 127   ;;  %s7352_s26 = smov 49  }
  0x84   : > { %v5031_v2 = vld [vmem:[%s5016_s30 + $0x8] sm:$0xff]  ;;  %v5034_v3 = vpack.i.bf16 %v274_v1, %v5027_v0  ;;  %v5037_v4 = vld [vmem:[%s5016_s30 + $0x10] sm:$0xff]  ;;  %v5040_v5 = vld [vmem:[%s5016_s30] sm:$0xff]  ;;  %s7315_s10 = smov 48   ;;  %s7313_s28 = smov 47   ;;  %vm7332_vm0 = vcmask 1039360  }
  0x85   : > { %v5043_v6 = vld [vmem:[%s5016_s30 + $0x18] sm:$0xff]  ;;  %v5047_v7 = vpack.i.bf16 %v5037_v4, %v5031_v2  ;;  %v5063_v10 = vld [vmem:[%s5016_s30 + $0x30] sm:$0xff]  ;;  %s7353_s13 = smov 39   ;;  %s7350_s6 = smov 38   ;;  %v3673_v12 = vpack.i.bf16 %v5040_v5, %v274_v1  ;;  %vm725_vm1 = vcmask 400384   ;;  %vm746_vm2 = vcmask 392192  }
  0x86   : > { %3559 = vrot.lane.b32.xlu1 %v5034_v3, %s7294_s24  ;;  %v3553_v8 = vpack.i.bf16 %v5040_v5, %v5043_v6  ;;  %v5060_v9 = vpack.i.bf16 %v5027_v0, %v5043_v6  ;;  %v3583_v11 = vpack.i.bf16 %v5063_v10, %v274_v1  ;;  %s7311_s7 = smov 37   ;;  %s7309_s27 = smov 28   ;;  %v5118_v13 = vpack.i.bf16 %v5043_v6, %v5040_v5  ;;  %v5171_v14 = vld [vmem:[%s5016_s30 + $0x38] sm:$0xff] }
  0x87   : > { %3549 = vrot.lane.b32.xlu0 %v5047_v7, %s7294_s24  ;;  %s7323_s8 = smov 29   ;;  %s7307_s9 = smov 27   ;;  %v5179_v19 = vpack.i.bf16 %v5171_v14, %v5063_v10  ;;  %vm7358_vm3 = vcmask 318464   ;;  %vm767_vm4 = vcmask 384000   ;;  %vm7343_vm5 = vcmask 310272  }
  0x88   : > { %s7284_s11 = smov 118   ;;  %s7282_s14 = smov 126   ;;  %vm7342_vm6 = vcmask 302080   ;;  %vm7300_vm7 = vcmask 1031168   ;;  %vm354_vm8 = vcmask 965632   ;;  %vm522_vm9 = vcmask 228352  }
  0x89   : > { %s7288_s12 = smov 116   ;;  %s7286_s16 = smov 117   ;;  %vm7329_vm10 = vcmask 949248   ;;  %vm7341_vm11 = vcmask 236544   ;;  %vm7301_vm12 = vcmask 957440   ;;  %vm7305_vm13 = vcmask 883712  }
  0x8a   : > { %3564 = vrot.lane.b32.xlu1 %v5047_v7, %s7352_s26  ;;  %vm550_vm14 = vcmask 220160   ;;  %vm7318_vm15 = vcmask 875520   ;;  %s7501_s0 = smov 38   ;;  %s7504_s1 = smov 107  }
  0x8b   : > { %3554 = vrot.lane.b32.xlu0 %v3553_v8, %s7294_s24  ;;  %s7505_s2 = smov 26   ;;  %s7506_s23 = smov 8  }
  0x8c   : > { %s7507_s20 = smov 16   ;;  %s7512_s19 = smov 7  }
  0x8d   : > { %s7513_s15 = smov 49   ;;  %s7514_s21 = smov 39  }
  0x8e   : > { %3574 = vrot.lane.b32.xlu1 %v5047_v7, %s7315_s10  ;;  %p7760_p3 = scmp.ne.s32.totalorder %s7439_s17, 0 }
  0x8f   : > { %3569 = vrot.lane.b32.xlu0 %v5060_v9, %s7352_s26 }
  0x92   : > { %3584 = vrot.lane.b32.xlu1 %v3583_v11, %s7352_s26 }
  0x93   : > { %3579 = vrot.lane.b32.xlu0 %v5060_v9, %s7315_s10 }
  0x96   : > { %3594 = vrot.lane.b32.xlu1 %v5047_v7, %s7313_s28 }
  0x97   : > { %3589 = vrot.lane.b32.xlu0 %v3583_v11, %s7315_s10 }
  0x9a   : > { %3604 = vrot.lane.b32.xlu1 %v5047_v7, %s7353_s13 }
  0x9b   : > { %3599 = vrot.lane.b32.xlu0 %v5060_v9, %s7313_s28 }
  0x9e   : > { %3614 = vrot.lane.b32.xlu1 %v3583_v11, %s7313_s28 }
  0x9f   : > { %3609 = vrot.lane.b32.xlu0 %v5060_v9, %s7353_s13 }
  0xa2   : > { %3624 = vrot.lane.b32.xlu1 %v5047_v7, %s7350_s6 }
  0xa3   : > { %3619 = vrot.lane.b32.xlu0 %v3583_v11, %s7353_s13 }
  0xa6   : > { %3634 = vrot.lane.b32.xlu1 %v5047_v7, %s7311_s7 }
  0xa7   : > { %3629 = vrot.lane.b32.xlu0 %v5060_v9, %s7350_s6 }
  0xaa   : > { %3644 = vrot.lane.b32.xlu1 %v3583_v11, %s7350_s6 }
  0xab   : > { %3639 = vrot.lane.b32.xlu0 %v5060_v9, %s7311_s7 }
  0xae   : > { %3654 = vrot.lane.b32.xlu1 %v5047_v7, %s7309_s27 }
  0xaf   : > { %3649 = vrot.lane.b32.xlu0 %v3583_v11, %s7311_s7 }
  0xb2   : > { %3664 = vrot.lane.b32.xlu1 %v5047_v7, %s7323_s8 }
  0xb3   : > { %3659 = vrot.lane.b32.xlu0 %v5060_v9, %s7309_s27 }
  0xb6   : > { %3674 = vrot.lane.b32.xlu1 %v3673_v12, %s7309_s27 }
  0xb7   : > { %3669 = vrot.lane.b32.xlu0 %v5060_v9, %s7323_s8 }
  0xba   : > { %538 = vrot.lane.b32.xlu1 %v5031_v2, %s7307_s9 }
  0xbb   : > { %3679 = vrot.lane.b32.xlu0 %v3583_v11, %s7323_s8 }
  0xbe   : > { %542 = vrot.lane.b32.xlu1 %v5043_v6, %s7307_s9 }
  0xbf   : > { %540 = vrot.lane.b32.xlu0 %v5037_v4, %s7307_s9 }
  0xc2   : > { %546 = vrot.lane.b32.xlu1 %v274_v1, %s7307_s9 }
  0xc3   : > { %544 = vrot.lane.b32.xlu0 %v5027_v0, %s7307_s9 }
  0xc6   : > { %3689 = vrot.lane.b32.xlu1 %v5047_v7, %s7284_s11 }
  0xc7   : > { %3684 = vrot.lane.b32.xlu0 %v5047_v7, %s7282_s14 }
  0xca   : > { %3699 = vrot.lane.b32.xlu1 %v5118_v13, %s7284_s11 }
  0xcb   : > { %3694 = vrot.lane.b32.xlu0 %v5118_v13, %s7282_s14 }
  0xce   : > { %3709 = vrot.lane.b32.xlu1 %v5034_v3, %s7284_s11  ;;  %s7290_s11 = smov 108  }
  0xcf   : > { %3704 = vrot.lane.b32.xlu0 %v5034_v3, %s7282_s14  ;;  %s7319_s14 = smov 107  }
  0xd2   : > { %3719 = vrot.lane.b32.xlu1 %v5047_v7, %s7288_s12 }
  0xd3   : > { %3714 = vrot.lane.b32.xlu0 %v5047_v7, %s7286_s16 }
  0xd6   : > { %3729 = vrot.lane.b32.xlu1 %v5118_v13, %s7288_s12 }
  0xd7   : > { %3724 = vrot.lane.b32.xlu0 %v5118_v13, %s7286_s16 }
  0xda   : > { %3739 = vrot.lane.b32.xlu1 %v5034_v3, %s7288_s12  ;;  %s7321_s12 = smov 26  }
  0xdb   : > { %3734 = vrot.lane.b32.xlu0 %v5034_v3, %s7286_s16  ;;  %s7292_s16 = smov 106  }
  0xde   : > { %3749 = vrot.lane.b32.xlu1 %v5047_v7, %s7319_s14 }
  0xdf   : > { %3744 = vrot.lane.b32.xlu0 %v5047_v7, %s7290_s11 }
  0xe2   : > { %3759 = vrot.lane.b32.xlu1 %v5118_v13, %s7319_s14 }
  0xe3   : > { %3754 = vrot.lane.b32.xlu0 %v5118_v13, %s7290_s11 }
  0xe6   : > { %3769 = vrot.lane.b32.xlu1 %v5034_v3, %s7319_s14 }
  0xe7   : > { %3764 = vrot.lane.b32.xlu0 %v5034_v3, %s7290_s11  ;;  %s7298_s11 = smov 18  }
  0xea   : > { %3779 = vrot.lane.b32.xlu1 %v5118_v13, %s7292_s16 }
  0xeb   : > { %3774 = vrot.lane.b32.xlu0 %v5047_v7, %s7292_s16 }
  0xee   : > { %3789 = vrot.lane.b32.xlu1 %v5047_v7, %s7321_s12 }
  0xef   : > { %3784 = vrot.lane.b32.xlu0 %v5034_v3, %s7292_s16  ;;  %s7296_s16 = smov 17  }
  0xf2   : > { %3794 = vrot.lane.b32.xlu1 %v5118_v13, %s7321_s12 }
  0xf3   : > { %536 = vrot.lane.b32.xlu0 %v5040_v5, %s7307_s9 }
  0xf6   : > { %3804 = vrot.lane.b32.xlu1 %v5047_v7, %s7298_s11 }
  0xf7   : > { %3799 = vrot.lane.b32.xlu0 %v5034_v3, %s7321_s12 }
  0xf8   : > { %v5173_v15 = vpop.permute.xlu1 %3559 }
  0xf9   : > { %v3550_v16 = vpop.permute.xlu0 %3549  ;;  %v3561_v24 = vunpack.i.l.bf16 %v5173_v15  ;;  %v3562_v52 = vunpack.i.h.bf16 %v5173_v15 }
  0xfa   : > { %v3552_v17 = vunpack.i.h.bf16 %v3550_v16  ;;  %v3551_v18 = vunpack.i.l.bf16 %v3550_v16  ;;  %3814 = vrot.lane.b32.xlu1 %v5118_v13, %s7298_s11 }
  0xfb   : > { %3809 = vrot.lane.b32.xlu0 %v5047_v7, %s7296_s16  ;;  %v5277_v60 = vsel %vm7332_vm0, %v3561_v24, %v3562_v52 }
  0xfc   : > { %v5183_v20 = vpop.permute.xlu1 %3564  ;;  %v300_v21 = vsel %vm7332_vm0, %v3551_v18, %v3552_v17 }
  0xfd   : > { %v3555_v22 = vpop.permute.xlu0 %3554  ;;  %v3057_v23 = vpack.c.bf16 %v300_v21, %v5031_v2  ;;  %v3567_v50 = vunpack.i.h.bf16 %v5183_v20  ;;  %v3566_v51 = vunpack.i.l.bf16 %v5183_v20 }
  0xfe   : > { %v3557_v25 = vunpack.i.h.bf16 %v3555_v22  ;;  %v3556_v26 = vunpack.i.l.bf16 %v3555_v22  ;;  %3824 = vrot.lane.b32.xlu1 %v5179_v19, %s7294_s24  ;;  %s7348_s24 = smov 8  }
  0xff   : > { %3058 = vmatprep.subr.bf16.mxu0 %v3057_v23  ;;  %3819 = vrot.lane.b32.xlu0 %v5118_v13, %s7296_s16  ;;  %v726_v57 = vsel %vm725_vm1, %v3566_v51, %v3567_v50 }
 0x100   : > { %v301_v27 = vsel %vm7332_vm0, %v3552_v17, %v3556_v26  ;;  %v5193_v28 = vpop.permute.xlu1 %3574  ;;  %v299_v29 = vsel %vm7332_vm0, %v3557_v25, %v3551_v18  ;;  %v302_v30 = vsel %vm7332_vm0, %v3556_v26, %v3561_v24 }
 0x101   : > { %v5199_v31 = vpop.permute.xlu0 %3569  ;;  %v3059_v32 = vpack.c.bf16 %v299_v29, %v5040_v5  ;;  %v3109_v33 = vpack.c.bf16 %v302_v30, %v5043_v6  ;;  %v3111_v34 = vpack.c.bf16 %v301_v27, %v5037_v4  ;;  %v3858_v43 = vpack.i.bf16 %v301_v27, %v300_v21 }
 0x102   : > { %628 = vrot.lane.b32.xlu1 %v5027_v0, %s7296_s16  ;;  %s7346_s16 = smov 16   ;;  %v3571_v47 = vunpack.i.l.bf16 %v5199_v31  ;;  %v3863_v48 = vpack.i.bf16 %v299_v29, %v5040_v5  ;;  %v3577_v58 = vunpack.i.h.bf16 %v5193_v28  ;;  %v3576_v59 = vunpack.i.l.bf16 %v5193_v28 }
 0x103   : > { %3829 = vrot.lane.b32.xlu0 %v5034_v3, %s7298_s11  ;;  %3060 = vmatpush1.bf16.msra.mxu0 %v3059_v32  ;;  %s7344_s11 = smov 7   ;;  %v3873_v63 = vpack.i.bf16 %v5277_v60, %v302_v30  ;;  %v3572_v11 = vunpack.i.h.bf16 %v5199_v31 }
 0x104   : > { %v5208_v35 = vpop.permute.xlu1 %3584  ;;  %3110 = vmatprep.subr.bf16.mxu1 %v3109_v33  ;;  %v727_v55 = vsel %vm725_vm1, %v3567_v50, %v3571_v47  ;;  %v747_v3 = vsel %vm746_vm2, %v3576_v59, %v3577_v58  ;;  %v3888_v4 = vpack.i.bf16 %v3576_v59, %v3566_v51 }
 0x105   : > { %v5210_v36 = vpop.permute.xlu0 %3579  ;;  %3112 = vmatpush1.bf16.msra.mxu1 %v3111_v34  ;;  %v3878_v62 = vpack.i.bf16 %v727_v55, %v726_v57  ;;  %v3586_v8 = vunpack.i.l.bf16 %v5208_v35  ;;  %v728_v27 = vsel %vm725_vm1, %v3571_v47, %v3572_v11 }
 0x106   : > { %3839 = vrot.lane.b32.xlu1 %v5047_v7, %s7348_s24  ;;  %v3581_v56 = vunpack.i.l.bf16 %v5210_v36 }
 0x107   : > { %3834 = vrot.lane.b32.xlu0 %v5047_v7, %s7346_s16  ;;  %v729_v20 = vsel %vm725_vm1, %v3572_v11, %v3586_v8 }
 0x108   : > { %v5216_v37 = vpop.permute.xlu1 %3594  ;;  %v748_v1 = vsel %vm746_vm2, %v3577_v58, %v3581_v56  ;;  %v3893_v30 = vpack.i.bf16 %v729_v20, %v728_v27 }
 0x109   : > { %v5218_v38 = vpop.permute.xlu0 %3589  ;;  %v3597_v24 = vunpack.i.h.bf16 %v5216_v37  ;;  %v3596_v25 = vunpack.i.l.bf16 %v5216_v37 }
 0x10a   : > { %3849 = vrot.lane.b32.xlu1 %v5118_v13, %s7348_s24  ;;  %v3591_v5 = vunpack.i.l.bf16 %v5218_v38 }
 0x10b   : > { %3844 = vrot.lane.b32.xlu0 %v5118_v13, %s7346_s16 }
 0x10c   : > { %v5224_v39 = vpop.permute.xlu1 %3604 }
 0x10d   : > { %v5226_v40 = vpop.permute.xlu0 %3599  ;;  %v3607_v21 = vunpack.i.h.bf16 %v5224_v39  ;;  %v3606_v22 = vunpack.i.l.bf16 %v5224_v39 }
 0x10e   : > { %685 = vrot.lane.b32.xlu1 %v5027_v0, %s7348_s24  ;;  %v3601_v18 = vunpack.i.l.bf16 %v5226_v40 }
 0x10f   : > { %656 = vrot.lane.b32.xlu0 %v5027_v0, %s7346_s16  ;;  %v789_v33 = vsel %vm7358_vm3, %v3606_v22, %v3607_v21  ;;  %v3913_v58 = vpack.i.bf16 %v3606_v22, %v3596_v25 }
 0x110   : > { %v5232_v41 = vpop.permute.xlu1 %3614  ;;  %v769_v32 = vsel %vm767_vm4, %v3597_v24, %v3601_v18 }
 0x111   : > { %v5234_v42 = vpop.permute.xlu0 %3609  ;;  %v3616_v39 = vunpack.i.l.bf16 %v5232_v41 }
 0x112   : > { %744 = vrot.lane.b32.xlu1 %v5171_v14, %s7315_s10  ;;  %v3611_v13 = vunpack.i.l.bf16 %v5234_v42  ;;  %v3612_v50 = vunpack.i.h.bf16 %v5234_v42  ;;  %s7452_s10 = smov 108  }
 0x113   : > { %723 = vrot.lane.b32.xlu0 %v5171_v14, %s7352_s26 }
 0x114   : > { %v5240_v44 = vpop.permute.xlu1 %3624  ;;  %v790_v31 = vsel %vm7358_vm3, %v3607_v21, %v3611_v13 }
 0x115   : > { %v5242_v45 = vpop.permute.xlu0 %3619  ;;  %v3908_v37 = vpack.i.bf16 %v790_v31, %v789_v33 }
 0x116   : > { %3859 = vrot.lane.b32.xlu1 %v3858_v43, %s7344_s11  ;;  %v3621_v51 = vunpack.i.l.bf16 %v5242_v45 }
 0x117   : > { %3854 = vrot.lane.b32.xlu0 %v5047_v7, %s7344_s11  ;;  %v3883_v7 = vpack.i.bf16 %v748_v1, %v747_v3 }
 0x118   : > { %v5247_v46 = vpop.permute.xlu1 %3634 }
 0x119   : > { %v5251_v49 = vpop.permute.xlu0 %3629  ;;  %v3637_v42 = vunpack.i.h.bf16 %v5247_v46 }
 0x11a   : > { %765 = vrot.lane.b32.xlu1 %v5171_v14, %s7313_s28  ;;  %s7451_s28 = smov 117  }
 0x11b   : > { %3864 = vrot.lane.b32.xlu0 %v3863_v48, %s7344_s11  ;;  %v3602_v48 = vunpack.i.h.bf16 %v5226_v40  ;;  %v3627_v40 = vunpack.i.h.bf16 %v5240_v44 }
 0x11c   : > { %v5259_v53 = vpop.permute.xlu1 %3644 }
 0x11d   : > { %v5261_v54 = vpop.permute.xlu0 %3639  ;;  %v771_v59 = vsel %vm767_vm4, %v3602_v48, %v3616_v39  ;;  %v3646_v1 = vunpack.i.l.bf16 %v5259_v53  ;;  %v770_v3 = vsel %vm767_vm4, %v3601_v18, %v3602_v48 }
 0x11e   : > { %3869 = vrot.lane.b32.xlu1 %v5060_v9, %s7344_s11  ;;  %v3582_v9 = vunpack.i.h.bf16 %v5210_v36  ;;  %v768_v36 = vsel %vm767_vm4, %v3596_v25, %v3597_v24  ;;  %v3641_v11 = vunpack.i.l.bf16 %v5261_v54  ;;  %v3642_v22 = vunpack.i.h.bf16 %v5261_v54 }
 0x11f   : > { %786 = vrot.lane.b32.xlu0 %v5171_v14, %s7353_s13  ;;  %v3903_v47 = vpack.i.bf16 %v769_v32, %v768_v36 }
 0x120   : > { %v5279_v61 = vpop.permute.xlu1 %3654  ;;  %v750_v17 = vsel %vm746_vm2, %v3582_v9, %v3591_v5  ;;  %v749_v23 = vsel %vm746_vm2, %v3581_v56, %v3582_v9  ;;  %v3631_v56 = vunpack.i.l.bf16 %v5251_v49  ;;  %v3923_v9 = vpack.i.bf16 %v771_v59, %v770_v3 }
 0x121   : > { %v5282_v0 = vpop.permute.xlu0 %3649  ;;  %v3898_v28 = vpack.i.bf16 %v750_v17, %v749_v23 }
 0x122   : > { %3879 = vrot.lane.b32.xlu1 %v3878_v62, %s7344_s11  ;;  %v3626_v62 = vunpack.i.l.bf16 %v5240_v44  ;;  %v791_v44 = vsel %vm7358_vm3, %v3611_v13, %v3612_v50  ;;  %v811_v21 = vsel %vm7343_vm5, %v3627_v40, %v3631_v56  ;;  %v3651_v54 = vunpack.i.l.bf16 %v5282_v0 }
 0x123   : > { %3874 = vrot.lane.b32.xlu0 %v3873_v63, %s7344_s11  ;;  %v3636_v63 = vunpack.i.l.bf16 %v5247_v46 }
 0x124   : > { %v5287_v2 = vpop.permute.xlu1 %3664 }
 0x125   : > { %v5291_v6 = vpop.permute.xlu0 %3659  ;;  %v831_v25 = vsel %vm7342_vm6, %v3636_v63, %v3637_v42  ;;  %v3943_v32 = vpack.i.bf16 %v3636_v63, %v3626_v62  ;;  %v5385_v63 = vunpack.i.l.bf16 %v5279_v61 }
 0x126   : > { %3889 = vrot.lane.b32.xlu1 %v3888_v4, %s7344_s11  ;;  %v3632_v4 = vunpack.i.h.bf16 %v5251_v49  ;;  %v810_v49 = vsel %vm7343_vm5, %v3626_v62, %v3627_v40  ;;  %v833_v40 = vsel %vm7342_vm6, %v3641_v11, %v3642_v22  ;;  %v3657_v62 = vunpack.i.h.bf16 %v5279_v61 }
 0x127   : > { %3884 = vrot.lane.b32.xlu0 %v3883_v7, %s7344_s11  ;;  %v3933_v31 = vpack.i.bf16 %v811_v21, %v810_v49  ;;  %v3667_v61 = vunpack.i.h.bf16 %v5287_v2 }
 0x128   : > { %v5298_v12 = vpop.permute.xlu1 %3674  ;;  %v5374_v27 = vsel %vm7343_vm5, %v3632_v4, %v3646_v1  ;;  %v812_v48 = vsel %vm7343_vm5, %v3631_v56, %v3632_v4 }
 0x129   : > { %v5301_v16 = vpop.permute.xlu0 %3669  ;;  %v3948_v59 = vpack.i.bf16 %v5374_v27, %v812_v48 }
 0x12a   : > { %828 = vrot.lane.b32.xlu1 %v5171_v14, %s7311_s7  ;;  %v3671_v21 = vunpack.i.l.bf16 %v5301_v16  ;;  %s7450_s7 = smov 116  }
 0x12b   : > { %807 = vrot.lane.b32.xlu0 %v5171_v14, %s7350_s6 }
 0x12c   : > { %v5319_v26 = vpop.permute.xlu1 %538 }
 0x12d   : > { %v5322_v29 = vpop.permute.xlu0 %3679 }
 0x12e   : > { %3899 = vrot.lane.b32.xlu1 %v3898_v28, %s7344_s11 }
 0x12f   : > { %3894 = vrot.lane.b32.xlu0 %v3893_v30, %s7344_s11 }
 0x130   : > { %v5329_v34 = vpop.permute.xlu1 %542 }
 0x131   : > { %v5333_v43 = vpop.permute.xlu0 %540 }
 0x132   : > { %3909 = vrot.lane.b32.xlu1 %v3908_v37, %s7344_s11 }
 0x133   : > { %3904 = vrot.lane.b32.xlu0 %v3903_v47, %s7344_s11  ;;  %v832_v47 = vsel %vm7342_vm6, %v3637_v42, %v3641_v11  ;;  %v3661_v42 = vunpack.i.l.bf16 %v5291_v6 }
 0x134   : > { %v5340_v55 = vpop.permute.xlu1 %546 }
 0x135   : > { %v5343_v57 = vpop.permute.xlu0 %544 }
 0x136   : > { %3919 = vrot.lane.b32.xlu1 %v5179_v19, %s7309_s27  ;;  %v792_v19 = vsel %vm7358_vm3, %v3612_v50, %v3621_v51  ;;  %s7449_s27 = smov 126  }
 0x137   : > { %3914 = vrot.lane.b32.xlu0 %v3913_v58, %s7344_s11  ;;  %v3928_v24 = vpack.i.bf16 %v792_v19, %v791_v44  ;;  %v834_v44 = vsel %vm7342_vm6, %v3642_v22, %v3651_v54  ;;  %v3666_v22 = vunpack.i.l.bf16 %v5287_v2 }
 0x138   : > { %v3690_v7 = vpop.permute.xlu1 %3689 }
 0x139   : > { %v3692_v17 = vunpack.i.h.bf16 %v3690_v7  ;;  %v3691_v46 = vunpack.i.l.bf16 %v3690_v7  ;;  %v3685_v20 = vpop.permute.xlu0 %3684 }
 0x13a   : > { %v3687_v18 = vunpack.i.h.bf16 %v3685_v20  ;;  %v3686_v23 = vunpack.i.l.bf16 %v3685_v20  ;;  %3924 = vrot.lane.b32.xlu1 %v3923_v9, %s7344_s11  ;;  %v3938_v9 = vpack.i.bf16 %v832_v47, %v831_v25  ;;  %v853_v47 = vsel %vm7341_vm11, %v3667_v61, %v3671_v21 }
 0x13b   : > { %849 = vrot.lane.b32.xlu0 %v5171_v14, %s7323_s8  ;;  %v356_v13 = vsel %vm354_vm8, %v3691_v46, %v3692_v17  ;;  %s7455_s8 = smov 18  }
 0x13c   : > { %v3700_v28 = vpop.permute.xlu1 %3699  ;;  %v328_v30 = vsel %vm7300_vm7, %v3686_v23, %v3687_v18 }
 0x13d   : > { %v3701_v33 = vunpack.i.l.bf16 %v3700_v28  ;;  %v3695_v36 = vpop.permute.xlu0 %3694  ;;  %v3061_v37 = vpack.c.bf16 %v356_v13, %v328_v30  ;;  %v3702_v50 = vunpack.i.h.bf16 %v3700_v28  ;;  %v5418_v28 = vsel %vm522_vm9, %v3657_v62, %v3661_v42 }
 0x13e   : > { %v3696_v58 = vunpack.i.l.bf16 %v3695_v36  ;;  %3934 = vrot.lane.b32.xlu1 %v3933_v31, %s7344_s11  ;;  %v3697_v3 = vunpack.i.h.bf16 %v3695_v36  ;;  %v3953_v30 = vpack.i.bf16 %v834_v44, %v833_v40 }
 0x13f   : > { %3062 = vmatprep.subr.bf16.mxu0 %v3061_v37  ;;  %3929 = vrot.lane.b32.xlu0 %v3928_v24, %s7344_s11  ;;  %v355_v56 = vsel %vm354_vm8, %v3701_v33, %v3691_v46  ;;  %v357_v13 = vsel %vm354_vm8, %v3692_v17, %v3702_v50 }
 0x140   : > { %v5390_v4 = vpop.permute.xlu1 %3709  ;;  %v327_v7 = vsel %vm7300_vm7, %v3696_v58, %v3686_v23  ;;  %v329_v27 = vsel %vm7300_vm7, %v3687_v18, %v3697_v3 }
 0x141   : > { %v7331_v19 = vunpack.i.h.bf16 %v5390_v4  ;;  %v3711_v11 = vunpack.i.l.bf16 %v5390_v4  ;;  %v5399_v20 = vpop.permute.xlu0 %3704  ;;  %v3063_v46 = vpack.c.bf16 %v355_v56, %v327_v7  ;;  %v3115_v58 = vpack.c.bf16 %v357_v13, %v329_v27 }
 0x142   : > { %v7327_v49 = vunpack.i.h.bf16 %v5399_v20  ;;  %v3706_v23 = vunpack.i.l.bf16 %v5399_v20  ;;  %3944 = vrot.lane.b32.xlu1 %v3943_v32, %s7344_s11  ;;  %v5432_v56 = vsel %vm522_vm9, %v5385_v63, %v3657_v62 }
 0x143   : > { %v5410_v24 = vsel %vm354_vm8, %v3711_v11, %v7331_v19  ;;  %3064 = vmatpush1.bf16.msra.mxu0 %v3063_v46  ;;  %3939 = vrot.lane.b32.xlu0 %v3938_v9, %s7344_s11  ;;  %v358_v25 = vsel %vm354_vm8, %v3702_v50, %v3711_v11  ;;  %v3963_v44 = vpack.i.bf16 %v5418_v28, %v5432_v56  ;;  %v3681_v11 = vunpack.i.l.bf16 %v5322_v29 }
 0x144   : > { %v5423_v2 = vsel %vm7300_vm7, %v3706_v23, %v7327_v49  ;;  %v3720_v17 = vpop.permute.xlu1 %3719  ;;  %v330_v31 = vsel %vm7300_vm7, %v3697_v3, %v3706_v23  ;;  %v852_v3 = vsel %vm7341_vm11, %v3666_v22, %v3667_v61  ;;  %vm7357_vm7 = vcmask 719872  }
 0x145   : > { %v3722_v32 = vunpack.i.h.bf16 %v3720_v17  ;;  %v3721_v33 = vunpack.i.l.bf16 %v3720_v17  ;;  %v3715_v36 = vpop.permute.xlu0 %3714  ;;  %v3113_v37 = vpack.c.bf16 %v358_v25, %v330_v31  ;;  %v3958_v13 = vpack.i.bf16 %v853_v47, %v852_v3 }
 0x146   : > { %v3717_v48 = vunpack.i.h.bf16 %v3715_v36  ;;  %v3716_v50 = vunpack.i.l.bf16 %v3715_v36  ;;  %3954 = vrot.lane.b32.xlu1 %v3953_v30, %s7344_s11  ;;  %v3968_v30 = vpack.i.bf16 %v5385_v63, %v3666_v22  ;;  %v3676_v31 = vunpack.i.l.bf16 %v5298_v12 }
 0x147   : > { %3949 = vrot.lane.b32.xlu0 %v3948_v59, %s7344_s11  ;;  %3114 = vmatprep.subr.bf16.mxu1 %v3113_v37  ;;  %v412_v40 = vsel %vm7329_vm10, %v3721_v33, %v3722_v32  ;;  %v3672_v59 = vunpack.i.h.bf16 %v5301_v16 }
 0x148   : > { %3116 = vmatpush1.bf16.msra.mxu1 %v3115_v58  ;;  %v3730_v7 = vpop.permute.xlu1 %3729  ;;  %v384_v9 = vsel %vm7301_vm12, %v3716_v50, %v3717_v48 }
 0x149   : > { %v3731_v46 = vunpack.i.l.bf16 %v3730_v7  ;;  %v3725_v23 = vpop.permute.xlu0 %3724  ;;  %v3065_v62 = vpack.c.bf16 %v412_v40, %v384_v9  ;;  %v3732_v25 = vunpack.i.h.bf16 %v3730_v7  ;;  %v855_v37 = vsel %vm7341_vm11, %v3672_v59, %v3681_v11 }
 0x14a   : > { %v3726_v27 = vunpack.i.l.bf16 %v3725_v23  ;;  %3964 = vrot.lane.b32.xlu1 %v3963_v44, %s7344_s11  ;;  %v3727_v61 = vunpack.i.h.bf16 %v3725_v23  ;;  %v854_v22 = vsel %vm7341_vm11, %v3671_v21, %v3672_v59  ;;  %v3662_v9 = vunpack.i.h.bf16 %v5291_v6  ;;  %v5479_v59 = vld [vmem:[#allocation7 + $0x8] sm:$0xff] }
 0x14b   : > { %3066 = vmatprep.subr.bf16.mxu0 %v3065_v62  ;;  %3959 = vrot.lane.b32.xlu0 %v3958_v13, %s7344_s11  ;;  %v411_v17 = vsel %vm7329_vm10, %v3731_v46, %v3721_v33  ;;  %v3973_v62 = vpack.i.bf16 %v855_v37, %v854_v22 }
 0x14c   : > { %v5447_v36 = vpop.permute.xlu1 %3739  ;;  %v383_v16 = vsel %vm7301_vm12, %v3726_v27, %v3716_v50  ;;  %v413_v50 = vsel %vm7329_vm10, %v3722_v32, %v3732_v25  ;;  %v385_v46 = vsel %vm7301_vm12, %v3717_v48, %v3727_v61  ;;  %3038 = vmatprep.mubr.msk.f32.mxu0 %vm7357_vm7, %v5479_v59  ;;  %3040 = vmatprep.mubr.msk.f32.mxu1 %vm7357_vm7, %v5479_v59 }
 0x14d   : > { %v7306_v47 = vunpack.i.h.bf16 %v5447_v36  ;;  %v3741_v58 = vunpack.i.l.bf16 %v5447_v36  ;;  %v5455_v33 = vpop.permute.xlu0 %3734  ;;  %v3067_v40 = vpack.c.bf16 %v411_v17, %v383_v16 }
 0x14e   : > { %v7303_v3 = vunpack.i.h.bf16 %v5455_v33  ;;  %v3736_v7 = vunpack.i.l.bf16 %v5455_v33  ;;  %861 = vrot.lane.b32.xlu1 %v5171_v14, %s7307_s9 }
 0x14f   : > { %v5467_v44 = vsel %vm7329_vm10, %v3741_v58, %v7306_v47  ;;  %3068 = vmatpush1.bf16.msra.mxu0 %v3067_v40  ;;  %548 = vrot.lane.b32.xlu0 %v5063_v10, %s7307_s9  ;;  %v414_v21 = vsel %vm7329_vm10, %v3732_v25, %v3741_v58  ;;  %v5490_v25 = vsel %vm522_vm9, %v3662_v9, %v3676_v31  ;;  %s7448_s9 = smov 118   ;;  %vm693_vm10 = vcmask 64512  }
 0x150   : > { %v5476_v23 = vsel %vm7301_vm12, %v3736_v7, %v7303_v3  ;;  %v3750_v32 = vpop.permute.xlu1 %3749  ;;  %v386_v13 = vsel %vm7301_vm12, %v3727_v61, %v3736_v7  ;;  %v3119_v58 = vpack.c.bf16 %v413_v50, %v385_v46  ;;  %v5498_v7 = vsel %vm522_vm9, %v3661_v42, %v3662_v9 }
 0x151   : > { %v3752_v27 = vunpack.i.h.bf16 %v3750_v32  ;;  %v3751_v17 = vunpack.i.l.bf16 %v3750_v32  ;;  %v3745_v16 = vpop.permute.xlu0 %3744  ;;  %v3117_v40 = vpack.c.bf16 %v414_v21, %v386_v13  ;;  %v3978_v50 = vpack.i.bf16 %v5490_v25, %v5498_v7 }
 0x152   : > { %v3747_v61 = vunpack.i.h.bf16 %v3745_v16  ;;  %v3746_v37 = vunpack.i.l.bf16 %v3745_v16  ;;  %3974 = vrot.lane.b32.xlu1 %v3973_v62, %s7344_s11  ;;  %vm7317_vm12 = vcmask 867328  }
 0x153   : > { %3969 = vrot.lane.b32.xlu0 %v3968_v30, %s7344_s11  ;;  %3118 = vmatprep.subr.bf16.mxu1 %v3117_v40  ;;  %v468_v22 = vsel %vm7318_vm15, %v3751_v17, %v3752_v27  ;;  %v5506_v30 = vsel %vm550_vm14, %v5319_v26, %v5333_v43 }
 0x154   : > { %3120 = vmatpush1.bf16.msra.mxu1 %v3119_v58  ;;  %v3760_v21 = vpop.permute.xlu1 %3759  ;;  %v440_v32 = vsel %vm7305_vm13, %v3746_v37, %v3747_v61 }
 0x155   : > { %v3761_v13 = vunpack.i.l.bf16 %v3760_v21  ;;  %v3755_v48 = vpop.permute.xlu0 %3754  ;;  %v3069_v16 = vpack.c.bf16 %v468_v22, %v440_v32  ;;  %v3762_v46 = vunpack.i.h.bf16 %v3760_v21 }
 0x156   : > { %v3756_v6 = vunpack.i.l.bf16 %v3755_v48  ;;  %1026 = vrot.lane.b32.xlu1 %v5506_v30, %s7344_s11  ;;  %v3757_v42 = vunpack.i.h.bf16 %v3755_v48 }
 0x157   : > { %3070 = vmatprep.subr.bf16.mxu0 %v3069_v16  ;;  %3979 = vrot.lane.b32.xlu0 %v3978_v50, %s7344_s11  ;;  %v467_v9 = vsel %vm7318_vm15, %v3761_v13, %v3751_v17  ;;  %v5524_v16 = vsel %vm550_vm14, %v5333_v43, %v5329_v34  ;;  %v469_v17 = vsel %vm7318_vm15, %v3752_v27, %v3762_v46  ;;  %v3677_v43 = vunpack.i.h.bf16 %v5298_v12 }
 0x158   : > { %v5512_v62 = vpop.permute.xlu1 %3769  ;;  %v439_v40 = vsel %vm7305_vm13, %v3756_v6, %v3746_v37  ;;  %v441_v50 = vsel %vm7305_vm13, %v3747_v61, %v3757_v42 }
 0x159   : > { %v7302_v58 = vunpack.i.h.bf16 %v5512_v62  ;;  %v3771_v22 = vunpack.i.l.bf16 %v5512_v62  ;;  %v5517_v32 = vpop.permute.xlu0 %3764  ;;  %v3071_v21 = vpack.c.bf16 %v467_v9, %v439_v40  ;;  %v523_v61 = vsel %vm522_vm9, %v3677_v43, %v5385_v63 }
 0x15a   : > { %v7304_v18 = vunpack.i.h.bf16 %v5517_v32  ;;  %v3766_v48 = vunpack.i.l.bf16 %v5517_v32  ;;  %1024 = vrot.lane.b32.xlu1 %v5319_v26, %s7344_s11 }
 0x15b   : > { %v5532_v37 = vsel %vm7318_vm15, %v3771_v22, %v7302_v58  ;;  %3072 = vmatpush1.bf16.msra.mxu0 %v3071_v21  ;;  %1028 = vrot.lane.b32.xlu0 %v5524_v16, %s7344_s11  ;;  %v470_v13 = vsel %vm7318_vm15, %v3762_v46, %v3771_v22  ;;  %v5548_v58 = vsel %vm550_vm14, %v5343_v57, %v5340_v55  ;;  %vm634_vm15 = vcmask 138240  }
 0x15c   : > { %v5542_v6 = vsel %vm7305_vm13, %v3766_v48, %v7304_v18  ;;  %v3780_v27 = vpop.permute.xlu1 %3779  ;;  %v442_v9 = vsel %vm7305_vm13, %v3757_v42, %v3766_v48  ;;  %v5555_v18 = vsel %vm550_vm14, %v5329_v34, %v5343_v57  ;;  %v3123_v42 = vpack.c.bf16 %v469_v17, %v441_v50 }
 0x15d   : > { %v3781_v40 = vunpack.i.l.bf16 %v3780_v27  ;;  %v3775_v21 = vpop.permute.xlu0 %3774  ;;  %v3121_v46 = vpack.c.bf16 %v470_v13, %v442_v9  ;;  %v3782_v48 = vunpack.i.h.bf16 %v3780_v27  ;;  %vm7328_vm13 = vcmask 211968  }
 0x15e   : > { %v3777_v22 = vunpack.i.h.bf16 %v3775_v21  ;;  %v3776_v3 = vunpack.i.l.bf16 %v3775_v21  ;;  %1032 = vrot.lane.b32.xlu1 %v5548_v58, %s7344_s11 }
 0x15f   : > { %1030 = vrot.lane.b32.xlu0 %v5555_v18, %s7344_s11  ;;  %3122 = vmatprep.subr.bf16.mxu1 %v3121_v46 }
 0x160   : > { %3124 = vmatpush1.bf16.msra.mxu1 %v3123_v42  ;;  %v3790_v13 = vpop.permute.xlu1 %3789  ;;  %v496_v9 = vsel %vm7317_vm12, %v3776_v3, %v3777_v22  ;;  %v495_v21 = vsel %vm7317_vm12, %v3781_v40, %v3776_v3  ;;  %v497_v3 = vsel %vm7317_vm12, %v3777_v22, %v3782_v48 }
 0x161   : > { %v3792_v34 = vunpack.i.h.bf16 %v3790_v13  ;;  %v3791_v57 = vunpack.i.l.bf16 %v3790_v13  ;;  %v5565_v47 = vpop.permute.xlu0 %3784  ;;  %v3073_v17 = vpack.c.bf16 %v5432_v56, %v496_v9  ;;  %v3075_v50 = vpack.c.bf16 %v523_v61, %v495_v21 }
 0x162   : > { %v7326_v27 = vunpack.i.h.bf16 %v5565_v47  ;;  %v3786_v46 = vunpack.i.l.bf16 %v5565_v47  ;;  %352 = vrot.lane.b32.xlu1 %v5063_v10, %s7448_s9  ;;  %v3127_v22 = vpack.c.bf16 %v5418_v28, %v497_v3  ;;  %v5599_v28 = vld [vmem:[%s5016_s30 + $0x30] sm:$0xff] }
 0x163   : > { %3074 = vmatprep.subr.bf16.mxu0 %v3073_v17  ;;  %324 = vrot.lane.b32.xlu0 %v5063_v10, %s7449_s27  ;;  %v580_v63 = vsel %vm7328_vm13, %v3791_v57, %v3792_v34 }
 0x164   : > { %v5579_v56 = vsel %vm7317_vm12, %v3786_v46, %v7326_v27  ;;  %3076 = vmatpush1.bf16.msra.mxu0 %v3075_v50  ;;  %v3795_v43 = vpop.permute.xlu1 %3794  ;;  %v3077_v40 = vpack.c.bf16 %v580_v63, %v5506_v30  ;;  %v498_v61 = vsel %vm7317_vm12, %v3782_v48, %v3786_v46  ;;  %vm606_vm12 = vcmask 146432  }
 0x165   : > { %v3796_v42 = vunpack.i.l.bf16 %v3795_v43  ;;  %v537_v13 = vpop.permute.xlu0 %536  ;;  %v3125_v9 = vpack.c.bf16 %v5498_v7, %v498_v61  ;;  %v3797_v17 = vunpack.i.h.bf16 %v3795_v43 }
 0x166   : > { %3078 = vmatprep.subr.bf16.mxu0 %v3077_v40  ;;  %408 = vrot.lane.b32.xlu1 %v5063_v10, %s7450_s7  ;;  %v551_v30 = vsel %vm550_vm14, %v537_v13, %v5319_v26 }
 0x167   : > { %v579_v50 = vsel %vm7328_vm13, %v3796_v42, %v3791_v57  ;;  %380 = vrot.lane.b32.xlu0 %v5063_v10, %s7451_s28  ;;  %3126 = vmatprep.subr.bf16.mxu1 %v3125_v9  ;;  %v581_v10 = vsel %vm7328_vm13, %v3792_v34, %v3797_v17 }
 0x168   : > { %v3079_v7 = vpack.c.bf16 %v579_v50, %v551_v30  ;;  %3128 = vmatpush1.bf16.msra.mxu1 %v3127_v22  ;;  %v3805_v48 = vpop.permute.xlu1 %3804  ;;  %v3131_v50 = vpack.c.bf16 %v581_v10, %v5524_v16  ;;  %v5619_v30 = vld [vmem:[%s5016_s30 + $0x28] sm:$0xff] }
 0x169   : > { %v5594_v46 = vpop.permute.xlu0 %3799  ;;  %v3807_v26 = vunpack.i.h.bf16 %v3805_v48  ;;  %v3806_v57 = vunpack.i.l.bf16 %v3805_v48 }
 0x16a   : > { %v7325_v63 = vunpack.i.h.bf16 %v5594_v46  ;;  %v3801_v40 = vunpack.i.l.bf16 %v5594_v46  ;;  %3080 = vmatpush1.bf16.msra.mxu0 %v3079_v7  ;;  %464 = vrot.lane.b32.xlu1 %v5599_v28, %s7319_s14  ;;  %s7453_s14 = smov 106  }
 0x16b   : > { %436 = vrot.lane.b32.xlu0 %v5599_v28, %s7452_s10  ;;  %v608_v48 = vsel %vm606_vm12, %v3806_v57, %v3807_v26 }
 0x16c   : > { %v5609_v3 = vsel %vm7328_vm13, %v3801_v40, %v7325_v63  ;;  %v3815_v43 = vpop.permute.xlu1 %3814  ;;  %v582_v61 = vsel %vm7328_vm13, %v3797_v17, %v3801_v40  ;;  %v3983_v17 = vpack.i.bf16 %v5599_v28, %v5619_v30  ;;  %vm662_vm13 = vcmask 130048  }
 0x16d   : > { %v3810_v42 = vpop.permute.xlu0 %3809  ;;  %v3129_v13 = vpack.c.bf16 %v582_v61, %v5555_v18  ;;  %v3816_v18 = vunpack.i.l.bf16 %v3815_v43  ;;  %v3817_v10 = vunpack.i.h.bf16 %v3815_v43 }
 0x16e   : > { %v3812_v22 = vunpack.i.h.bf16 %v3810_v42  ;;  %v3811_v34 = vunpack.i.l.bf16 %v3810_v42  ;;  %576 = vrot.lane.b32.xlu1 %v5599_v28, %s7321_s12  ;;  %s7454_s12 = smov 17  }
 0x16f   : > { %492 = vrot.lane.b32.xlu0 %v5599_v28, %s7453_s14  ;;  %3130 = vmatprep.subr.bf16.mxu1 %v3129_v13  ;;  %v607_v13 = vsel %vm606_vm12, %v3816_v18, %v3806_v57  ;;  %v609_v18 = vsel %vm606_vm12, %v3807_v26, %v3817_v10 }
 0x170   : > { %3132 = vmatpush1.bf16.msra.mxu1 %v3131_v50  ;;  %v3825_v7 = vpop.permute.xlu1 %3824  ;;  %v636_v40 = vsel %vm634_vm15, %v3811_v34, %v3812_v22 }
 0x171   : > { %v3820_v61 = vpop.permute.xlu0 %3819  ;;  %v3081_v42 = vpack.c.bf16 %v636_v40, %v608_v48  ;;  %v5634_v63 = vunpack.i.l.bf16 %v3825_v7  ;;  %v3827_v40 = vunpack.i.h.bf16 %v3825_v7 }
 0x172   : > { %v3821_v9 = vunpack.i.l.bf16 %v3820_v61  ;;  %3984 = vrot.lane.b32.xlu1 %v3983_v17, %s7454_s12  ;;  %v3822_v16 = vunpack.i.h.bf16 %v3820_v61 }
 0x173   : > { %3082 = vmatprep.subr.bf16.mxu0 %v3081_v42  ;;  %604 = vrot.lane.b32.xlu0 %v5599_v28, %s7455_s8  ;;  %v5652_v7 = vsel %vm7332_vm0, %v3562_v52, %v5634_v63  ;;  %v4008_v52 = vpack.i.bf16 %v3827_v40, %v5171_v14 }
 0x174   : > { %v5630_v21 = vpop.permute.xlu1 %628  ;;  %v635_v50 = vsel %vm634_vm15, %v3821_v9, %v3811_v34  ;;  %v637_v43 = vsel %vm634_vm15, %v3812_v22, %v3822_v16 }
 0x175   : > { %v5636_v27 = vpop.permute.xlu0 %3829  ;;  %v3083_v48 = vpack.c.bf16 %v635_v50, %v607_v13  ;;  %v638_v57 = vsel %vm634_vm15, %v3822_v16, %v5630_v21  ;;  %v710_v16 = vsel %vm7332_vm0, %v5634_v63, %v3827_v40  ;;  %vm7356_vm0 = vcmask 56320  }
 0x176   : > { %v7330_v49 = vunpack.i.l.bf16 %v5636_v27  ;;  %3994 = vrot.lane.b32.xlu1 %v3983_v17, %s7348_s24 }
 0x177   : > { %3084 = vmatpush1.bf16.msra.mxu0 %v3083_v48  ;;  %3989 = vrot.lane.b32.xlu0 %v3983_v17, %s7346_s16  ;;  %s7498_s16 = smov 47  }
 0x178   : > { %v3840_v9 = vpop.permute.xlu1 %3839  ;;  %v610_v34 = vsel %vm606_vm12, %v3817_v10, %v7330_v49  ;;  %v3135_v49 = vpack.c.bf16 %v637_v43, %v609_v18 }
 0x179   : > { %v3842_v61 = vunpack.i.h.bf16 %v3840_v9  ;;  %v3841_v22 = vunpack.i.l.bf16 %v3840_v9  ;;  %v3835_v42 = vpop.permute.xlu0 %3834  ;;  %v3133_v13 = vpack.c.bf16 %v638_v57, %v610_v34 }
 0x17a   : > { %v3837_v50 = vunpack.i.h.bf16 %v3835_v42  ;;  %v3836_v48 = vunpack.i.l.bf16 %v3835_v42  ;;  %3999 = vrot.lane.b32.xlu1 %v3983_v17, %s7344_s11  ;;  %v4003_v42 = vpack.i.bf16 %v710_v16, %v5652_v7 }
 0x17b   : > { %691 = vrot.lane.b32.xlu0 %v5171_v14, %s7348_s24  ;;  %3134 = vmatprep.subr.bf16.mxu1 %v3133_v13  ;;  %v695_v15 = vsel %vm693_vm10, %v3841_v22, %v3842_v61  ;;  %v3592_v14 = vunpack.i.h.bf16 %v5218_v38  ;;  %v3617_v38 = vunpack.i.h.bf16 %v5232_v41  ;;  %s7499_s24 = smov 37  }
 0x17c   : > { %3136 = vmatpush1.bf16.msra.mxu1 %v3135_v49  ;;  %v3850_v26 = vpop.permute.xlu1 %3849  ;;  %v664_v10 = vsel %vm662_vm13, %v3836_v48, %v3837_v50 }
 0x17d   : > { %v3852_v57 = vunpack.i.h.bf16 %v3850_v26  ;;  %v3851_v9 = vunpack.i.l.bf16 %v3850_v26  ;;  %v3845_v34 = vpop.permute.xlu0 %3844  ;;  %v3085_v19 = vpack.c.bf16 %v695_v15, %v664_v10 }
 0x17e   : > { %v3847_v17 = vunpack.i.h.bf16 %v3845_v34  ;;  %v3846_v43 = vunpack.i.l.bf16 %v3845_v34  ;;  %4009 = vrot.lane.b32.xlu1 %v4008_v52, %s7344_s11  ;;  %v3587_v52 = vunpack.i.h.bf16 %v5208_v35 }
 0x17f   : > { %3086 = vmatprep.subr.bf16.mxu0 %v3085_v19  ;;  %4004 = vrot.lane.b32.xlu0 %v4003_v42, %s7344_s11  ;;  %v694_v18 = vsel %vm693_vm10, %v3851_v9, %v3841_v22  ;;  %v696_v19 = vsel %vm693_vm10, %v3842_v61, %v3852_v57 }
 0x180   : > { %v5667_v49 = vpop.permute.xlu1 %685  ;;  %v663_v40 = vsel %vm662_vm13, %v3846_v43, %v3836_v48  ;;  %v665_v26 = vsel %vm662_vm13, %v3837_v50, %v3847_v17  ;;  %v751_v48 = vsel %vm746_vm2, %v3591_v5, %v3592_v14  ;;  %v730_v61 = vsel %vm725_vm1, %v3586_v8, %v3587_v52 }
 0x181   : > { %v697_v13 = vsel %vm693_vm10, %v3852_v57, %v5667_v49  ;;  %v5672_v15 = vpop.permute.xlu0 %656  ;;  %v3087_v16 = vpack.c.bf16 %v694_v18, %v663_v40  ;;  %v3139_v34 = vpack.c.bf16 %v696_v19, %v665_v26 }
 0x182   : > { %v666_v22 = vsel %vm662_vm13, %v3847_v17, %v5672_v15 }
 0x183   : > { %3088 = vmatpush1.bf16.msra.mxu0 %v3087_v16  ;;  %v3137_v10 = vpack.c.bf16 %v697_v13, %v666_v22  ;;  %v772_v22 = vsel %vm767_vm4, %v3616_v39, %v3617_v38 }
 0x184   : > { %v745_v9 = vpop.permute.xlu1 %744 }
 0x185   : > { %v752_v42 = vsel %vm746_vm2, %v3592_v14, %v745_v9  ;;  %v724_v43 = vpop.permute.xlu0 %723  ;;  %3138 = vmatprep.subr.bf16.mxu1 %v3137_v10 }
 0x186   : > { %v4018_v50 = vpack.i.bf16 %v752_v42, %v751_v48  ;;  %v731_v57 = vsel %vm725_vm1, %v3587_v52, %v724_v43  ;;  %3140 = vmatpush1.bf16.msra.mxu1 %v3139_v34  ;;  %v4023_v35 = vpack.i.bf16 %v745_v9, %v724_v43  ;;  %v3622_v48 = vunpack.i.h.bf16 %v5242_v45 }
 0x187   : > { %v4013_v17 = vpack.i.bf16 %v731_v57, %v730_v61 }
 0x188   : > { %4019 = vrot.lane.b32.xlu1 %v4018_v50, %s7344_s11  ;;  %v3860_v18 = vpop.permute.xlu1 %3859  ;;  %v793_v39 = vsel %vm7358_vm3, %v3621_v51, %v3622_v48 }
 0x189   : > { %v3855_v5 = vpop.permute.xlu0 %3854  ;;  %4014 = vrot.lane.b32.xlu0 %v4013_v17, %s7344_s11  ;;  %v3862_v14 = vunpack.i.h.bf16 %v3860_v18  ;;  %v3861_v40 = vunpack.i.l.bf16 %v3860_v18 }
 0x18a   : > { %v3857_v13 = vunpack.i.h.bf16 %v3855_v5  ;;  %v3856_v16 = vunpack.i.l.bf16 %v3855_v5 }
 0x18b   : > { %v1049_v8 = vsel %vm7356_vm0, %v3861_v40, %v3862_v14 }
 0x18c   : > { %v766_v26 = vpop.permute.xlu1 %765  ;;  %v1042_v19 = vsel %vm7356_vm0, %v3856_v16, %v3857_v13 }
 0x18d   : > { %v3865_v52 = vpop.permute.xlu0 %3864  ;;  %4024 = vrot.lane.b32.xlu0 %v4023_v35, %s7344_s11  ;;  %v773_v10 = vsel %vm767_vm4, %v3617_v38, %v766_v26  ;;  %v3089_v34 = vpack.c.bf16 %v1049_v8, %v1042_v19  ;;  %v3652_v19 = vunpack.i.h.bf16 %v5282_v0 }
 0x18e   : > { %v3867_v42 = vunpack.i.h.bf16 %v3865_v52  ;;  %v3866_v50 = vunpack.i.l.bf16 %v3865_v52  ;;  %v4028_v9 = vpack.i.bf16 %v773_v10, %v772_v22 }
 0x18f   : > { %3090 = vmatprep.subr.bf16.mxu0 %v3089_v34 }
 0x190   : > { %4029 = vrot.lane.b32.xlu1 %v4028_v9, %s7344_s11  ;;  %v5699_v43 = vpop.permute.xlu1 %3869  ;;  %v1041_v61 = vsel %vm7356_vm0, %v3866_v50, %v3856_v16  ;;  %v1048_v57 = vsel %vm7356_vm0, %v3867_v42, %v3861_v40 }
 0x191   : > { %v787_v41 = vpop.permute.xlu0 %786  ;;  %v3091_v17 = vpack.c.bf16 %v1048_v57, %v1041_v61  ;;  %v3872_v35 = vunpack.i.h.bf16 %v5699_v43  ;;  %v3871_v8 = vunpack.i.l.bf16 %v5699_v43 }
 0x192   : > { %v794_v18 = vsel %vm7358_vm3, %v3622_v48, %v787_v41  ;;  %v4038_v38 = vpack.i.bf16 %v787_v41, %v766_v26 }
 0x193   : > { %v4033_v5 = vpack.i.bf16 %v794_v18, %v793_v39  ;;  %3092 = vmatpush1.bf16.msra.mxu0 %v3091_v17  ;;  %v1044_v26 = vsel %vm7356_vm0, %v3871_v8, %v3872_v35  ;;  %v1043_v52 = vsel %vm7356_vm0, %v3857_v13, %v3871_v8  ;;  %v3647_v17 = vunpack.i.h.bf16 %v5259_v53 }
 0x194   : > { %4039 = vrot.lane.b32.xlu1 %v4038_v38, %s7344_s11  ;;  %v3880_v16 = vpop.permute.xlu1 %3879 }
 0x195   : > { %4034 = vrot.lane.b32.xlu0 %v4033_v5, %s7344_s11  ;;  %v5711_v40 = vpop.permute.xlu0 %3874  ;;  %v3882_v22 = vunpack.i.h.bf16 %v3880_v16  ;;  %v3881_v10 = vunpack.i.l.bf16 %v3880_v16 }
 0x196   : > { %v3877_v45 = vunpack.i.h.bf16 %v5711_v40  ;;  %v3876_v51 = vunpack.i.l.bf16 %v5711_v40 }
 0x197   : > { %v1056_v5 = vsel %vm7356_vm0, %v3881_v10, %v3882_v22 }
 0x198   : > { %v3890_v34 = vpop.permute.xlu1 %3889  ;;  %v1051_v48 = vsel %vm7356_vm0, %v3876_v51, %v3877_v45  ;;  %v1050_v42 = vsel %vm7356_vm0, %v3862_v14, %v3876_v51  ;;  %v835_v51 = vsel %vm7342_vm6, %v3651_v54, %v3652_v19 }
 0x199   : > { %v3885_v50 = vpop.permute.xlu0 %3884  ;;  %v3892_v9 = vunpack.i.h.bf16 %v3890_v34  ;;  %v3891_v61 = vunpack.i.l.bf16 %v3890_v34  ;;  %v3141_v57 = vpack.c.bf16 %v1051_v48, %v1044_v26  ;;  %v3143_v41 = vpack.c.bf16 %v1050_v42, %v1043_v52 }
 0x19a   : > { %v3887_v39 = vunpack.i.h.bf16 %v3885_v50  ;;  %v3886_v18 = vunpack.i.l.bf16 %v3885_v50  ;;  %v814_v48 = vsel %vm7343_vm5, %v3646_v1, %v3647_v17 }
 0x19b   : > { %3142 = vmatprep.subr.bf16.mxu1 %v3141_v57  ;;  %v1055_v13 = vsel %vm7356_vm0, %v3891_v61, %v3881_v10 }
 0x19c   : > { %3144 = vmatpush1.bf16.msra.mxu1 %v3143_v41  ;;  %v829_v38 = vpop.permute.xlu1 %828  ;;  %v1063_v8 = vsel %vm7356_vm0, %v3886_v18, %v3887_v39  ;;  %v1062_v14 = vsel %vm7356_vm0, %v3892_v9, %v3886_v18 }
 0x19d   : > { %v808_v16 = vpop.permute.xlu0 %807  ;;  %v836_v26 = vsel %vm7342_vm6, %v3652_v19, %v829_v38  ;;  %v3093_v52 = vpack.c.bf16 %v1063_v8, %v1056_v5  ;;  %v3095_v34 = vpack.c.bf16 %v1062_v14, %v1055_v13  ;;  %vm7462_vm6 = vcmask 957440  }
 0x19e   : > { %v815_v42 = vsel %vm7343_vm5, %v3647_v17, %v808_v16  ;;  %v4048_v10 = vpack.i.bf16 %v836_v26, %v835_v51  ;;  %v4053_v61 = vpack.i.bf16 %v829_v38, %v808_v16  ;;  %vm7473_vm5 = vcmask 211968  }
 0x19f   : > { %v4043_v50 = vpack.i.bf16 %v815_v42, %v814_v48  ;;  %3094 = vmatprep.subr.bf16.mxu0 %v3093_v52 }
 0x1a0   : > { %3096 = vmatpush1.bf16.msra.mxu0 %v3095_v34  ;;  %4049 = vrot.lane.b32.xlu1 %v4048_v10, %s7344_s11  ;;  %v5738_v9 = vpop.permute.xlu1 %3899 }
 0x1a1   : > { %4044 = vrot.lane.b32.xlu0 %v4043_v50, %s7344_s11  ;;  %v5741_v0 = vpop.permute.xlu0 %3894  ;;  %v7339_v54 = vunpack.i.h.bf16 %v5738_v9  ;;  %v3901_v53 = vunpack.i.l.bf16 %v5738_v9  ;;  %v3682_v50 = vunpack.i.h.bf16 %v5322_v29 }
 0x1a2   : > { %v7337_v1 = vunpack.i.h.bf16 %v5741_v0  ;;  %v3896_v19 = vunpack.i.l.bf16 %v5741_v0 }
 0x1a3   : > { %v1065_v57 = vsel %vm7356_vm0, %v3901_v53, %v7339_v54  ;;  %v1064_v41 = vsel %vm7356_vm0, %v3887_v39, %v3901_v53  ;;  %v856_v12 = vsel %vm7341_vm11, %v3681_v11, %v3682_v50  ;;  %v5856_v54 = vld [vmem:[#allocation7 + $0x18] sm:$0xff] }
 0x1a4   : > { %v3910_v17 = vpop.permute.xlu1 %3909  ;;  %v1058_v18 = vsel %vm7356_vm0, %v3896_v19, %v7337_v1  ;;  %v1057_v13 = vsel %vm7356_vm0, %v3882_v22, %v3896_v19  ;;  %v5852_v1 = vld [vmem:[#allocation7] sm:$0xff] }
 0x1a5   : > { %v3905_v5 = vpop.permute.xlu0 %3904  ;;  %4054 = vrot.lane.b32.xlu0 %v4053_v61, %s7344_s11  ;;  %v3912_v8 = vunpack.i.h.bf16 %v3910_v17  ;;  %v3911_v14 = vunpack.i.l.bf16 %v3910_v17  ;;  %v3145_v51 = vpack.c.bf16 %v1065_v57, %v1058_v18  ;;  %v3147_v38 = vpack.c.bf16 %v1064_v41, %v1057_v13 }
 0x1a6   : > { %v3907_v16 = vunpack.i.h.bf16 %v3905_v5  ;;  %v3906_v26 = vunpack.i.l.bf16 %v3905_v5 }
 0x1a7   : > { %3146 = vmatprep.subr.bf16.mxu1 %v3145_v51  ;;  %v1077_v52 = vsel %vm7356_vm0, %v3911_v14, %v3912_v8 }
 0x1a8   : > { %3148 = vmatpush1.bf16.msra.mxu1 %v3147_v38  ;;  %v3920_v39 = vpop.permute.xlu1 %3919  ;;  %v1070_v34 = vsel %vm7356_vm0, %v3906_v26, %v3907_v16 }
 0x1a9   : > { %v3915_v48 = vpop.permute.xlu0 %3914  ;;  %v3922_v42 = vunpack.i.h.bf16 %v3920_v39  ;;  %v5758_v10 = vunpack.i.l.bf16 %v3920_v39  ;;  %v3097_v22 = vpack.c.bf16 %v1077_v52, %v1070_v34 }
 0x1aa   : > { %v3917_v53 = vunpack.i.h.bf16 %v3915_v48  ;;  %v3916_v19 = vunpack.i.l.bf16 %v3915_v48 }
 0x1ab   : > { %v5765_v61 = vsel %vm522_vm9, %v3676_v31, %v5758_v10  ;;  %v860_v57 = vsel %vm522_vm9, %v5758_v10, %v3922_v42  ;;  %3098 = vmatprep.subr.bf16.mxu0 %v3097_v22 }
 0x1ac   : > { %v5769_v41 = vpop.permute.xlu1 %3924  ;;  %v4063_v17 = vpack.i.bf16 %v860_v57, %v5765_v61  ;;  %v1069_v18 = vsel %vm7356_vm0, %v3916_v19, %v3906_v26  ;;  %v1076_v13 = vsel %vm7356_vm0, %v3917_v53, %v3911_v14 }
 0x1ad   : > { %v850_v5 = vpop.permute.xlu0 %849  ;;  %v3099_v51 = vpack.c.bf16 %v1076_v13, %v1069_v18  ;;  %v7336_v52 = vunpack.i.h.bf16 %v5769_v41  ;;  %v3926_v39 = vunpack.i.l.bf16 %v5769_v41 }
 0x1ae   : > { %v857_v31 = vsel %vm7341_vm11, %v3682_v50, %v850_v5  ;;  %4064 = vrot.lane.b32.xlu0 %v4063_v17, %s7344_s11  ;;  %v4068_v11 = vpack.i.bf16 %v3922_v42, %v850_v5  ;;  %vm7458_vm11 = vcmask 1031168  }
 0x1af   : > { %v4058_v38 = vpack.i.bf16 %v857_v31, %v856_v12  ;;  %3100 = vmatpush1.bf16.msra.mxu0 %v3099_v51  ;;  %v1072_v48 = vsel %vm7356_vm0, %v3926_v39, %v7336_v52  ;;  %v1071_v22 = vsel %vm7356_vm0, %v3907_v16, %v3926_v39 }
 0x1b0   : > { %v3935_v34 = vpop.permute.xlu1 %3934 }
 0x1b1   : > { %v5781_v26 = vpop.permute.xlu0 %3929  ;;  %4059 = vrot.lane.b32.xlu1 %v4058_v38, %s7344_s11  ;;  %v3937_v50 = vunpack.i.h.bf16 %v3935_v34  ;;  %v3936_v53 = vunpack.i.l.bf16 %v3935_v34 }
 0x1b2   : > { %v7334_v14 = vunpack.i.h.bf16 %v5781_v26  ;;  %v3931_v29 = vunpack.i.l.bf16 %v5781_v26 }
 0x1b3   : > { %v1084_v39 = vsel %vm7356_vm0, %v3936_v53, %v3937_v50 }
 0x1b4   : > { %v3945_v19 = vpop.permute.xlu1 %3944  ;;  %v1079_v57 = vsel %vm7356_vm0, %v3931_v29, %v7334_v14  ;;  %v1078_v17 = vsel %vm7356_vm0, %v3912_v8, %v3931_v29 }
 0x1b5   : > { %v3940_v18 = vpop.permute.xlu0 %3939  ;;  %v3947_v13 = vunpack.i.h.bf16 %v3945_v19  ;;  %v3946_v51 = vunpack.i.l.bf16 %v3945_v19  ;;  %4069 = vrot.lane.b32.xlu1 %v4068_v11, %s7344_s11  ;;  %v3149_v42 = vpack.c.bf16 %v1079_v57, %v1072_v48  ;;  %v3151_v5 = vpack.c.bf16 %v1078_v17, %v1071_v22 }
 0x1b6   : > { %v3942_v12 = vunpack.i.h.bf16 %v3940_v18  ;;  %v3941_v31 = vunpack.i.l.bf16 %v3940_v18 }
 0x1b7   : > { %3150 = vmatprep.subr.bf16.mxu1 %v3149_v42  ;;  %v1083_v16 = vsel %vm7356_vm0, %v3946_v51, %v3936_v53 }
 0x1b8   : > { %3152 = vmatpush1.bf16.msra.mxu1 %v3151_v5  ;;  %v5796_v38 = vpop.permute.xlu1 %3954  ;;  %v1091_v34 = vsel %vm7356_vm0, %v3941_v31, %v3942_v12  ;;  %v1090_v8 = vsel %vm7356_vm0, %v3947_v13, %v3941_v31 }
 0x1b9   : > { %v5801_v29 = vpop.permute.xlu0 %3949  ;;  %v7333_v11 = vunpack.i.h.bf16 %v5796_v38  ;;  %v3956_v48 = vunpack.i.l.bf16 %v5796_v38  ;;  %v3101_v22 = vpack.c.bf16 %v1091_v34, %v1084_v39  ;;  %v3103_v19 = vpack.c.bf16 %v1090_v8, %v1083_v16 }
 0x1ba   : > { %v7335_v57 = vunpack.i.h.bf16 %v5801_v29  ;;  %v3951_v17 = vunpack.i.l.bf16 %v5801_v29 }
 0x1bb   : > { %3102 = vmatprep.subr.bf16.mxu0 %v3101_v22  ;;  %v1093_v53 = vsel %vm7356_vm0, %v3956_v48, %v7333_v11  ;;  %v1092_v18 = vsel %vm7356_vm0, %v3942_v12, %v3956_v48 }
 0x1bc   : > { %3104 = vmatpush1.bf16.msra.mxu0 %v3103_v19  ;;  %v3965_v13 = vpop.permute.xlu1 %3964  ;;  %v1086_v51 = vsel %vm7356_vm0, %v3951_v17, %v7335_v57  ;;  %v1085_v42 = vsel %vm7356_vm0, %v3937_v50, %v3951_v17 }
 0x1bd   : > { %v3960_v5 = vpop.permute.xlu0 %3959  ;;  %v3967_v31 = vunpack.i.h.bf16 %v3965_v13  ;;  %v3966_v16 = vunpack.i.l.bf16 %v3965_v13  ;;  %v3153_v39 = vpack.c.bf16 %v1093_v53, %v1086_v51  ;;  %v3155_v34 = vpack.c.bf16 %v1092_v18, %v1085_v42 }
 0x1be   : > { %v3962_v8 = vunpack.i.h.bf16 %v3960_v5  ;;  %v3961_v22 = vunpack.i.l.bf16 %v3960_v5 }
 0x1bf   : > { %3154 = vmatprep.subr.bf16.mxu1 %v3153_v39  ;;  %v1105_v11 = vsel %vm7356_vm0, %v3966_v16, %v3967_v31 }
 0x1c0   : > { %3156 = vmatpush1.bf16.msra.mxu1 %v3155_v34  ;;  %v862_v12 = vpop.permute.xlu1 %861  ;;  %v1098_v48 = vsel %vm7356_vm0, %v3961_v22, %v3962_v8 }
 0x1c1   : > { %v5817_v19 = vpop.permute.xlu0 %548  ;;  %v3105_v14 = vpack.c.bf16 %v1105_v11, %v1098_v48 }
 0x1c2   : > { %v863_v50 = vsel %vm550_vm14, %v5817_v19, %v862_v12  ;;  %v5824_v17 = vsel %vm550_vm14, %v5340_v55, %v5817_v19 }
 0x1c3   : > { %1036 = vrot.lane.b32.xlu1 %v863_v50, %s7344_s11  ;;  %1034 = vrot.lane.b32.xlu0 %v5824_v17, %s7344_s11 }
 0x1c4   : > { %3106 = vmatprep.subr.bf16.mxu0 %v3105_v14  ;;  %v5829_v53 = vpop.permute.xlu1 %3974 }
 0x1c5   : > { %v3970_v18 = vpop.permute.xlu0 %3969  ;;  %v7338_v11 = vunpack.i.h.bf16 %v5829_v53  ;;  %v3976_v42 = vunpack.i.l.bf16 %v5829_v53 }
 0x1c6   : > { %v3972_v13 = vunpack.i.h.bf16 %v3970_v18  ;;  %v3971_v51 = vunpack.i.l.bf16 %v3970_v18  ;;  %v7366_v18 = vmov 0.0  }
 0x1c7   : > { %1038 = vrot.lane.b32.xlu0 %v862_v12, %s7344_s11  ;;  %s7497_s11 = smov 48  }
 0x1c8   : > { %v1027_v5 = vpop.permute.xlu1 %1026  ;;  %v1097_v55 = vsel %vm7356_vm0, %v3971_v51, %v3961_v22  ;;  %v1104_v39 = vsel %vm7356_vm0, %v3972_v13, %v3966_v16  ;;  %v1100_v22 = vsel %vm7356_vm0, %v3976_v42, %v7338_v11  ;;  %v1099_v13 = vsel %vm7356_vm0, %v3962_v8, %v3976_v42 }
 0x1c9   : > { %v5836_v34 = vpop.permute.xlu0 %3979  ;;  %v3107_v48 = vpack.c.bf16 %v1104_v39, %v1097_v55  ;;  %v3161_v11 = vpack.c.bf16 %v5652_v7, %v5619_v30  ;;  %v5868_v30 = vld [vmem:[#allocation7 + $0x10] sm:$0xff]  ;;  %v3214_v7 = vpack.c.bf16 %v5634_v63, %v5599_v28  ;;  %v7459_v63 = vunpack.i.h.bf16 %v5447_v36 }
 0x1ca   : > { %v7340_v14 = vunpack.i.h.bf16 %v5836_v34  ;;  %v3981_v50 = vunpack.i.l.bf16 %v5836_v34 }
 0x1cb   : > { %3108 = vmatpush1.bf16.msra.mxu0 %v3107_v48  ;;  %2092 = vrot.lane.b32.xlu0 %v7366_v18, %s7352_s26 }
 0x1cc   : > { %v1025_v12 = vpop.permute.xlu1 %1024  ;;  %v1107_v16 = vsel %vm7356_vm0, %v3981_v50, %v7340_v14  ;;  %v1106_v51 = vsel %vm7356_vm0, %v3967_v31, %v3981_v50  ;;  %v4610_v14 = vld [vmem:[%s5016_s30 + $0x20] sm:$0xff]  ;;  %v7363_v50 = vmov 0.0|0.0   ;;  %s7464_s30 = smov 29  }
 0x1cd   : > { %v1029_v55 = vpop.permute.xlu0 %1028  ;;  %v3157_v39 = vpack.c.bf16 %v1107_v16, %v1100_v22  ;;  %v1111_v48 = vsel %vm7356_vm0, %v1025_v12, %v1027_v5  ;;  %v3159_v57 = vpack.c.bf16 %v1106_v51, %v1099_v13  ;;  %v3163_v8 = vpack.c.bf16 %v5277_v60, %v4610_v14 }
 0x1ce   : > { %v1112_v52 = vsel %vm7356_vm0, %v1027_v5, %v1029_v55  ;;  %v7457_v12 = vunpack.i.h.bf16 %v5399_v20  ;;  %v7461_v51 = vunpack.i.h.bf16 %v5455_v33  ;;  %v7465_v33 = vunpack.i.h.bf16 %v5512_v62 }
 0x1cf   : > { %1258 = vmatprep.subr.mxu0 %v1112_v52  ;;  %3158 = vmatprep.subr.bf16.mxu1 %v3157_v39  ;;  %v7470_v62 = vunpack.i.h.bf16 %v5565_v47  ;;  %v3832_v47 = vunpack.i.h.bf16 %v5636_v27 }
 0x1d0   : > { %1259 = vmatpush1.msra.mxu0 %v1111_v48  ;;  %3160 = vmatpush1.bf16.msra.mxu1 %v3159_v57  ;;  %v5860_v31 = vpop.permute.xlu1 %1032  ;;  %v7463_v48 = vpack.c.bf16 %v5410_v24, %v5423_v2  ;;  %v7467_v24 = vunpack.i.h.bf16 %v5517_v32  ;;  %v7472_v32 = vunpack.i.h.bf16 %v5594_v46 }
 0x1d1   : > { %v1031_v42 = vpop.permute.xlu0 %1030  ;;  %3162 = vmatprep.subr.bf16.mxu0 %v3161_v11  ;;  %1271 = vmatmul.mubr.f32.vlgmr.msra.gmra.mrb[0].mxu0 %v5852_v1  ;;  %v7456_v11 = vunpack.i.h.bf16 %v5390_v4 }
 0x1d2   : > { %3164 = vmatpush1.bf16.msra.mxu0 %v3163_v8  ;;  %v1114_v52 = vsel %vm7356_vm0, %v1031_v42, %v5860_v31  ;;  %v1113_v5 = vsel %vm7356_vm0, %v1029_v55, %v1031_v42  ;;  %3039 = vmatprep.mubr.msk.f32.mxu0 %vm7357_vm7, %v5856_v54 }
 0x1d3   : > { %1335 = vmatprep.subr.mxu1 %v1114_v52  ;;  %2152 = vrot.lane.b32.xlu0 %v7366_v18, %s7353_s13 }
 0x1d4   : > { %1336 = vmatpush1.msra.mxu1 %v1113_v5  ;;  %v353_v60 = vpop.permute.xlu1 %352 }
 0x1d5   : > { %v325_v57 = vpop.permute.xlu0 %324  ;;  %v360_v14 = vsel %vm354_vm8, %v7456_v11, %v353_v60  ;;  %3213 = vmatprep.subr.bf16.mxu1 %v7363_v50  ;;  %1348 = vmatmul.mubr.f32.vlgmr.msra.gmra.mrb[0].mxu1 %v5852_v1 }
 0x1d6   : > { %v332_v22 = vsel %vm7458_vm11, %v7457_v12, %v325_v57  ;;  %v3217_v16 = vpack.c.bf16 %v353_v60, %v325_v57  ;;  %3215 = vmatpush1.bf16.msra.mxu1 %v3214_v7  ;;  %1277 = vmatmul.mubr.f32.gmra.mrb[2].mxu0 %v5868_v30  ;;  %vm7460_vm11 = vcmask 949248   ;;  %v7469_v60 = vpack.c.bf16 %v5467_v44, %v5476_v23 }
 0x1d7   : > { %v3165_v13 = vpack.c.bf16 %v360_v14, %v332_v22  ;;  %3216 = vmatprep.subr.bf16.mxu1 %v7363_v50  ;;  %3041 = vmatprep.mubr.msk.f32.mxu1 %vm7357_vm7, %v5856_v54  ;;  %v7474_v12 = vpack.c.bf16 %v5532_v37, %v5542_v6  ;;  %v7475_v37 = vpack.c.bf16 %v5490_v25, %v5579_v56 }
 0x1d8   : > { %v409_v4 = vpop.permute.xlu1 %408  ;;  %3042 = vmatprep.mubr.msk.f32.mxu0 %vm7357_vm7, %v5479_v59  ;;  %2172 = vrot.lane.b32.xlu0 %v7366_v18, %s7350_s6  ;;  %s4803_s6 = smov 111  }
 0x1d9   : > { %v381_v20 = vpop.permute.xlu0 %380  ;;  %v416_v28 = vsel %vm7460_vm11, %v7459_v63, %v409_v4  ;;  %3166 = vmatprep.subr.bf16.mxu0 %v3165_v13  ;;  %1354 = vmatmul.mubr.f32.gmra.mrb[2].mxu1 %v5868_v30  ;;  %vm7468_vm11 = vcmask 883712  }
 0x1da   : > { %v388_v55 = vsel %vm7462_vm6, %v7461_v51, %v381_v20  ;;  %v3220_v39 = vpack.c.bf16 %v409_v4, %v381_v20  ;;  %3168 = vmatpush1.bf16.msra.mxu0 %v7463_v48  ;;  %3218 = vmatpush1.bf16.msra.mxu1 %v3217_v16  ;;  %vm7466_vm6 = vcmask 875520   ;;  %v7476_v48 = vpack.c.bf16 %v5609_v3, %v5548_v58 }
 0x1db   : > { %v3169_v8 = vpack.c.bf16 %v416_v28, %v388_v55  ;;  %3219 = vmatprep.subr.bf16.mxu1 %v7363_v50  ;;  %3044 = vmatprep.mubr.msk.f32.mxu1 %vm7357_vm7, %v5479_v59 }
 0x1dc   : > { %v465_v36 = vpop.permute.xlu1 %464  ;;  %2212 = vrot.lane.b32.xlu0 %v7366_v18, %s7464_s30 }
 0x1dd   : > { %v437_v42 = vpop.permute.xlu0 %436  ;;  %v472_v52 = vsel %vm7466_vm6, %v7465_v33, %v465_v36  ;;  %3170 = vmatprep.subr.bf16.mxu0 %v3169_v8  ;;  %vm7471_vm6 = vcmask 867328   ;;  %v7477_v8 = vunpack.i.l.bf16 %v5636_v27 }
 0x1de   : > { %v444_v2 = vsel %vm7468_vm11, %v7467_v24, %v437_v42  ;;  %v3223_v5 = vpack.c.bf16 %v465_v36, %v437_v42  ;;  %3172 = vmatpush1.bf16.msra.mxu0 %v7469_v60  ;;  %3221 = vmatpush1.bf16.msra.mxu1 %v3220_v39  ;;  %vm1647_vm11 = vcmask 908288  }
 0x1df   : > { %v3173_v59 = vpack.c.bf16 %v472_v52, %v444_v2  ;;  %3222 = vmatprep.subr.bf16.mxu1 %v7363_v50 }
 0x1e0   : > { %v577_v7 = vpop.permute.xlu1 %576 }
 0x1e1   : > { %v493_v57 = vpop.permute.xlu0 %492  ;;  %3174 = vmatprep.subr.bf16.mxu0 %v3173_v59  ;;  %v584_v14 = vsel %vm7473_vm5, %v7472_v32, %v577_v7  ;;  %vm7355_vm5 = vcmask 80896  }
 0x1e2   : > { %v500_v11 = vsel %vm7471_vm6, %v7470_v62, %v493_v57  ;;  %3176 = vmatpush1.bf16.msra.mxu0 %v7474_v12  ;;  %3224 = vmatpush1.bf16.msra.mxu1 %v3223_v5  ;;  %v3226_v23 = vpack.c.bf16 %v5758_v10, %v493_v57  ;;  %v3181_v46 = vpack.c.bf16 %v584_v14, %v5824_v17  ;;  %vm3046_vm6 = vmneg %vm1647_vm11 }
 0x1e3   : > { %v3177_v44 = vpack.c.bf16 %v5765_v61, %v500_v11  ;;  %3225 = vmatprep.subr.bf16.mxu1 %v7363_v50  ;;  %v3229_v61 = vpack.c.bf16 %v577_v7, %v5817_v19  ;;  %v611_v19 = vsel %vm606_vm12, %v7477_v8, %v3832_v47 }
 0x1e4   : > { %v3985_v22 = vpop.permute.xlu1 %3984 }
 0x1e5   : > { %v605_v16 = vpop.permute.xlu0 %604  ;;  %v3987_v13 = vunpack.i.h.bf16 %v3985_v22  ;;  %v3986_v4 = vunpack.i.l.bf16 %v3985_v22  ;;  %3178 = vmatprep.subr.bf16.mxu0 %v3177_v44 }
 0x1e6   : > { %3180 = vmatpush1.bf16.msra.mxu0 %v7475_v37  ;;  %3227 = vmatpush1.bf16.msra.mxu1 %v3226_v23  ;;  %v612_v6 = vsel %vm606_vm12, %v3832_v47, %v605_v16 }
 0x1e7   : > { %3182 = vmatprep.subr.bf16.mxu0 %v3181_v46  ;;  %3228 = vmatprep.subr.bf16.mxu1 %v7363_v50  ;;  %v640_v10 = vsel %vm634_vm15, %v3986_v4, %v3987_v13  ;;  %v639_v28 = vsel %vm634_vm15, %v5630_v21, %v3986_v4  ;;  %v3232_v25 = vpack.c.bf16 %v3987_v13, %v605_v16 }
 0x1e8   : > { %v3995_v20 = vpop.permute.xlu1 %3994  ;;  %v3185_v63 = vpack.c.bf16 %v640_v10, %v612_v6  ;;  %v3187_v42 = vpack.c.bf16 %v639_v28, %v611_v19 }
 0x1e9   : > { %v3990_v17 = vpop.permute.xlu0 %3989  ;;  %v3997_v51 = vunpack.i.h.bf16 %v3995_v20  ;;  %v3996_v55 = vunpack.i.l.bf16 %v3995_v20 }
 0x1ea   : > { %v3992_v56 = vunpack.i.h.bf16 %v3990_v17  ;;  %v3991_v39 = vunpack.i.l.bf16 %v3990_v17  ;;  %3184 = vmatpush1.bf16.msra.mxu0 %v7476_v48  ;;  %3230 = vmatpush1.bf16.msra.mxu1 %v3229_v61  ;;  %v7479_v61 = vunpack.i.h.bf16 %v5741_v0 }
 0x1eb   : > { %3186 = vmatprep.subr.bf16.mxu0 %v3185_v63  ;;  %3231 = vmatprep.subr.bf16.mxu1 %v7363_v50  ;;  %v699_v21 = vsel %vm693_vm10, %v3996_v55, %v3997_v51  ;;  %v698_v58 = vsel %vm693_vm10, %v5667_v49, %v3996_v55 }
 0x1ec   : > { %v4000_v36 = vpop.permute.xlu1 %3999  ;;  %v668_v33 = vsel %vm662_vm13, %v3991_v39, %v3992_v56  ;;  %v667_v52 = vsel %vm662_vm13, %v5672_v15, %v3991_v39 }
 0x1ed   : > { %v692_v3 = vpop.permute.xlu0 %691  ;;  %v3189_v24 = vpack.c.bf16 %v699_v21, %v668_v33  ;;  %v4002_v2 = vunpack.i.h.bf16 %v4000_v36  ;;  %v4001_v60 = vunpack.i.l.bf16 %v4000_v36  ;;  %v3191_v7 = vpack.c.bf16 %v698_v58, %v667_v52 }
 0x1ee   : > { %v700_v27 = vsel %vm693_vm10, %v3997_v51, %v692_v3  ;;  %3188 = vmatpush1.bf16.msra.mxu0 %v3187_v42  ;;  %3233 = vmatpush1.bf16.msra.mxu1 %v3232_v25  ;;  %v7480_v58 = vunpack.i.h.bf16 %v5769_v41 }
 0x1ef   : > { %v3235_v5 = vpack.c.bf16 %v700_v27, %v3992_v56  ;;  %3190 = vmatprep.subr.bf16.mxu0 %v3189_v24  ;;  %3234 = vmatprep.subr.bf16.mxu1 %v7363_v50  ;;  %v1046_v49 = vsel %vm7356_vm0, %v4001_v60, %v4002_v2  ;;  %v1045_v12 = vsel %vm7356_vm0, %v3872_v35, %v4001_v60  ;;  %v7481_v27 = vunpack.i.h.bf16 %v5781_v26 }
 0x1f0   : > { %v4010_v59 = vpop.permute.xlu1 %4009 }
 0x1f1   : > { %v4005_v57 = vpop.permute.xlu0 %4004  ;;  %v4012_v62 = vunpack.i.h.bf16 %v4010_v59  ;;  %v4011_v15 = vunpack.i.l.bf16 %v4010_v59 }
 0x1f2   : > { %v4007_v11 = vunpack.i.h.bf16 %v4005_v57  ;;  %v4006_v32 = vunpack.i.l.bf16 %v4005_v57  ;;  %3192 = vmatpush1.bf16.msra.mxu0 %v3191_v7  ;;  %3236 = vmatpush1.bf16.msra.mxu1 %v3235_v5 }
 0x1f3   : > { %v1047_v14 = vsel %vm7356_vm0, %v4002_v2, %v4011_v15  ;;  %3237 = vmatprep.subr.bf16.mxu1 %v7363_v50 }
 0x1f4   : > { %v1052_v44 = vsel %vm7356_vm0, %v3877_v45, %v4006_v32  ;;  %v1054_v23 = vsel %vm7356_vm0, %v4007_v11, %v4012_v62  ;;  %v1053_v22 = vsel %vm7356_vm0, %v4006_v32, %v4007_v11  ;;  %v7478_v45 = vunpack.i.h.bf16 %v5738_v9 }
 0x1f5   : > { %v3193_v47 = vpack.c.bf16 %v1053_v22, %v1046_v49  ;;  %v3238_v16 = vpack.c.bf16 %v1054_v23, %v1047_v14  ;;  %v3195_v13 = vpack.c.bf16 %v1052_v44, %v1045_v12  ;;  %v7482_v14 = vunpack.i.h.bf16 %v5796_v38 }
 0x1f6   : > { %v7483_v23 = vunpack.i.h.bf16 %v5801_v29 }
 0x1f7   : > { %3194 = vmatprep.subr.bf16.mxu0 %v3193_v47  ;;  %3239 = vmatpush1.bf16.msra.mxu1 %v3238_v16 }
 0x1f8   : > { %3196 = vmatpush1.bf16.msra.mxu0 %v3195_v13  ;;  %3240 = vmatprep.subr.bf16.mxu1 %v7363_v50 }
 0x1fa   : > { %v4020_v4 = vpop.permute.xlu1 %4019 }
 0x1fb   : > { %v4015_v43 = vpop.permute.xlu0 %4014  ;;  %v4022_v46 = vunpack.i.h.bf16 %v4020_v4  ;;  %v4021_v35 = vunpack.i.l.bf16 %v4020_v4 }
 0x1fc   : > { %v4017_v37 = vunpack.i.h.bf16 %v4015_v43  ;;  %v4016_v40 = vunpack.i.l.bf16 %v4015_v43 }
 0x1fd   : > { %v1066_v6 = vsel %vm7356_vm0, %v7478_v45, %v4021_v35  ;;  %v1067_v10 = vsel %vm7356_vm0, %v4021_v35, %v4022_v46 }
 0x1fe   : > { %v1059_v20 = vsel %vm7356_vm0, %v7479_v61, %v4016_v40  ;;  %v1060_v63 = vsel %vm7356_vm0, %v4016_v40, %v4017_v37 }
 0x1ff   : > { %v4025_v28 = vpop.permute.xlu0 %4024  ;;  %v3197_v17 = vpack.c.bf16 %v1067_v10, %v1060_v63  ;;  %v3199_v51 = vpack.c.bf16 %v1066_v6, %v1059_v20  ;;  %v7484_v20 = vunpack.i.h.bf16 %v5836_v34 }
 0x200   : > { %v4027_v55 = vunpack.i.h.bf16 %v4025_v28  ;;  %v4026_v25 = vunpack.i.l.bf16 %v4025_v28  ;;  %v7485_v28 = vunpack.i.h.bf16 %v5829_v53 }
 0x201   : > { %3198 = vmatprep.subr.bf16.mxu0 %v3197_v17 }
 0x202   : > { %v1061_v56 = vsel %vm7356_vm0, %v4017_v37, %v4026_v25  ;;  %v1068_v9 = vsel %vm7356_vm0, %v4022_v46, %v4027_v55  ;;  %3200 = vmatpush1.bf16.msra.mxu0 %v3199_v51  ;;  %v4030_v39 = vpop.permute.xlu1 %4029 }
 0x203   : > { %v3241_v48 = vpack.c.bf16 %v1068_v9, %v1061_v56  ;;  %v4031_v8 = vunpack.i.l.bf16 %v4030_v39  ;;  %v4032_v0 = vunpack.i.h.bf16 %v4030_v39 }
 0x205   : > { %3242 = vmatpush1.bf16.msra.mxu1 %v3241_v48  ;;  %v1073_v3 = vsel %vm7356_vm0, %v7480_v58, %v4031_v8  ;;  %v1074_v60 = vsel %vm7356_vm0, %v4031_v8, %v4032_v0 }
 0x206   : > { %v4040_v19 = vpop.permute.xlu1 %4039  ;;  %3243 = vmatprep.subr.bf16.mxu1 %v7363_v50 }
 0x207   : > { %v4035_v21 = vpop.permute.xlu0 %4034  ;;  %v4042_v36 = vunpack.i.h.bf16 %v4040_v19  ;;  %v4041_v42 = vunpack.i.l.bf16 %v4040_v19 }
 0x208   : > { %v4037_v33 = vunpack.i.h.bf16 %v4035_v21  ;;  %v4036_v52 = vunpack.i.l.bf16 %v4035_v21 }
 0x209   : > { %v1075_v24 = vsel %vm7356_vm0, %v4032_v0, %v4041_v42 }
 0x20a   : > { %v1080_v2 = vsel %vm7356_vm0, %v7481_v27, %v4036_v52  ;;  %v1082_v5 = vsel %vm7356_vm0, %v4037_v33, %v4042_v36  ;;  %v1081_v59 = vsel %vm7356_vm0, %v4036_v52, %v4037_v33 }
 0x20b   : > { %v3201_v7 = vpack.c.bf16 %v1081_v59, %v1074_v60  ;;  %v3244_v57 = vpack.c.bf16 %v1082_v5, %v1075_v24  ;;  %v3203_v62 = vpack.c.bf16 %v1080_v2, %v1073_v3  ;;  %v268_v3 = vld [vmem:[#allocation2] sm:$0x7f] }
 0x20d   : > { %3202 = vmatprep.subr.bf16.mxu0 %v3201_v7  ;;  %3245 = vmatpush1.bf16.msra.mxu1 %v3244_v57 }
 0x20e   : > { %3204 = vmatpush1.bf16.msra.mxu0 %v3203_v62  ;;  %3246 = vmatprep.subr.bf16.mxu1 %v7363_v50 }
 0x212   : > { %v4050_v41 = vpop.permute.xlu1 %4049 }
 0x213   : > { %v4045_v15 = vpop.permute.xlu0 %4044  ;;  %v4052_v11 = vunpack.i.h.bf16 %v4050_v41  ;;  %v4051_v26 = vunpack.i.l.bf16 %v4050_v41 }
 0x214   : > { %v4047_v32 = vunpack.i.h.bf16 %v4045_v15  ;;  %v4046_v49 = vunpack.i.l.bf16 %v4045_v15 }
 0x215   : > { %v1094_v12 = vsel %vm7356_vm0, %v7482_v14, %v4051_v26  ;;  %v1095_v44 = vsel %vm7356_vm0, %v4051_v26, %v4052_v11 }
 0x216   : > { %v1087_v22 = vsel %vm7356_vm0, %v7483_v23, %v4046_v49  ;;  %v1088_v47 = vsel %vm7356_vm0, %v4046_v49, %v4047_v32 }
 0x217   : > { %v4055_v16 = vpop.permute.xlu0 %4054  ;;  %v3205_v13 = vpack.c.bf16 %v1095_v44, %v1088_v47  ;;  %v3207_v4 = vpack.c.bf16 %v1094_v12, %v1087_v22 }
 0x218   : > { %v4057_v43 = vunpack.i.h.bf16 %v4055_v16  ;;  %v4056_v46 = vunpack.i.l.bf16 %v4055_v16 }
 0x219   : > { %3206 = vmatprep.subr.bf16.mxu0 %v3205_v13 }
 0x21a   : > { %v1089_v35 = vsel %vm7356_vm0, %v4047_v32, %v4056_v46  ;;  %v1096_v38 = vsel %vm7356_vm0, %v4052_v11, %v4057_v43  ;;  %3208 = vmatpush1.bf16.msra.mxu0 %v3207_v4 }
 0x21b   : > { %v3247_v37 = vpack.c.bf16 %v1096_v38, %v1089_v35 }
 0x21d   : > { %3248 = vmatpush1.bf16.msra.mxu1 %v3247_v37 }
 0x21e   : > { %3249 = vmatprep.subr.bf16.mxu1 %v7363_v50 }
 0x220   : > { %v4065_v29 = vpop.permute.xlu0 %4064 }
 0x221   : > { %v4067_v40 = vunpack.i.h.bf16 %v4065_v29  ;;  %v4066_v45 = vunpack.i.l.bf16 %v4065_v29 }
 0x223   : > { %v4060_v6 = vpop.permute.xlu1 %4059  ;;  %v1108_v63 = vsel %vm7356_vm0, %v7484_v20, %v4066_v45  ;;  %v1109_v55 = vsel %vm7356_vm0, %v4066_v45, %v4067_v40 }
 0x224   : > { %v4062_v10 = vunpack.i.h.bf16 %v4060_v6  ;;  %v4061_v61 = vunpack.i.l.bf16 %v4060_v6 }
 0x226   : > { %v1101_v17 = vsel %vm7356_vm0, %v7485_v28, %v4061_v61  ;;  %v1102_v51 = vsel %vm7356_vm0, %v4061_v61, %v4062_v10 }
 0x227   : > { %v4070_v25 = vpop.permute.xlu1 %4069  ;;  %v3209_v56 = vpack.c.bf16 %v1109_v55, %v1102_v51  ;;  %v3211_v9 = vpack.c.bf16 %v1108_v63, %v1101_v17 }
 0x228   : > { %v4072_v39 = vunpack.i.h.bf16 %v4070_v25  ;;  %v4071_v48 = vunpack.i.l.bf16 %v4070_v25 }
 0x229   : > { %3210 = vmatprep.subr.bf16.mxu0 %v3209_v56 }
 0x22a   : > { %v1103_v8 = vsel %vm7356_vm0, %v4062_v10, %v4071_v48  ;;  %v1110_v34 = vsel %vm7356_vm0, %v4067_v40, %v4072_v39  ;;  %3212 = vmatpush1.bf16.msra.mxu0 %v3211_v9 }
 0x22b   : > { %v3250_v0 = vpack.c.bf16 %v1110_v34, %v1103_v8 }
 0x22d   : > { %3251 = vmatpush1.bf16.msra.mxu1 %v3250_v0 }
 0x22e   : > { %1489 = vmatprep.subr.mxu1 %v7366_v18 }
 0x235   : > { %v1037_v53 = vpop.permute.xlu1 %1036  ;;  %v1035_v19 = vpop.permute.xlu0 %1034 }
 0x236   : > { %v1116_v21 = vsel %vm7356_vm0, %v1035_v19, %v1037_v53  ;;  %v1115_v36 = vsel %vm7356_vm0, %v5860_v31, %v1035_v19  ;;  %v1526_v31 = vlaneseq }
 0x237   : > { %1412 = vmatprep.subr.mxu0 %v1116_v21 }
 0x238   : > { %1413 = vmatpush1.msra.mxu0 %v1115_v36  ;;  %v1527_v52 = vshrl.u32 %v1526_v31, 7 }
 0x239   : > { %v1039_v42 = vpop.permute.xlu0 %1038  ;;  %1425 = vmatmul.mubr.f32.vlgmr.msra.gmra.mrb[4].mxu0 %v5852_v1 }
 0x23a   : > { %v1117_v33 = vsel %vm7356_vm0, %v1037_v53, %v1039_v42  ;;  %3043 = vmatprep.mubr.msk.f32.mxu0 %vm7357_vm7, %v5856_v54  ;;  %v1528_v58 = vsub.s32 0, %v1527_v52  ;;  %v1532_v24 = vsub.s32 1, %v1527_v52  ;;  %v1536_v2 = vsub.s32 2, %v1527_v52 }
 0x23b   : > { %1490 = vmatpush1.msra.mxu1 %v1117_v33  ;;  %v1540_v60 = vsub.s32 3, %v1527_v52  ;;  %v1544_v22 = vsub.s32 4, %v1527_v52  ;;  %v1548_v47 = vsub.s32 5, %v1527_v52  ;;  %v1552_v16 = vsub.s32 6, %v1527_v52 }
 0x23c   : > { %1502 = vmatmul.mubr.f32.vlgmr.msra.gmra.mrb[4].mxu1 %v5852_v1  ;;  %v6021_v27 = vrot.slane %v268_v3, %v1528_v58  ;;  %v6023_v5 = vrot.slane %v268_v3, %v1532_v24  ;;  %v6026_v57 = vrot.slane %v268_v3, %v1536_v2 }
 0x23d   : > { %1431 = vmatmul.mubr.f32.gmra.mrb[6].mxu0 %v5868_v30  ;;  %3045 = vmatprep.mubr.msk.f32.mxu1 %vm7357_vm7, %v5856_v54  ;;  %v6041_v13 = vrot.slane %v268_v3, %v1544_v22  ;;  %v6043_v4 = vrot.slane %v268_v3, %v1548_v47  ;;  %v6045_v46 = vrot.slane %v268_v3, %v1552_v16  ;;  %vm7389_vm7 = vmmov 1  }
 0x23e   : > { %7486 = vst [vmem:[#allocation18_spill] sm:$0xff] %v6021_v27  ;;  %7487 = vst [vmem:[#allocation19_spill] sm:$0xff] %v6023_v5 }
 0x23f   : > { %7488 = vst [vmem:[#allocation20_spill] sm:$0xff] %v6026_v57  ;;  %7494 = vst [vmem:[#allocation26_spill] sm:$0xff] %v6041_v13 }
 0x240   : > { %1507 = vmatmul.mubr.f32.gmra.mrb[6].mxu1 %v5868_v30  ;;  %v6029_v30 = vrot.slane %v268_v3, %v1540_v60  ;;  %7495 = vst [vmem:[#allocation27_spill] sm:$0xff] %v6043_v4  ;;  %7496 = vst [vmem:[#allocation28_spill] sm:$0xff] %v6045_v46 }
 0x241   : > { %vm3255_vm3 = vmpackc.low %vm7389_vm7, %vm3046_vm6 }
 0x242   : > { %7489 = vst [vmem:[#allocation21_spill] sm:$0xff] %v6029_v30 }
 0x2a4   : > { %v1272_v59 = vpop.f32.mrb[0].mxu0 }
 0x2a5   : > { %v1561_v1 = vmul.f32 %v6021_v27, %v1272_v59  ;;  %v1274_v7 = vpop.f32.mrb[1].mxu0 }
 0x2a6   : > { %v1562_v54 = vmul.f32 %v6023_v5, %v1274_v7 }
 0x2a8   : > { %v1568_v62 = vadd.f32 %v1562_v54, %v1561_v1  ;;  %v1349_v41 = vpop.f32.mrb[0].mxu1 }
 0x2a9   : > { %v1563_v15 = vmul.f32 %v6026_v57, %v1349_v41  ;;  %v1351_v11 = vpop.f32.mrb[1].mxu1  ;;  %v6032_v26 = vpop.f32.mrb[2].mxu0 }
 0x2aa   : > { %7490 = vst [vmem:[#allocation22_spill] sm:$0xff] %v6032_v26  ;;  %v1564_v32 = vmul.f32 %v6029_v30, %v1351_v11  ;;  %v6035_v49 = vpop.f32.mrb[3].mxu0 }
 0x2ab   : > { %7491 = vst [vmem:[#allocation23_spill] sm:$0xff] %v6035_v49  ;;  %v1569_v14 = vadd.f32 %v1568_v62, %v1563_v15  ;;  %v6065_v62 = vpop.permute.xlu0 %2092 }
 0x2ac   : > { %v6037_v12 = vpop.f32.mrb[2].mxu1 }
 0x2ad   : > { %7492 = vst [vmem:[#allocation24_spill] sm:$0xff] %v6037_v12  ;;  %v1570_v44 = vadd.f32 %v1569_v14, %v1564_v32  ;;  %v6039_v23 = vpop.f32.mrb[3].mxu1 }
 0x2ae   : > { %7493 = vst [vmem:[#allocation25_spill] sm:$0xff] %v6039_v23 }
 0x30c   : > { %v1426_v43 = vpop.f32.mrb[4].mxu0 }
 0x30d   : > { %v1565_v35 = vmul.f32 %v6041_v13, %v1426_v43  ;;  %v1428_v38 = vpop.f32.mrb[5].mxu0 }
 0x30e   : > { %v1566_v37 = vmul.f32 %v6043_v4, %v1428_v38 }
 0x30f   : > { %v1571_v29 = vadd.f32 %v1570_v44, %v1565_v35  ;;  %v1503_v40 = vpop.f32.mrb[4].mxu1 }
 0x310   : > { %v1567_v45 = vmul.f32 %v6045_v46, %v1503_v40  ;;  %v1505_v6 = vpop.f32.mrb[5].mxu1 }
 0x311   : > { %v1572_v10 = vadd.f32 %v1571_v29, %v1566_v37 }
 0x312   : > { %v1574_v61 = vsel %vm7355_vm5, %v1567_v45, 0.0 }
 0x313   : > { %v1575_v20 = vadd.f32 %v1574_v61, %v1572_v10 }
 0x315   : > { %1576 = vadd.xlane.f32.xlu1 %v1575_v20 }
 0x326   : > { %2112 = vrot.lane.b32.xlu1 %v7366_v18, %s7497_s11 }
 0x32a   : > { %2132 = vrot.lane.b32.xlu1 %v7366_v18, %s7498_s16 }
 0x32e   : > { %2192 = vrot.lane.b32.xlu1 %v7366_v18, %s7499_s24 }
 0x3a2   : > { %v1577_v63 = vpop.xlane.xlu1 %1576 }
 0x3a3   : > { %v1578_v28 = vmul.f32 0.001953125, %v1577_v63 }
 0x3a5   : > { %v1579_v17 = vsub.f32 %v1272_v59, %v1578_v28  ;;  %v1580_v51 = vsub.f32 %v1274_v7, %v1578_v28  ;;  %v1581_v55 = vsub.f32 %v1349_v41, %v1578_v28  ;;  %v1582_v25 = vsub.f32 %v1351_v11, %v1578_v28  ;;  %v6067_v41 = vpop.permute.xlu0 %2152 }
 0x3a6   : > { %v1583_v56 = vsub.f32 %v1426_v43, %v1578_v28  ;;  %v1585_v8 = vsub.f32 %v1503_v40, %v1578_v28  ;;  %v1584_v34 = vsub.f32 %v1428_v38, %v1578_v28  ;;  %v6073_v28 = vpop.permute.xlu1 %2112 }
 0x3a7   : > { %v1586_v9 = vmul.f32 %v1579_v17, %v6021_v27  ;;  %v1587_v39 = vmul.f32 %v1580_v51, %v6023_v5  ;;  %v1588_v48 = vmul.f32 %v1581_v55, %v6026_v57  ;;  %v1589_v0 = vmul.f32 %v1582_v25, %v6029_v30 }
 0x3a8   : > { %v1590_v21 = vmul.f32 %v1583_v56, %v6041_v13  ;;  %v1592_v33 = vmul.f32 %v1585_v8, %v6045_v46  ;;  %v1591_v31 = vmul.f32 %v1584_v34, %v6043_v4 }
 0x3a9   : > { %v1593_v53 = vmul.f32 %v1586_v9, %v1586_v9  ;;  %v1594_v19 = vmul.f32 %v1587_v39, %v1587_v39  ;;  %v1595_v36 = vmul.f32 %v1588_v48, %v1588_v48  ;;  %v1596_v52 = vmul.f32 %v1589_v0, %v1589_v0  ;;  %v6069_v15 = vpop.permute.xlu0 %2172 }
 0x3aa   : > { %v1597_v3 = vmul.f32 %v1590_v21, %v1590_v21  ;;  %v1599_v2 = vmul.f32 %v1592_v33, %v1592_v33  ;;  %v1598_v60 = vmul.f32 %v1591_v31, %v1591_v31  ;;  %v6075_v17 = vpop.permute.xlu1 %2132 }
 0x3ab   : > { %v1600_v42 = vadd.f32 %v1594_v19, %v1593_v53 }
 0x3ac   : > { %v1605_v7 = vsel %vm7355_vm5, %v1599_v2, 0.0  ;;  %vm7508_vm5 = vcmask 1039360  }
 0x3ad   : > { %v1601_v58 = vadd.f32 %v1600_v42, %v1595_v36  ;;  %v6071_v11 = vpop.permute.xlu0 %2212  ;;  %vm7509_vm0 = vmmov %vm7508_vm5 }
 0x3ae   : > { %v6077_v51 = vpop.permute.xlu1 %2192  ;;  %vm7511_vm6 = vmmov %vm7509_vm0 }
 0x3af   : > { %v1602_v24 = vadd.f32 %v1601_v58, %v1596_v52 }
 0x3b1   : > { %v1603_v59 = vadd.f32 %v1602_v24, %v1597_v3 }
 0x3b3   : > { %v1604_v1 = vadd.f32 %v1603_v59, %v1598_v60 }
 0x3b5   : > { %v1606_v54 = vadd.f32 %v1605_v7, %v1604_v1 }
 0x3b7   : > { %1607 = vadd.xlane.f32.xlu0 %v1606_v54 }
 0x444   : > { %v1608_v32 = vpop.xlane.xlu0 %1607 }
 0x445   : > { %v1609_v14 = vmul.f32 0.001953125, %v1608_v32 }
 0x447   : > { %v1610_v44 = vadd.f32 1e-05, %v1609_v14 }
 0x449   : > { %4604 = vrsqrt.f32 %v1610_v44 }
 0x453   : > { %v4605_v22 = vpop.eup %4604 }
 0x454   : > { %v1613_v47 = vmul.f32 %v4605_v22, %v1587_v39  ;;  %v1612_v16 = vmul.f32 %v4605_v22, %v1586_v9  ;;  %v1614_v38 = vmul.f32 %v4605_v22, %v1588_v48  ;;  %v1615_v37 = vmul.f32 %v4605_v22, %v1589_v0 }
 0x455   : > { %v1616_v45 = vmul.f32 %v4605_v22, %v1590_v21  ;;  %v1617_v6 = vmul.f32 %v4605_v22, %v1591_v31  ;;  %v1618_v20 = vmul.f32 %v4605_v22, %v1592_v33 }
 0x456   : > { %v1620_v43 = vmax.f32 %v1613_v47, 0.0  ;;  %v1619_v35 = vmax.f32 %v1612_v16, 0.0  ;;  %v1621_v29 = vmax.f32 %v1614_v38, 0.0  ;;  %v1622_v40 = vmax.f32 %v1615_v37, 0.0 }
 0x457   : > { %v1623_v10 = vmax.f32 %v1616_v45, 0.0  ;;  %v1624_v61 = vmax.f32 %v1617_v6, 0.0  ;;  %v1625_v63 = vmax.f32 %v1618_v20, 0.0 }
 0x458   : > { %1635 = vrot.lane.b32.xlu1 %v1620_v43, %s4803_s6  ;;  %1633 = vrot.lane.b32.xlu0 %v1619_v35, %s4803_s6 }
 0x45c   : > { %1637 = vrot.lane.b32.xlu1 %v1621_v29, %s4803_s6  ;;  %1639 = vrot.lane.b32.xlu0 %v1622_v40, %s4803_s6 }
 0x460   : > { %1641 = vrot.lane.b32.xlu1 %v1623_v10, %s4803_s6  ;;  %1643 = vrot.lane.b32.xlu0 %v1624_v61, %s4803_s6 }
 0x464   : > { %1645 = vrot.lane.b32.xlu1 %v1625_v63, %s4803_s6  ;;  %s7500_s6 = smov 127  }
 0x4ca   : > { %v6079_v55 = vpop.permute.xlu0 %1633  ;;  %v1636_v25 = vpop.permute.xlu1 %1635 }
 0x4cb   : > { %v6083_v39 = vsel %vm1647_vm11, 0.0, %v6079_v55  ;;  %v6087_v48 = vsel %vm1647_vm11, %v6079_v55, %v1636_v25 }
 0x4cc   : > { %v4283_v3 = vpack.i.bf16 %v7366_v18, %v6083_v39 }
 0x4ce   : > { %v1640_v56 = vpop.permute.xlu0 %1639  ;;  %v1638_v9 = vpop.permute.xlu1 %1637 }
 0x4cf   : > { %v6090_v8 = vsel %vm1647_vm11, %v1636_v25, %v1638_v9  ;;  %v6093_v34 = vsel %vm1647_vm11, %v1638_v9, %v1640_v56 }
 0x4d0   : > { %v4078_v0 = vpack.i.bf16 %v6083_v39, %v6093_v34  ;;  %v6099_v53 = vpack.i.bf16 %v6090_v8, %v6087_v48  ;;  %v4183_v58 = vpack.i.bf16 %v6093_v34, %v6083_v39 }
 0x4d2   : > { %v6101_v19 = vpop.permute.xlu0 %1643  ;;  %4079 = vrot.lane.b32.xlu1 %v4078_v0, %s7500_s6  ;;  %4074 = vrot.lane.b32.xlu0 %v6099_v53, %s7500_s6  ;;  %v1642_v21 = vpop.permute.xlu1 %1641 }
 0x4d3   : > { %v6107_v36 = vsel %vm1647_vm11, %v1640_v56, %v1642_v21  ;;  %v6111_v42 = vsel %vm1647_vm11, %v1642_v21, %v6101_v19 }
 0x4d4   : > { %v4083_v33 = vpack.i.bf16 %v6111_v42, %v6107_v36  ;;  %v6120_v31 = vpack.i.bf16 %v6107_v36, %v6093_v34  ;;  %v4168_v52 = vpack.i.bf16 %v6083_v39, %v6111_v42 }
 0x4d6   : > { %4089 = vrot.lane.b32.xlu1 %v6099_v53, %s7352_s26  ;;  %4084 = vrot.lane.b32.xlu0 %v4083_v33, %s7500_s6  ;;  %v1646_v24 = vpop.permute.xlu1 %1645 }
 0x4d7   : > { %v6236_v35 = vsel %vm1647_vm11, %v6101_v19, %v1646_v24  ;;  %vm7520_vm11 = vcmask 1031168  }
 0x4d8   : > { %7510 = vst [vmem:[#allocation29_spill] sm:$0xff] %v6236_v35 }
 0x4da   : > { %4099 = vrot.lane.b32.xlu1 %v6099_v53, %s7497_s11  ;;  %4094 = vrot.lane.b32.xlu0 %v6120_v31, %s7352_s26  ;;  %s7502_s26 = smov 28  }
 0x4de   : > { %4109 = vrot.lane.b32.xlu1 %v6099_v53, %s7498_s16  ;;  %4104 = vrot.lane.b32.xlu0 %v6120_v31, %s7497_s11 }
 0x4e2   : > { %4119 = vrot.lane.b32.xlu1 %v6099_v53, %s7353_s13  ;;  %4114 = vrot.lane.b32.xlu0 %v6120_v31, %s7498_s16 }
 0x4e6   : > { %4129 = vrot.lane.b32.xlu1 %v6099_v53, %s7501_s0  ;;  %4124 = vrot.lane.b32.xlu0 %v6120_v31, %s7353_s13  ;;  %s7503_s13 = smov 27  }
 0x4ea   : > { %4139 = vrot.lane.b32.xlu1 %v6099_v53, %s7499_s24  ;;  %4134 = vrot.lane.b32.xlu0 %v6120_v31, %s7501_s0 }
 0x4ee   : > { %4149 = vrot.lane.b32.xlu1 %v6099_v53, %s7502_s26  ;;  %4144 = vrot.lane.b32.xlu0 %v6120_v31, %s7499_s24 }
 0x4f2   : > { %4159 = vrot.lane.b32.xlu1 %v6099_v53, %s7464_s30  ;;  %4154 = vrot.lane.b32.xlu0 %v6120_v31, %s7502_s26 }
 0x4f6   : > { %4169 = vrot.lane.b32.xlu1 %v4168_v52, %s7502_s26  ;;  %4164 = vrot.lane.b32.xlu0 %v6120_v31, %s7464_s30 }
 0x4fa   : > { %1913 = vrot.lane.b32.xlu1 %v6087_v48, %s7503_s13  ;;  %1915 = vrot.lane.b32.xlu0 %v6090_v8, %s7503_s13 }
 0x4fe   : > { %1917 = vrot.lane.b32.xlu1 %v6093_v34, %s7503_s13  ;;  %1919 = vrot.lane.b32.xlu0 %v6107_v36, %s7503_s13 }
 0x502   : > { %1921 = vrot.lane.b32.xlu1 %v6111_v42, %s7503_s13  ;;  %4174 = vrot.lane.b32.xlu0 %v6099_v53, %s7449_s27 }
 0x506   : > { %4179 = vrot.lane.b32.xlu1 %v6099_v53, %s7448_s9  ;;  %4184 = vrot.lane.b32.xlu0 %v4183_v58, %s7449_s27 }
 0x50a   : > { %4189 = vrot.lane.b32.xlu1 %v4183_v58, %s7448_s9  ;;  %4194 = vrot.lane.b32.xlu0 %v4083_v33, %s7449_s27 }
 0x50e   : > { %4199 = vrot.lane.b32.xlu1 %v4083_v33, %s7448_s9  ;;  %4204 = vrot.lane.b32.xlu0 %v6099_v53, %s7451_s28 }
 0x512   : > { %4209 = vrot.lane.b32.xlu1 %v6099_v53, %s7450_s7  ;;  %4214 = vrot.lane.b32.xlu0 %v4183_v58, %s7451_s28 }
 0x516   : > { %4219 = vrot.lane.b32.xlu1 %v4183_v58, %s7450_s7  ;;  %4224 = vrot.lane.b32.xlu0 %v4083_v33, %s7451_s28 }
 0x51a   : > { %4229 = vrot.lane.b32.xlu1 %v4083_v33, %s7450_s7  ;;  %4234 = vrot.lane.b32.xlu0 %v6099_v53, %s7452_s10 }
 0x51e   : > { %4239 = vrot.lane.b32.xlu1 %v6099_v53, %s7504_s1  ;;  %4244 = vrot.lane.b32.xlu0 %v4183_v58, %s7452_s10 }
 0x522   : > { %4249 = vrot.lane.b32.xlu1 %v4183_v58, %s7504_s1  ;;  %4254 = vrot.lane.b32.xlu0 %v4083_v33, %s7452_s10 }
 0x526   : > { %4259 = vrot.lane.b32.xlu1 %v4083_v33, %s7504_s1  ;;  %4264 = vrot.lane.b32.xlu0 %v6099_v53, %s7453_s14 }
 0x52a   : > { %4269 = vrot.lane.b32.xlu1 %v4183_v58, %s7453_s14  ;;  %4274 = vrot.lane.b32.xlu0 %v4083_v33, %s7453_s14 }
 0x52e   : > { %4279 = vrot.lane.b32.xlu1 %v6099_v53, %s7505_s2  ;;  %4284 = vrot.lane.b32.xlu0 %v4283_v3, %s7503_s13 }
 0x532   : > { %4289 = vrot.lane.b32.xlu1 %v4183_v58, %s7505_s2  ;;  %4294 = vrot.lane.b32.xlu0 %v4083_v33, %s7505_s2 }
 0x536   : > { %4299 = vrot.lane.b32.xlu1 %v6099_v53, %s7455_s8  ;;  %4304 = vrot.lane.b32.xlu0 %v6099_v53, %s7454_s12 }
 0x53a   : > { %4309 = vrot.lane.b32.xlu1 %v4183_v58, %s7455_s8  ;;  %4314 = vrot.lane.b32.xlu0 %v4183_v58, %s7454_s12 }
 0x53e   : > { %2000 = vrot.lane.b32.xlu1 %v6107_v36, %s7454_s12  ;;  %4319 = vrot.lane.b32.xlu0 %v4083_v33, %s7455_s8 }
 0x542   : > { %4329 = vrot.lane.b32.xlu1 %v6099_v53, %s7506_s23  ;;  %4324 = vrot.lane.b32.xlu0 %v6099_v53, %s7507_s20 }
 0x544   : > { %v4075_v2 = vpop.permute.xlu0 %4074  ;;  %v4080_v60 = vpop.permute.xlu1 %4079 }
 0x545   : > { %v4077_v59 = vunpack.i.h.bf16 %v4075_v2  ;;  %v4076_v1 = vunpack.i.l.bf16 %v4075_v2  ;;  %v4082_v7 = vunpack.i.h.bf16 %v4080_v60  ;;  %v4081_v32 = vunpack.i.l.bf16 %v4080_v60 }
 0x546   : > { %4339 = vrot.lane.b32.xlu1 %v4183_v58, %s7506_s23  ;;  %4334 = vrot.lane.b32.xlu0 %v4183_v58, %s7507_s20 }
 0x547   : > { %v6219_v54 = vsel %vm7508_vm5, %v4082_v7, %v4076_v1  ;;  %v6222_v14 = vsel %vm7509_vm0, %v4076_v1, %v4077_v59  ;;  %vm7390_vm5 = vcmask 990208   ;;  %v6241_v38 = vsel %vm7509_vm0, %v4077_v59, %v4081_v32 }
 0x548   : > { %v3254_v44 = vpack.c.bf16 %v6219_v54, %v6079_v55  ;;  %v6226_v22 = vpop.permute.xlu0 %4084  ;;  %v6228_v47 = vpop.permute.xlu1 %4089  ;;  %v3252_v16 = vpack.c.bf16 %v6222_v14, %v6087_v48  ;;  %v6258_v6 = vsel %vm7390_vm5, %v6236_v35, 0.0  ;;  %v3307_v10 = vpack.c.bf16 %v6241_v38, %v6090_v8 }
 0x549   : > { %v4086_v43 = vunpack.i.l.bf16 %v6226_v22  ;;  %v6272_v63 = vpack.i.bf16 %v6258_v6, %v6111_v42  ;;  %v4091_v60 = vunpack.i.l.bf16 %v6228_v47 }
 0x54a   : > { %3253 = vmatprep.subr.bf16.mxu0 %v3252_v16  ;;  %2055 = vrot.lane.b32.xlu1 %v6107_v36, %s7506_s23 }
 0x54b   : > { %2027 = vrot.lane.b32.xlu0 %v6107_v36, %s7507_s20  ;;  %3256 = vmatpush1.bf16.msk.msra.mxu0 %vm3255_vm3, %v3254_v44  ;;  %v6248_v37 = vsel %vm7511_vm6, %v4081_v32, %v4086_v43  ;;  %vm7516_vm3 = vmmov %vm7509_vm0 }
 0x54c   : > { %v6250_v29 = vpop.permute.xlu0 %4094  ;;  %v6252_v40 = vpop.permute.xlu1 %4099  ;;  %v3305_v45 = vpack.c.bf16 %v6248_v37, %v6093_v34  ;;  %v4388_v34 = vpack.i.bf16 %v7366_v18, %v6258_v6  ;;  %vm7521_vm0 = vmmov %vm7520_vm11 }
 0x54d   : > { %v4101_v52 = vunpack.i.l.bf16 %v6252_v40  ;;  %vm7522_vm6 = vmmov %vm7521_vm0 }
 0x54e   : > { %4349 = vrot.lane.b32.xlu1 %v6120_v31, %s7512_s19  ;;  %3306 = vmatprep.subr.bf16.mxu1 %v3305_v45 }
 0x54f   : > { %4344 = vrot.lane.b32.xlu0 %v6099_v53, %s7512_s19  ;;  %3308 = vmatpush1.bf16.msra.mxu1 %v3307_v10  ;;  %v4398_v32 = vpack.i.bf16 %v4101_v52, %v4091_v60 }
 0x550   : > { %v6266_v61 = vpop.permute.xlu0 %4104  ;;  %v6268_v20 = vpop.permute.xlu1 %4109 }
 0x551   : > { %v7372_v59 = vunpack.i.l.bf16 %v6268_v20 }
 0x552   : > { %4354 = vrot.lane.b32.xlu1 %v6272_v63, %s7513_s15  ;;  %s3449_s15 = smul.u32 56, %s5013_s29 }
 0x553   : > { %4359 = vrot.lane.b32.xlu0 %v6272_v63, %s7497_s11 }
 0x554   : > { %v6278_v55 = vpop.permute.xlu0 %4114  ;;  %v6280_v25 = vpop.permute.xlu1 %4119 }
 0x555   : > { %v7369_v24 = vunpack.i.l.bf16 %v6280_v25 }
 0x556   : > { %4364 = vrot.lane.b32.xlu1 %v6272_v63, %s7498_s16 }
 0x557   : > { %4369 = vrot.lane.b32.xlu0 %v6272_v63, %s7514_s21 }
 0x558   : > { %v6286_v56 = vpop.permute.xlu0 %4124  ;;  %v6288_v9 = vpop.permute.xlu1 %4129 }
 0x559   : > { %v7371_v50 = vunpack.i.l.bf16 %v6288_v9 }
 0x55a   : > { %4374 = vrot.lane.b32.xlu1 %v6272_v63, %s7501_s0 }
 0x55b   : > { %4379 = vrot.lane.b32.xlu0 %v6272_v63, %s7499_s24  ;;  %s267_s24 = scalar_lea.vmem [#allocation8], %s3449_s15 }
 0x55c   : > { %v6294_v48 = vpop.permute.xlu0 %4134  ;;  %v6296_v8 = vpop.permute.xlu1 %4139 }
 0x55d   : > { %v7370_v44 = vunpack.i.l.bf16 %v6296_v8 }
 0x55e   : > { %4389 = vrot.lane.b32.xlu1 %v4388_v34, %s7500_s6 }
 0x55f   : > { %4384 = vrot.lane.b32.xlu0 %v6272_v63, %s7464_s30 }
 0x560   : > { %v6303_v0 = vpop.permute.xlu0 %4144  ;;  %v6305_v53 = vpop.permute.xlu1 %4149 }
 0x562   : > { %4394 = vrot.lane.b32.xlu1 %v4388_v34, %s7502_s26  ;;  %v4403_v34 = vpack.i.bf16 %v7369_v24, %v7372_v59  ;;  %v6368_v24 = vunpack.i.l.bf16 %v6305_v53  ;;  %v4423_v59 = vpack.i.bf16 %v6219_v54, %v6083_v39  ;;  %v4418_v39 = vpack.i.bf16 %v6241_v38, %v6222_v14  ;;  %s2935_s26 = sshll.u32 %s267_s24, 4  ;;  %s7230_s26 = int_to_ptr.vmem [resolvable:$true] %s2935_s26 }
 0x563   : > { %1923 = vrot.lane.b32.xlu0 %v6258_v6, %s7503_s13  ;;  %v4102_v54 = vunpack.i.h.bf16 %v6252_v40  ;;  %s2921_s13 = scalar_lea.sflag [#allocation4], %s5013_s29 }
 0x564   : > { %v6310_v19 = vpop.permute.xlu0 %4154  ;;  %v6312_v21 = vpop.permute.xlu1 %4159 }
 0x565   : > { %v4157_v33 = vunpack.i.h.bf16 %v6310_v19  ;;  %v7368_v31 = vunpack.i.l.bf16 %v6310_v19  ;;  %v2114_v4 = vsel %vm746_vm2, %v4101_v52, %v4102_v54 }
 0x566   : > { %1707 = vrot.lane.b32.xlu1 %v6258_v6, %s7449_s27  ;;  %s4806_s27 = smov [#allocation8]  }
 0x567   : > { %1734 = vrot.lane.b32.xlu0 %v6258_v6, %s7448_s9  ;;  %v6336_v1 = vsel %vm522_vm9, %v7368_v31, %v4157_v33  ;;  %v7374_v31 = vunpack.i.h.bf16 %v6226_v22 }
 0x568   : > { %v6321_v58 = vpop.permute.xlu0 %4164  ;;  %v6323_v3 = vpop.permute.xlu1 %4169 }
 0x569   : > { %v7365_v2 = vunpack.i.l.bf16 %v6323_v3 }
 0x56a   : > { %1761 = vrot.lane.b32.xlu1 %v6258_v6, %s7451_s28 }
 0x56b   : > { %1788 = vrot.lane.b32.xlu0 %v6258_v6, %s7450_s7  ;;  %v6341_v7 = vsel %vm522_vm9, %v4157_v33, %v7365_v2  ;;  %v4408_v33 = vpack.i.bf16 %v7370_v44, %v7371_v50  ;;  %v7373_v2 = vunpack.i.l.bf16 %v6312_v21  ;;  %s4697_s7 = scalar_lea.vmem %s7230_s26, 896 }
 0x56c   : > { %7515 = vst [vmem:[#allocation30_spill] sm:$0xff] %v6341_v7  ;;  %v6344_v16 = vpop.permute.xlu0 %1915  ;;  %v6346_v45 = vpop.permute.xlu1 %1913  ;;  %p4698_p11 = scmp.ne.s32.totalorder %s7230_s26, %s4697_s7 }
 0x56e   : > { %4399 = vrot.lane.b32.xlu1 %v4398_v32, %s7512_s19  ;;  %v4413_v32 = vpack.i.bf16 %v6368_v24, %v7373_v2  ;;  %v4092_v2 = vunpack.i.h.bf16 %v6228_v47  ;;  %p4699_p7 = pnand %p4698_p11, %p7760_p3 }
 0x56f   : > { %4404 = vrot.lane.b32.xlu0 %v4403_v34, %s7512_s19 }
 0x570   : > { %v6362_v18 = vpop.permute.xlu0 %1919  ;;  %v6364_v10 = vpop.permute.xlu1 %1917  ;;  %v2094_v14 = vsel %vm725_vm1, %v4091_v60, %v4092_v2  ;;  %p4700_p9 = pneg %p4699_p7 }
 0x572   : > { %4409 = vrot.lane.b32.xlu1 %v4408_v33, %s7512_s19  ;;  %v6386_v33 = vsel %vm7516_vm3, %v4086_v43, %v7374_v31  ;;  %v7518_v43 = vunpack.i.l.bf16 %v6250_v29  ;;  %vm7524_vm3 = vmmov %vm7521_vm0 }
 0x573   : > { %2386 = vrot.lane.b32.xlu0 %v6346_v45, %s7512_s19  ;;  %7517 = vst [vmem:[#allocation31_spill] sm:$0xff] %v6386_v33 }
 0x574   : > { %v4175_v34 = vpop.permute.xlu0 %4174  ;;  %v6376_v44 = vpop.permute.xlu1 %1921  ;;  %v2095_v31 = vsel %vm725_vm1, %v4092_v2, %v7518_v43 }
 0x575   : > { %v4177_v12 = vunpack.i.h.bf16 %v4175_v34  ;;  %v4176_v49 = vunpack.i.l.bf16 %v4175_v34  ;;  %v7519_v34 = vunpack.i.l.bf16 %v6266_v61  ;;  %v4433_v46 = vpack.i.bf16 %v2095_v31, %v2094_v14 }
 0x576   : > { %4414 = vrot.lane.b32.xlu1 %v4413_v32, %s7512_s19  ;;  %v4428_v32 = vpack.i.bf16 %v6386_v33, %v6248_v37 }
 0x577   : > { %4424 = vrot.lane.b32.xlu0 %v4423_v59, %s7512_s19  ;;  %v2115_v59 = vsel %vm746_vm2, %v4102_v54, %v7519_v34  ;;  %v1710_v40 = vsel %vm7520_vm11, %v4176_v49, %v4177_v12  ;;  %vm7526_vm11 = vmmov %vm7521_vm0 }
 0x578   : > { %v4185_v50 = vpop.permute.xlu0 %4184  ;;  %v4180_v26 = vpop.permute.xlu1 %4179  ;;  %v4438_v34 = vpack.i.bf16 %v2115_v59, %v2114_v4 }
 0x579   : > { %v4182_v23 = vunpack.i.h.bf16 %v4180_v26  ;;  %v4181_v47 = vunpack.i.l.bf16 %v4180_v26  ;;  %v4186_v38 = vunpack.i.l.bf16 %v4185_v50  ;;  %v4187_v52 = vunpack.i.h.bf16 %v4185_v50 }
 0x57a   : > { %4419 = vrot.lane.b32.xlu1 %v4418_v39, %s7512_s19 }
 0x57b   : > { %4429 = vrot.lane.b32.xlu0 %v4428_v32, %s7512_s19  ;;  %v1737_v43 = vsel %vm354_vm8, %v4181_v47, %v4182_v23  ;;  %v1709_v32 = vsel %vm7521_vm0, %v4186_v38, %v4176_v49  ;;  %v1711_v14 = vsel %vm7526_vm11, %v4177_v12, %v4187_v52  ;;  %vm7527_vm0 = vcmask 957440  }
 0x57c   : > { %v6409_v37 = vpop.permute.xlu0 %4194  ;;  %v4190_v26 = vpop.permute.xlu1 %4189  ;;  %v3257_v13 = vpack.c.bf16 %v1737_v43, %v1710_v40  ;;  %vm7536_vm5 = vmmov %vm7527_vm0 }
 0x57d   : > { %v4191_v30 = vunpack.i.l.bf16 %v4190_v26  ;;  %v7386_v39 = vunpack.i.h.bf16 %v6409_v37  ;;  %v4196_v2 = vunpack.i.l.bf16 %v6409_v37  ;;  %v4192_v60 = vunpack.i.h.bf16 %v4190_v26 }
 0x57e   : > { %3258 = vmatprep.subr.bf16.mxu0 %v3257_v13  ;;  %4434 = vrot.lane.b32.xlu1 %v4433_v46, %s7512_s19 }
 0x57f   : > { %v1736_v57 = vsel %vm354_vm8, %v4191_v30, %v4181_v47  ;;  %4439 = vrot.lane.b32.xlu0 %v4438_v34, %s7512_s19  ;;  %v6424_v13 = vsel %vm7522_vm6, %v4196_v2, %v7386_v39  ;;  %v1738_v49 = vsel %vm354_vm8, %v4182_v23, %v4192_v60  ;;  %v1712_v30 = vsel %vm7524_vm3, %v4187_v52, %v4196_v2  ;;  %vm7529_vm3 = vmmov %vm7527_vm0 }
 0x580   : > { %v4205_v54 = vpop.permute.xlu0 %4204  ;;  %v6417_v40 = vpop.permute.xlu1 %4199  ;;  %v3259_v31 = vpack.c.bf16 %v1736_v57, %v1709_v32  ;;  %7523 = vst [vmem:[#allocation32_spill] sm:$0xff] %v6424_v13  ;;  %v3311_v2 = vpack.c.bf16 %v1738_v49, %v1711_v14  ;;  %vm7528_vm6 = vcmask 949248  }
 0x581   : > { %v7385_v4 = vunpack.i.h.bf16 %v6417_v40  ;;  %v4201_v59 = vunpack.i.l.bf16 %v6417_v40  ;;  %v4207_v46 = vunpack.i.h.bf16 %v4205_v54  ;;  %v4206_v50 = vunpack.i.l.bf16 %v4205_v54  ;;  %vm7530_vm11 = vmmov %vm7528_vm6 }
 0x582   : > { %3260 = vmatpush1.bf16.msra.mxu0 %v3259_v31  ;;  %vm7535_vm7 = vmmov %vm7528_vm6 }
 0x583   : > { %v6431_v57 = vsel %vm354_vm8, %v4201_v59, %v7385_v4  ;;  %v1739_v47 = vsel %vm354_vm8, %v4192_v60, %v4201_v59  ;;  %v1764_v31 = vsel %vm7527_vm0, %v4206_v50, %v4207_v46 }
 0x584   : > { %7525 = vst [vmem:[#allocation33_spill] sm:$0xff] %v6431_v57  ;;  %v4215_v38 = vpop.permute.xlu0 %4214  ;;  %v4210_v43 = vpop.permute.xlu1 %4209  ;;  %v3309_v26 = vpack.c.bf16 %v1739_v47, %v1712_v30 }
 0x585   : > { %v4212_v34 = vunpack.i.h.bf16 %v4210_v43  ;;  %v4211_v32 = vunpack.i.l.bf16 %v4210_v43  ;;  %v4216_v54 = vunpack.i.l.bf16 %v4215_v38  ;;  %v4217_v43 = vunpack.i.h.bf16 %v4215_v38 }
 0x586   : > { %3310 = vmatprep.subr.bf16.mxu1 %v3309_v26 }
 0x587   : > { %3312 = vmatpush1.bf16.msra.mxu1 %v3311_v2  ;;  %v1791_v4 = vsel %vm7528_vm6, %v4211_v32, %v4212_v34  ;;  %v1763_v49 = vsel %vm7529_vm3, %v4216_v54, %v4206_v50  ;;  %vm7532_vm3 = vmmov %vm7527_vm0 }
 0x588   : > { %v6439_v39 = vpop.permute.xlu0 %4224  ;;  %v4220_v60 = vpop.permute.xlu1 %4219  ;;  %v3261_v12 = vpack.c.bf16 %v1791_v4, %v1764_v31 }
 0x589   : > { %v4221_v52 = vunpack.i.l.bf16 %v4220_v60  ;;  %v7391_v59 = vunpack.i.h.bf16 %v6439_v39  ;;  %v4226_v30 = vunpack.i.l.bf16 %v6439_v39  ;;  %v4222_v47 = vunpack.i.h.bf16 %v4220_v60 }
 0x58a   : > { %3262 = vmatprep.subr.bf16.mxu0 %v3261_v12 }
 0x58b   : > { %v1790_v14 = vsel %vm7530_vm11, %v4221_v52, %v4211_v32  ;;  %v6452_v31 = vsel %vm7527_vm0, %v4226_v30, %v7391_v59  ;;  %v1792_v60 = vsel %vm7528_vm6, %v4212_v34, %v4222_v47  ;;  %v1766_v50 = vsel %vm7532_vm3, %v4217_v43, %v4226_v30  ;;  %vm7533_vm11 = vmmov %vm7528_vm6 }
 0x58c   : > { %v4235_v26 = vpop.permute.xlu0 %4234  ;;  %v6445_v2 = vpop.permute.xlu1 %4229  ;;  %v3263_v23 = vpack.c.bf16 %v1790_v14, %v1763_v49  ;;  %7531 = vst [vmem:[#allocation34_spill] sm:$0xff] %v6452_v31  ;;  %v1765_v52 = vsel %vm7536_vm5, %v4207_v46, %v4217_v43  ;;  %vm7537_vm0 = vcmask 883712   ;;  %vm7538_vm6 = vcmask 875520  }
 0x58d   : > { %v7395_v5 = vunpack.i.h.bf16 %v6445_v2  ;;  %v4231_v4 = vunpack.i.l.bf16 %v6445_v2  ;;  %v4237_v32 = vunpack.i.h.bf16 %v4235_v26  ;;  %v4236_v38 = vunpack.i.l.bf16 %v4235_v26  ;;  %vm7541_vm5 = vmmov %vm7537_vm0 }
 0x58e   : > { %3264 = vmatpush1.bf16.msra.mxu0 %v3263_v23  ;;  %v3315_v30 = vpack.c.bf16 %v1792_v60, %v1765_v52  ;;  %vm7543_vm3 = vmmov %vm7538_vm6 }
 0x58f   : > { %v6459_v54 = vsel %vm7533_vm11, %v4231_v4, %v7395_v5  ;;  %v1793_v12 = vsel %vm7535_vm7, %v4222_v47, %v4231_v4  ;;  %v1818_v13 = vsel %vm7537_vm0, %v4236_v38, %v4237_v32  ;;  %vm7540_vm7 = vmmov %vm7537_vm0 }
 0x590   : > { %7534 = vst [vmem:[#allocation35_spill] sm:$0xff] %v6459_v54  ;;  %v4245_v49 = vpop.permute.xlu0 %4244  ;;  %v4240_v14 = vpop.permute.xlu1 %4239  ;;  %v3313_v59 = vpack.c.bf16 %v1793_v12, %v1766_v50  ;;  %vm7544_vm11 = vmmov %vm7543_vm3 }
 0x591   : > { %v4242_v23 = vunpack.i.h.bf16 %v4240_v14  ;;  %v4241_v27 = vunpack.i.l.bf16 %v4240_v14  ;;  %v4246_v26 = vunpack.i.l.bf16 %v4245_v49  ;;  %v4152_v14 = vunpack.i.h.bf16 %v6305_v53 }
 0x592   : > { %3314 = vmatprep.subr.bf16.mxu1 %v3313_v59  ;;  %v4247_v60 = vunpack.i.h.bf16 %v4245_v49 }
 0x593   : > { %3316 = vmatpush1.bf16.msra.mxu1 %v3315_v30  ;;  %v1845_v5 = vsel %vm7538_vm6, %v4241_v27, %v4242_v23  ;;  %v1817_v59 = vsel %vm7540_vm7, %v4246_v26, %v4236_v38  ;;  %v4172_v38 = vunpack.i.h.bf16 %v6323_v3  ;;  %vm7546_vm6 = vmmov %vm7543_vm3  ;;  %vm7548_vm7 = vcmask 867328  }
 0x594   : > { %v6467_v57 = vpop.permute.xlu0 %4254  ;;  %v4250_v47 = vpop.permute.xlu1 %4249  ;;  %v3265_v46 = vpack.c.bf16 %v1845_v5, %v1818_v13  ;;  %v1819_v26 = vsel %vm7537_vm0, %v4237_v32, %v4247_v60 }
 0x595   : > { %7539 = vst [vmem:[#allocation36_spill] sm:$0xff] %v6467_v57  ;;  %v7399_v43 = vunpack.i.h.bf16 %v6467_v57  ;;  %v4256_v4 = vunpack.i.l.bf16 %v6467_v57  ;;  %v4252_v50 = vunpack.i.h.bf16 %v4250_v47  ;;  %v4251_v12 = vunpack.i.l.bf16 %v4250_v47 }
 0x596   : > { %3266 = vmatprep.subr.bf16.mxu0 %v3265_v46 }
 0x597   : > { %v6476_v52 = vsel %vm7541_vm5, %v4256_v4, %v7399_v43  ;;  %v1844_v30 = vsel %vm7543_vm3, %v4251_v12, %v4241_v27  ;;  %v1846_v5 = vsel %vm7544_vm11, %v4242_v23, %v4252_v50  ;;  %v6488_v27 = vsel %vm522_vm9, %v6368_v24, %v4152_v14  ;;  %vm7549_vm5 = vmmov %vm7537_vm0 }
 0x598   : > { %7542 = vst [vmem:[#allocation37_spill] sm:$0xff] %v6476_v52  ;;  %v3267_v13 = vpack.c.bf16 %v1844_v30, %v1817_v59  ;;  %v4265_v34 = vpop.permute.xlu0 %4264  ;;  %v6480_v31 = vpop.permute.xlu1 %4259  ;;  %v1820_v46 = vsel %vm7549_vm5, %v4247_v60, %v4256_v4  ;;  %v3319_v59 = vpack.c.bf16 %v1846_v5, %v1819_v26  ;;  %v1898_v4 = vsel %vm522_vm9, %v4172_v38, %v6368_v24  ;;  %vm7552_vm11 = vmmov %vm7548_vm7 }
 0x599   : > { %7545 = vst [vmem:[#allocation38_spill] sm:$0xff] %v6480_v31  ;;  %v4267_v47 = vunpack.i.h.bf16 %v4265_v34  ;;  %v4266_v54 = vunpack.i.l.bf16 %v4265_v34  ;;  %v7402_v53 = vunpack.i.h.bf16 %v6480_v31  ;;  %v4261_v49 = vunpack.i.l.bf16 %v6480_v31  ;;  %vm7554_vm0 = vmmov %vm7548_vm7 }
 0x59a   : > { %3268 = vmatpush1.bf16.msra.mxu0 %v3267_v13  ;;  %vm7557_vm5 = vcmask 211968  }
 0x59b   : > { %v6493_v23 = vsel %vm7546_vm6, %v4261_v49, %v7402_v53  ;;  %v1872_v34 = vsel %vm7548_vm7, %v4266_v54, %v4267_v47  ;;  %v1847_v12 = vsel %vm7543_vm3, %v4252_v50, %v4261_v49  ;;  %v7551_v50 = vunpack.i.l.bf16 %v6310_v19  ;;  %vm7555_vm6 = vmmov %vm7554_vm0 }
 0x59c   : > { %7547 = vst [vmem:[#allocation39_spill] sm:$0xff] %v6493_v23  ;;  %v6500_v30 = vpop.permute.xlu0 %4274  ;;  %v4270_v13 = vpop.permute.xlu1 %4269  ;;  %v3269_v43 = vpack.c.bf16 %v6488_v27, %v1872_v34  ;;  %v3317_v57 = vpack.c.bf16 %v1847_v12, %v1820_v46  ;;  %vm7556_vm7 = vmmov %vm7554_vm0 }
 0x59d   : > { %7550 = vst [vmem:[#allocation40_spill] sm:$0xff] %v6500_v30  ;;  %v7406_v31 = vunpack.i.h.bf16 %v6500_v30  ;;  %v4276_v53 = vunpack.i.l.bf16 %v6500_v30  ;;  %v4272_v35 = vunpack.i.h.bf16 %v4270_v13  ;;  %v4271_v33 = vunpack.i.l.bf16 %v4270_v13  ;;  %vm7559_vm3 = vmmov %vm7557_vm5 }
 0x59e   : > { %v6510_v60 = vsel %vm522_vm9, %v4152_v14, %v7551_v50  ;;  %3270 = vmatprep.subr.bf16.mxu0 %v3269_v43  ;;  %3318 = vmatprep.subr.bf16.mxu1 %v3317_v57 }
 0x59f   : > { %v6515_v5 = vsel %vm7552_vm11, %v4276_v53, %v7406_v31  ;;  %v1873_v49 = vsel %vm7554_vm0, %v4267_v47, %v4272_v35  ;;  %v1871_v26 = vsel %vm7555_vm6, %v4271_v33, %v4266_v54  ;;  %3320 = vmatpush1.bf16.msra.mxu1 %v3319_v59  ;;  %v1874_v34 = vsel %vm7556_vm7, %v4272_v35, %v4276_v53  ;;  %vm7560_vm11 = vmmov %vm7559_vm3 }
 0x5a0   : > { %7553 = vst [vmem:[#allocation41_spill] sm:$0xff] %v6515_v5  ;;  %v3271_v24 = vpack.c.bf16 %v1898_v4, %v1871_v26  ;;  %v6520_v38 = vpop.permute.xlu0 %4284  ;;  %v4280_v19 = vpop.permute.xlu1 %4279  ;;  %v3321_v14 = vpack.c.bf16 %v6336_v1, %v1874_v34  ;;  %v3323_v57 = vpack.c.bf16 %v6510_v60, %v1873_v49  ;;  %v6530_v35 = vsel %vm550_vm14, %v6346_v45, %v6344_v16  ;;  %vm7561_vm0 = vmmov %vm7559_vm3 }
 0x5a1   : > { %v4282_v46 = vunpack.i.h.bf16 %v4280_v19  ;;  %v4281_v12 = vunpack.i.l.bf16 %v4280_v19  ;;  %v4286_v47 = vunpack.i.l.bf16 %v6520_v38  ;;  %v6541_v26 = vsel %vm550_vm14, %v6344_v16, %v6364_v10  ;;  %vm7562_vm6 = vmmov %vm7561_vm0 }
 0x5a2   : > { %3272 = vmatpush1.bf16.msra.mxu0 %v3271_v24  ;;  %3322 = vmatprep.subr.bf16.mxu1 %v3321_v14  ;;  %v6546_v34 = vsel %vm550_vm14, %v6364_v10, %v6362_v18 }
 0x5a3   : > { %3324 = vmatpush1.bf16.msra.mxu1 %v3323_v57  ;;  %v1953_v33 = vsel %vm7557_vm5, %v4281_v12, %v4282_v46  ;;  %v1925_v24 = vsel %vm550_vm14, %v4286_v47, %v6346_v45 }
 0x5a4   : > { %v6533_v54 = vpop.permute.xlu0 %4294  ;;  %v4290_v53 = vpop.permute.xlu1 %4289  ;;  %v3273_v59 = vpack.c.bf16 %v1953_v33, %v6530_v35 }
 0x5a5   : > { %7558 = vst [vmem:[#allocation42_spill] sm:$0xff] %v6533_v54  ;;  %v7405_v13 = vunpack.i.h.bf16 %v6533_v54  ;;  %v4296_v4 = vunpack.i.l.bf16 %v6533_v54  ;;  %v4292_v50 = vunpack.i.h.bf16 %v4290_v53  ;;  %v4291_v49 = vunpack.i.l.bf16 %v4290_v53 }
 0x5a6   : > { %3274 = vmatprep.subr.bf16.mxu0 %v3273_v59 }
 0x5a7   : > { %v1952_v19 = vsel %vm7559_vm3, %v4291_v49, %v4281_v12  ;;  %v1954_v14 = vsel %vm7560_vm11, %v4282_v46, %v4292_v50  ;;  %v1955_v57 = vsel %vm7561_vm0, %v4292_v50, %v4296_v4  ;;  %v6556_v16 = vsel %vm7562_vm6, %v4296_v4, %v7405_v13 }
 0x5a8   : > { %7563 = vst [vmem:[#allocation43_spill] sm:$0xff] %v6556_v16  ;;  %v3275_v33 = vpack.c.bf16 %v1952_v19, %v1925_v24  ;;  %v3327_v53 = vpack.c.bf16 %v1954_v14, %v6541_v26  ;;  %v4305_v10 = vpop.permute.xlu0 %4304  ;;  %v4300_v43 = vpop.permute.xlu1 %4299  ;;  %v3325_v32 = vpack.c.bf16 %v1955_v57, %v6546_v34  ;;  %vm7580_vm0 = vcmask 310272  }
 0x5a9   : > { %v4307_v45 = vunpack.i.h.bf16 %v4305_v10  ;;  %v4306_v47 = vunpack.i.l.bf16 %v4305_v10  ;;  %v4302_v59 = vunpack.i.h.bf16 %v4300_v43  ;;  %v4301_v12 = vunpack.i.l.bf16 %v4300_v43 }
 0x5aa   : > { %3276 = vmatpush1.bf16.msra.mxu0 %v3275_v33  ;;  %3326 = vmatprep.subr.bf16.mxu1 %v3325_v32  ;;  %vm7581_vm6 = vcmask 302080  }
 0x5ab   : > { %3328 = vmatpush1.bf16.msra.mxu1 %v3327_v53  ;;  %v1980_v46 = vsel %vm606_vm12, %v4301_v12, %v4302_v59  ;;  %v2007_v50 = vsel %vm634_vm15, %v4306_v47, %v4307_v45 }
 0x5ac   : > { %v4315_v4 = vpop.permute.xlu0 %4314  ;;  %v4310_v49 = vpop.permute.xlu1 %4309  ;;  %v3277_v24 = vpack.c.bf16 %v2007_v50, %v1980_v46 }
 0x5ad   : > { %v4317_v19 = vunpack.i.h.bf16 %v4315_v4  ;;  %v4316_v14 = vunpack.i.l.bf16 %v4315_v4  ;;  %v4312_v13 = vunpack.i.h.bf16 %v4310_v49  ;;  %v4311_v31 = vunpack.i.l.bf16 %v4310_v49 }
 0x5ae   : > { %3278 = vmatprep.subr.bf16.mxu0 %v3277_v24 }
 0x5af   : > { %v2006_v57 = vsel %vm634_vm15, %v4316_v14, %v4306_v47  ;;  %v1979_v10 = vsel %vm606_vm12, %v4311_v31, %v4301_v12  ;;  %v2008_v53 = vsel %vm634_vm15, %v4307_v45, %v4317_v19  ;;  %v1981_v16 = vsel %vm606_vm12, %v4302_v59, %v4312_v13 }
 0x5b0   : > { %v3279_v43 = vpack.c.bf16 %v2006_v57, %v1979_v10  ;;  %v6564_v33 = vpop.permute.xlu0 %4319  ;;  %v6566_v32 = vpop.permute.xlu1 %2000  ;;  %v3331_v4 = vpack.c.bf16 %v2008_v53, %v1981_v16 }
 0x5b1   : > { %7564 = vst [vmem:[#allocation44_spill] sm:$0xff] %v6564_v33  ;;  %7565 = vst [vmem:[#allocation45_spill] sm:$0xff] %v6566_v32  ;;  %v7407_v46 = vunpack.i.h.bf16 %v6564_v33  ;;  %v4321_v50 = vunpack.i.l.bf16 %v6564_v33  ;;  %v2009_v12 = vsel %vm634_vm15, %v4317_v19, %v6566_v32 }
 0x5b2   : > { %3280 = vmatpush1.bf16.msra.mxu0 %v3279_v43 }
 0x5b3   : > { %v6575_v47 = vsel %vm606_vm12, %v4321_v50, %v7407_v46  ;;  %v1982_v31 = vsel %vm606_vm12, %v4312_v13, %v4321_v50 }
 0x5b4   : > { %7566 = vst [vmem:[#allocation46_spill] sm:$0xff] %v6575_v47  ;;  %v3329_v49 = vpack.c.bf16 %v2009_v12, %v1982_v31  ;;  %v4325_v45 = vpop.permute.xlu0 %4324  ;;  %v4330_v24 = vpop.permute.xlu1 %4329 }
 0x5b5   : > { %v4327_v59 = vunpack.i.h.bf16 %v4325_v45  ;;  %v4326_v14 = vunpack.i.l.bf16 %v4325_v45  ;;  %v4332_v57 = vunpack.i.h.bf16 %v4330_v24  ;;  %v4331_v10 = vunpack.i.l.bf16 %v4330_v24 }
 0x5b6   : > { %3330 = vmatprep.subr.bf16.mxu1 %v3329_v49 }
 0x5b7   : > { %3332 = vmatpush1.bf16.msra.mxu1 %v3331_v4  ;;  %v2034_v43 = vsel %vm662_vm13, %v4326_v14, %v4327_v59  ;;  %v2064_v46 = vsel %vm693_vm10, %v4331_v10, %v4332_v57 }
 0x5b8   : > { %v4335_v47 = vpop.permute.xlu0 %4334  ;;  %v4340_v33 = vpop.permute.xlu1 %4339  ;;  %v3281_v13 = vpack.c.bf16 %v2064_v46, %v2034_v43 }
 0x5b9   : > { %v4337_v50 = vunpack.i.h.bf16 %v4335_v47  ;;  %v4336_v5 = vunpack.i.l.bf16 %v4335_v47  ;;  %v4342_v19 = vunpack.i.h.bf16 %v4340_v33  ;;  %v4341_v16 = vunpack.i.l.bf16 %v4340_v33 }
 0x5ba   : > { %3282 = vmatprep.subr.bf16.mxu0 %v3281_v13 }
 0x5bb   : > { %v2033_v53 = vsel %vm662_vm13, %v4336_v5, %v4326_v14  ;;  %v2063_v31 = vsel %vm693_vm10, %v4341_v16, %v4331_v10  ;;  %v2035_v4 = vsel %vm662_vm13, %v4327_v59, %v4337_v50  ;;  %v2065_v49 = vsel %vm693_vm10, %v4332_v57, %v4342_v19 }
 0x5bc   : > { %v3283_v12 = vpack.c.bf16 %v2063_v31, %v2033_v53  ;;  %v6584_v45 = vpop.permute.xlu1 %2055  ;;  %v4097_v5 = vunpack.i.h.bf16 %v6250_v29  ;;  %v3335_v14 = vpack.c.bf16 %v2065_v49, %v2035_v4  ;;  %v4107_v59 = vunpack.i.h.bf16 %v6266_v61 }
 0x5bd   : > { %7567 = vst [vmem:[#allocation47_spill] sm:$0xff] %v6584_v45  ;;  %v6588_v24 = vpop.permute.xlu0 %2027  ;;  %v2066_v46 = vsel %vm693_vm10, %v4342_v19, %v6584_v45  ;;  %v7570_v57 = vunpack.i.l.bf16 %v6250_v29  ;;  %v4116_v16 = vunpack.i.l.bf16 %v6278_v55  ;;  %v7571_v4 = vunpack.i.l.bf16 %v6266_v61 }
 0x5be   : > { %7568 = vst [vmem:[#allocation48_spill] sm:$0xff] %v6588_v24  ;;  %v2036_v33 = vsel %vm662_vm13, %v4337_v50, %v6588_v24  ;;  %3284 = vmatpush1.bf16.msra.mxu0 %v3283_v12  ;;  %v4112_v50 = vunpack.i.h.bf16 %v6268_v20  ;;  %v4122_v29 = vunpack.i.h.bf16 %v6280_v25 }
 0x5bf   : > { %v3333_v47 = vpack.c.bf16 %v2066_v46, %v2036_v33  ;;  %v2096_v13 = vsel %vm725_vm1, %v7570_v57, %v4097_v5  ;;  %v2116_v49 = vsel %vm746_vm2, %v7571_v4, %v4107_v59  ;;  %v4126_v46 = vunpack.i.l.bf16 %v6286_v56 }
 0x5c0   : > { %v6595_v10 = vpop.permute.xlu1 %4349  ;;  %v2135_v32 = vsel %vm767_vm4, %v4112_v50, %v4116_v16  ;;  %v4117_v4 = vunpack.i.h.bf16 %v6278_v55 }
 0x5c1   : > { %7569 = vst [vmem:[#allocation49_spill] sm:$0xff] %v6595_v10  ;;  %v6597_v43 = vpop.permute.xlu0 %4344  ;;  %3334 = vmatprep.subr.bf16.mxu1 %v3333_v47 }
 0x5c2   : > { %3336 = vmatpush1.bf16.msra.mxu1 %v3335_v14 }
 0x5c4   : > { %v4355_v19 = vpop.permute.xlu1 %4354 }
 0x5c5   : > { %v4360_v53 = vpop.permute.xlu0 %4359  ;;  %v4357_v31 = vunpack.i.h.bf16 %v4355_v19  ;;  %v4356_v12 = vunpack.i.l.bf16 %v4355_v19 }
 0x5c6   : > { %v4362_v33 = vunpack.i.h.bf16 %v4360_v53  ;;  %v4361_v47 = vunpack.i.l.bf16 %v4360_v53 }
 0x5c7   : > { %v6612_v14 = vsel %vm725_vm1, %v4357_v31, %v6065_v62  ;;  %v6615_v57 = vsel %vm725_vm1, %v4356_v12, %v4357_v31  ;;  %v2097_v24 = vsel %vm725_vm1, %v4097_v5, %v4356_v12  ;;  %vm7572_vm1 = vcmask 318464  }
 0x5c8   : > { %v6620_v61 = vsel %vm746_vm2, %v4362_v33, %v6073_v28  ;;  %v6623_v19 = vsel %vm746_vm2, %v4361_v47, %v4362_v33  ;;  %v2117_v53 = vsel %vm746_vm2, %v4107_v59, %v4361_v47  ;;  %v6628_v45 = vpop.permute.xlu1 %4364  ;;  %v4443_v12 = vpack.i.bf16 %v2097_v24, %v2096_v13  ;;  %vm7575_vm2 = vmmov %vm7572_vm1 }
 0x5c9   : > { %v4448_v5 = vpack.i.bf16 %v2117_v53, %v2116_v49  ;;  %v4370_v52 = vpop.permute.xlu0 %4369  ;;  %v2155_v23 = vsel %vm7572_vm1, %v4122_v29, %v4126_v46  ;;  %v7417_v30 = vunpack.i.l.bf16 %v6628_v45  ;;  %v7573_v59 = vunpack.i.l.bf16 %v6268_v20  ;;  %vm7576_vm7 = vmmov %vm7572_vm1 }
 0x5ca   : > { %v4372_v54 = vunpack.i.h.bf16 %v4370_v52  ;;  %v4371_v33 = vunpack.i.l.bf16 %v4370_v52  ;;  %4444 = vrot.lane.b32.xlu0 %v4443_v12, %s7512_s19  ;;  %v7574_v49 = vunpack.i.l.bf16 %v6280_v25  ;;  %v4127_v13 = vunpack.i.h.bf16 %v6286_v56  ;;  %vm7577_vm5 = vmmov %vm7572_vm1 }
 0x5cb   : > { %v2134_v47 = vsel %vm767_vm4, %v7573_v59, %v4112_v50  ;;  %4449 = vrot.lane.b32.xlu1 %v4448_v5, %s7512_s19  ;;  %v4146_v56 = vunpack.i.l.bf16 %v6303_v0  ;;  %vm7578_vm3 = vmmov %vm7572_vm1  ;;  %v2136_v59 = vsel %vm767_vm4, %v4116_v16, %v4117_v4 }
 0x5cc   : > { %v2154_v24 = vsel %vm7575_vm2, %v7574_v49, %v4122_v29  ;;  %v6647_v52 = vsel %vm7576_vm7, %v4372_v54, %v6067_v41  ;;  %v6650_v20 = vsel %vm7577_vm5, %v4371_v33, %v4372_v54  ;;  %v6652_v50 = vpop.permute.xlu1 %4374  ;;  %v4453_v5 = vpack.i.bf16 %v2135_v32, %v2134_v47  ;;  %vm7579_vm11 = vmmov %vm7572_vm1 }
 0x5cd   : > { %v6656_v53 = vpop.permute.xlu0 %4379  ;;  %v4458_v25 = vpack.i.bf16 %v2155_v23, %v2154_v24  ;;  %v4136_v29 = vunpack.i.l.bf16 %v6294_v48  ;;  %v2157_v12 = vsel %vm7578_vm3, %v4127_v13, %v4371_v33  ;;  %v2137_v54 = vsel %vm767_vm4, %v4117_v4, %v7417_v30  ;;  %vm7583_vm1 = vmmov %vm7580_vm0 }
 0x5ce   : > { %4454 = vrot.lane.b32.xlu0 %v4453_v5, %s7512_s19  ;;  %v2156_v49 = vsel %vm7579_vm11, %v4126_v46, %v4127_v13  ;;  %v4132_v23 = vunpack.i.h.bf16 %v6288_v9  ;;  %v4142_v32 = vunpack.i.h.bf16 %v6296_v8  ;;  %v4463_v33 = vpack.i.bf16 %v2137_v54, %v2136_v59  ;;  %vm7585_vm2 = vmmov %vm7581_vm6 }
 0x5cf   : > { %4459 = vrot.lane.b32.xlu1 %v4458_v25, %s7512_s19  ;;  %v4468_v24 = vpack.i.bf16 %v2157_v12, %v2156_v49  ;;  %v7420_v25 = vunpack.i.l.bf16 %v6656_v53  ;;  %v7582_v46 = vunpack.i.l.bf16 %v6288_v9  ;;  %v4137_v13 = vunpack.i.h.bf16 %v6294_v48  ;;  %vm7586_vm7 = vmmov %vm7585_vm2 }
 0x5d0   : > { %v6670_v47 = vpop.permute.xlu1 %4389  ;;  %v2175_v31 = vsel %vm7580_vm0, %v4132_v23, %v4136_v29  ;;  %v2195_v5 = vsel %vm7581_vm6, %v4142_v32, %v4146_v56  ;;  %v7584_v12 = vunpack.i.l.bf16 %v6296_v8  ;;  %v4147_v59 = vunpack.i.h.bf16 %v6303_v0  ;;  %vm7588_vm5 = vmmov %vm7580_vm0 }
 0x5d1   : > { %v6672_v55 = vpop.permute.xlu0 %4384  ;;  %v2174_v4 = vsel %vm7583_vm1, %v7582_v46, %v4132_v23  ;;  %v7587_v48 = vunpack.i.l.bf16 %v6652_v50  ;;  %vm7589_vm3 = vmmov %vm7580_vm0  ;;  %vm7592_vm0 = vcmask 1031168   ;;  %vm7593_vm6 = vcmask 236544  }
 0x5d2   : > { %4469 = vrot.lane.b32.xlu0 %v4468_v24, %s7512_s19  ;;  %v2194_v54 = vsel %vm7585_vm2, %v7584_v12, %v4142_v32  ;;  %v4473_v24 = vpack.i.bf16 %v2175_v31, %v2174_v4  ;;  %v2197_v9 = vsel %vm7586_vm7, %v4147_v59, %v7420_v25  ;;  %v2176_v0 = vsel %vm7589_vm3, %v4136_v29, %v4137_v13  ;;  %vm7590_vm11 = vmmov %vm7585_vm2 }
 0x5d3   : > { %4464 = vrot.lane.b32.xlu1 %v4463_v33, %s7512_s19  ;;  %v4478_v16 = vpack.i.bf16 %v2195_v5, %v2194_v54  ;;  %v4166_v33 = vunpack.i.l.bf16 %v6321_v58  ;;  %v2177_v8 = vsel %vm7588_vm5, %v4137_v13, %v7587_v48  ;;  %v2196_v23 = vsel %vm7590_vm11, %v4146_v56, %v4147_v59  ;;  %vm7596_vm1 = vmmov %vm7593_vm6 }
 0x5d4   : > { %v6688_v49 = vpop.permute.xlu1 %4394  ;;  %v4162_v31 = vunpack.i.h.bf16 %v6312_v21  ;;  %v4488_v5 = vpack.i.bf16 %v2197_v9, %v2196_v23  ;;  %v4483_v46 = vpack.i.bf16 %v2177_v8, %v2176_v0  ;;  %v7591_v12 = vunpack.i.h.bf16 %v6409_v37  ;;  %v6737_v8 = vld [vmem:[%s7276_s3 + $0x8] sm:$0xff]  ;;  %vm7602_vm5 = vmmov %vm7596_vm1 }
 0x5d5   : > { %v6690_v30 = vpop.permute.xlu0 %1923  ;;  %v7418_v29 = vunpack.i.l.bf16 %v6672_v55  ;;  %v7594_v56 = vunpack.i.h.bf16 %v6417_v40  ;;  %v7595_v37 = vunpack.i.l.bf16 %v6312_v21  ;;  %v4167_v48 = vunpack.i.h.bf16 %v6321_v58  ;;  %vm7605_vm11 = vmmov %vm7596_vm1 }
 0x5d6   : > { %4479 = vrot.lane.b32.xlu0 %v4478_v16, %s7512_s19  ;;  %v2215_v16 = vsel %vm7593_vm6, %v4162_v31, %v4166_v33  ;;  %v4498_v0 = vpack.i.bf16 %v6510_v60, %v6488_v27  ;;  %vm7600_vm2 = vcmask 719872   ;;  %v7603_v27 = vunpack.i.h.bf16 %v6445_v2 }
 0x5d7   : > { %4474 = vrot.lane.b32.xlu1 %v4473_v24, %s7512_s19  ;;  %v2214_v9 = vsel %vm7596_vm1, %v7595_v37, %v4162_v31  ;;  %3048 = vmatprep.mubr.msk.f32.mxu0 %vm7600_vm2, %v6737_v8  ;;  %vm7601_vm7 = vmmov %vm7600_vm2  ;;  %v2217_v58 = vsel %vm7602_vm5, %v4167_v48, %v7418_v29  ;;  %vm7604_vm3 = vcmask 949248   ;;  %v7606_v2 = vpack.i.bf16 %v6341_v7, %v6336_v1 }
 0x5d8   : > { %v6704_v32 = vpop.permute.xlu1 %1707  ;;  %v4493_v31 = vpack.i.bf16 %v2215_v16, %v2214_v9  ;;  %3049 = vmatprep.mubr.msk.f32.mxu1 %vm7601_vm7, %v6737_v8  ;;  %v4347_v1 = vunpack.i.h.bf16 %v6597_v43 }
 0x5d9   : > { %v6706_v4 = vpop.permute.xlu0 %1734  ;;  %v6712_v54 = vsel %vm7592_vm0, %v7591_v12, %v6704_v32  ;;  %v2216_v12 = vsel %vm7605_vm11, %v4166_v33, %v4167_v48  ;;  %v7419_v48 = vunpack.i.h.bf16 %v6595_v10  ;;  %vm7608_vm0 = vcmask 56320  }
 0x5da   : > { %v6720_v13 = vsel %vm354_vm8, %v7594_v56, %v6706_v4  ;;  %4484 = vrot.lane.b32.xlu0 %v4483_v46, %s7512_s19  ;;  %vm7599_vm8 = vcmask 957440   ;;  %v4503_v56 = vpack.i.bf16 %v2217_v58, %v2216_v12  ;;  %v4346_v58 = vunpack.i.l.bf16 %v6597_v43  ;;  %vm7609_vm6 = vmmov %vm7608_vm0 }
 0x5db   : > { %4489 = vrot.lane.b32.xlu1 %v4488_v5, %s7512_s19  ;;  %v7598_v5 = vunpack.i.h.bf16 %v6439_v39  ;;  %vm7610_vm1 = vmmov %vm7608_vm0 }
 0x5dc   : > { %v6732_v40 = vpop.permute.xlu1 %1761  ;;  %v2403_v24 = vsel %vm7610_vm1, %v4346_v58, %v4347_v1  ;;  %vm7612_vm2 = vmmov %vm7608_vm0 }
 0x5dd   : > { %7597 = vst [vmem:[#allocation50_spill] sm:$0xff] %v6732_v40  ;;  %v6741_v23 = vpop.permute.xlu0 %1788  ;;  %v6747_v21 = vsel %vm7599_vm8, %v7598_v5, %v6732_v40  ;;  %vm7611_vm8 = vmmov %vm7608_vm0 }
 0x5de   : > { %v6760_v60 = vsel %vm7604_vm3, %v7603_v27, %v6741_v23  ;;  %4494 = vrot.lane.b32.xlu0 %v4493_v31, %s7512_s19  ;;  %v6793_v27 = vsel %vm550_vm14, %v6362_v18, %v6376_v44  ;;  %vm7613_vm7 = vmmov %vm7608_vm0 }
 0x5df   : > { %4499 = vrot.lane.b32.xlu1 %v4498_v0, %s7512_s19  ;;  %v4351_v0 = vunpack.i.l.bf16 %v6595_v10  ;;  %7607 = vst [vmem:[#allocation51_spill] sm:$0xff] %v6793_v27  ;;  %vm7614_vm5 = vmmov %vm7608_vm0 }
 0x5e0   : > { %v4400_v16 = vpop.permute.xlu1 %4399  ;;  %vm7616_vm3 = vmmov %vm7608_vm0 }
 0x5e1   : > { %v6769_v37 = vpop.permute.xlu0 %4404  ;;  %v2405_v43 = vsel %vm7608_vm0, %v4351_v0, %v7419_v48  ;;  %v2404_v18 = vsel %vm7609_vm6, %v4347_v1, %v4351_v0  ;;  %v4401_v29 = vunpack.i.l.bf16 %v4400_v16  ;;  %v4402_v40 = vunpack.i.h.bf16 %v4400_v16  ;;  %vm7617_vm11 = vmmov %vm7608_vm0 }
 0x5e2   : > { %4504 = vrot.lane.b32.xlu0 %v4503_v56, %s7512_s19  ;;  %vm7618_vm6 = vmmov %vm7608_vm0 }
 0x5e3   : > { %4509 = vrot.lane.b32.xlu1 %v7606_v2, %s7512_s19  ;;  %vm7619_vm1 = vmmov %vm7608_vm0 }
 0x5e4   : > { %v6776_v9 = vpop.permute.xlu1 %4409 }
 0x5e5   : > { %v6778_v5 = vpop.permute.xlu0 %2386 }
 0x5e6   : > { %2388 = vrot.lane.b32.xlu0 %v6530_v35, %s7512_s19 }
 0x5e7   : > { %2390 = vrot.lane.b32.xlu1 %v6541_v26, %s7512_s19 }
 0x5e8   : > { %v6784_v33 = vpop.permute.xlu1 %4414 }
 0x5e9   : > { %v4425_v31 = vpop.permute.xlu0 %4424 }
 0x5ea   : > { %v4426_v35 = vunpack.i.l.bf16 %v4425_v31  ;;  %2394 = vrot.lane.b32.xlu0 %v6793_v27, %s7512_s19  ;;  %v4427_v12 = vunpack.i.h.bf16 %v4425_v31 }
 0x5eb   : > { %2392 = vrot.lane.b32.xlu1 %v6546_v34, %s7512_s19 }
 0x5ec   : > { %v4420_v26 = vpop.permute.xlu1 %4419  ;;  %v2402_v34 = vsel %vm7611_vm8, %v4426_v35, %v4346_v58  ;;  %vm7622_vm8 = vcmask 1039360  }
 0x5ed   : > { %v6799_v56 = vpop.permute.xlu0 %4429  ;;  %v4422_v2 = vunpack.i.h.bf16 %v4420_v26  ;;  %v4421_v39 = vunpack.i.l.bf16 %v4420_v26 }
 0x5ee   : > { %v4431_v46 = vunpack.i.l.bf16 %v6799_v56  ;;  %1842 = vrot.lane.b32.xlu0 %v6258_v6, %s7504_s1  ;;  %v7615_v1 = vunpack.i.h.bf16 %v6799_v56 }
 0x5ef   : > { %v2409_v31 = vsel %vm7612_vm2, %v4427_v12, %v4421_v39  ;;  %1815 = vrot.lane.b32.xlu1 %v6258_v6, %s7452_s10  ;;  %v2410_v26 = vsel %vm7613_vm7, %v4421_v39, %v4422_v2  ;;  %vm7623_vm2 = vmmov %vm7622_vm8  ;;  %vm7626_vm7 = vcmask 302080  }
 0x5f0   : > { %v2411_v0 = vsel %vm7614_vm5, %v4422_v2, %v4431_v46  ;;  %v3287_v48 = vpack.c.bf16 %v2409_v31, %v2402_v34  ;;  %v6816_v25 = vpop.permute.xlu1 %4434  ;;  %v3285_v59 = vpack.c.bf16 %v2410_v26, %v2403_v24  ;;  %v2412_v58 = vsel %vm7616_vm3, %v4431_v46, %v7615_v1  ;;  %vm7628_vm5 = vmmov %vm7626_vm7 }
 0x5f1   : > { %v3339_v35 = vpack.c.bf16 %v2411_v0, %v2404_v18  ;;  %v6821_v12 = vpop.permute.xlu0 %4439  ;;  %v4437_v10 = vunpack.i.h.bf16 %v6816_v25  ;;  %v4436_v27 = vunpack.i.l.bf16 %v6816_v25  ;;  %v3337_v7 = vpack.c.bf16 %v2412_v58, %v2405_v43 }
 0x5f2   : > { %v4442_v39 = vunpack.i.h.bf16 %v6821_v12  ;;  %v4441_v2 = vunpack.i.l.bf16 %v6821_v12  ;;  %3286 = vmatprep.subr.bf16.mxu0 %v3285_v59  ;;  %1950 = vrot.lane.b32.xlu0 %v6258_v6, %s7505_s2  ;;  %v4543_v18 = vpack.i.bf16 %v6067_v41, %v6075_v17  ;;  %v4367_v34 = vunpack.i.h.bf16 %v6628_v45 }
 0x5f3   : > { %v2416_v24 = vsel %vm7617_vm11, %v4401_v29, %v4436_v27  ;;  %1869 = vrot.lane.b32.xlu1 %v6258_v6, %s7453_s14  ;;  %v2417_v46 = vsel %vm7608_vm0, %v4436_v27, %v4437_v10  ;;  %3338 = vmatprep.subr.bf16.mxu1 %v3337_v7  ;;  %v4392_v7 = vunpack.i.h.bf16 %v6670_v47  ;;  %v6856_v27 = vunpack.i.l.bf16 %v6670_v47 }
 0x5f4   : > { %v2423_v43 = vsel %vm7618_vm6, %v4402_v40, %v4441_v2  ;;  %3288 = vmatpush1.bf16.msra.mxu0 %v3287_v48  ;;  %v2424_v59 = vsel %vm7619_vm1, %v4441_v2, %v4442_v39  ;;  %3340 = vmatpush1.bf16.msra.mxu1 %v3339_v35  ;;  %v7620_v40 = vmov 0.0   ;;  %v4538_v48 = vpack.i.bf16 %v6073_v28, %v6065_v62  ;;  %vm7640_vm6 = vmmov %vm7619_vm1 }
 0x5f5   : > { %v3291_v16 = vpack.c.bf16 %v2423_v43, %v2416_v24  ;;  %v3289_v29 = vpack.c.bf16 %v2424_v59, %v2417_v46  ;;  %v7621_v62 = vunpack.i.h.bf16 %v6226_v22  ;;  %v2079_v47 = vsel %vm7623_vm2, %v6856_v27, %v4392_v7  ;;  %vm7642_vm2 = vmmov %vm7619_vm1 }
 0x5f6   : > { %4514 = vrot.lane.b32.xlu0 %v6272_v63, %s7454_s12  ;;  %v2139_v31 = vsel %vm767_vm4, %v4367_v34, %v6075_v17  ;;  %v7624_v26 = vunpack.i.l.bf16 %v6628_v45  ;;  %v4382_v22 = vunpack.i.h.bf16 %v6656_v53  ;;  %v7625_v1 = vpack.i.bf16 %v6620_v61, %v6623_v19 }
 0x5f7   : > { %1977 = vrot.lane.b32.xlu1 %v6258_v6, %s7455_s8  ;;  %3290 = vmatprep.subr.bf16.mxu0 %v3289_v29  ;;  %v4533_v6 = vpack.i.bf16 %v4392_v7, %v7620_v40  ;;  %v6869_v28 = vsel %vm7622_vm8, %v7621_v62, %v6856_v27  ;;  %v4377_v35 = vunpack.i.h.bf16 %v6652_v50  ;;  %v7627_v17 = vunpack.i.l.bf16 %v6656_v53  ;;  %vm7641_vm8 = vmmov %vm7619_vm1  ;;  %s4701_s8 = sshll.u32 %s4806_s27, 4  ;;  %s4702_s8 = int_to_ptr.vmem [resolvable:$false] %s4701_s8 }
 0x5f8   : > { %3292 = vmatpush1.bf16.msra.mxu0 %v3291_v16  ;;  %v4553_v41 = vpack.i.bf16 %v2079_v47, %v6869_v28  ;;  %v2138_v0 = vsel %vm767_vm4, %v7624_v26, %v4367_v34  ;;  %v2199_v2 = vsel %vm7626_vm7, %v4382_v22, %v6077_v51  ;;  %v4387_v24 = vunpack.i.h.bf16 %v6672_v55  ;;  %vm7643_vm7 = vmmov %vm7619_vm1  ;;  %s4703_s9 = scalar_lea.vmem %s4702_s8, 1792  ;;  %p4704_p12 = scmp.lt.s32.totalorder %s7230_s26, %s4702_s8 }
 0x5f9   : > { %v4568_v58 = vpack.i.bf16 %v2139_v31, %v2138_v0  ;;  %v2198_v45 = vsel %vm7628_vm5, %v7627_v17, %v4382_v22  ;;  %v7629_v61 = vpack.i.bf16 %v6612_v14, %v6615_v57  ;;  %vm7630_vm4 = vcmask 310272   ;;  %vm7644_vm5 = vmmov %vm7619_vm1  ;;  %p4705_p2 = scmp.lt.s32.totalorder %s4703_s9, %s4697_s7 }
 0x5fa   : > { %4524 = vrot.lane.b32.xlu0 %v6272_v63, %s7506_s23  ;;  %v4583_v19 = vpack.i.bf16 %v2199_v2, %v2198_v45  ;;  %v2179_v46 = vsel %vm7630_vm4, %v4377_v35, %v6069_v15  ;;  %v7631_v43 = vunpack.i.l.bf16 %v6652_v50  ;;  %vm7632_vm3 = vmmov %vm7630_vm4  ;;  %vm7633_vm11 = vcmask 236544  }
 0x5fb   : > { %4519 = vrot.lane.b32.xlu1 %v6272_v63, %s7507_s20  ;;  %v2219_v53 = vsel %vm7633_vm11, %v4387_v24, %v6071_v11  ;;  %v7634_v59 = vunpack.i.l.bf16 %v6672_v55  ;;  %vm7635_vm0 = vmmov %vm7633_vm11  ;;  %v4397_v29 = vunpack.i.h.bf16 %v6688_v49  ;;  %v6911_v14 = vunpack.i.l.bf16 %v6688_v49  ;;  %p4706_p13 = por %p4705_p2, %p4704_p12 }
 0x5fc   : > { %v7637_v7 = vunpack.i.l.bf16 %v6323_v3  ;;  %v6934_v3 = vpop.f32.mrb[6].mxu1  ;;  %vm7645_vm4 = vmmov %vm7619_vm1 }
 0x5fd   : > { %v2218_v16 = vsel %vm7635_vm0, %v7634_v59, %v4387_v24  ;;  %v4598_v49 = vpack.i.bf16 %v4397_v29, %v6071_v11  ;;  %v6944_v11 = vsel %vm550_vm14, %v6376_v44, %v6690_v30  ;;  %vm7647_vm11 = vmmov %vm7619_vm1  ;;  %p4707_p6 = pnand %p4706_p13, %p4700_p9 }
 0x5fe   : > { %4529 = vrot.lane.b32.xlu0 %v6272_v63, %s7512_s19  ;;  %v4548_v63 = vpack.i.bf16 %v6077_v51, %v6069_v15  ;;  %v2178_v51 = vsel %vm7632_vm3, %v7631_v43, %v4377_v35  ;;  %v7636_v15 = vpack.i.bf16 %v6647_v52, %v6650_v20  ;;  %v4588_v50 = vpack.i.bf16 %v2219_v53, %v2218_v16  ;;  %v6932_v20 = vpop.f32.mrb[6].mxu0  ;;  %vm7646_vm3 = vmmov %vm7619_vm1 }
 0x5ff   : > { %2061 = vrot.lane.b32.xlu1 %v7620_v40, %s7506_s23  ;;  %v4578_v57 = vpack.i.bf16 %v2179_v46, %v2178_v51  ;;  %v6922_v55 = vsel %vm522_vm9, %v7637_v7, %v6911_v14  ;;  %v4406_v35 = vunpack.i.l.bf16 %v6769_v37  ;;  %vm7648_vm0 = vmmov %vm7619_vm1  ;;  %s3450_s23 = smul.u32 896, %s4858_s22 }
 0x601   : > { %s7228_s28 = scalar_lea.hbm %s7278_s5, %s3450_s23 }
 0x602   : > { %4534 = vrot.lane.b32.xlu0 %v4533_v6, %s7512_s19  ;;  %v4287_v6 = vunpack.i.h.bf16 %v6520_v38 }
 0x603   : > { %4539 = vrot.lane.b32.xlu1 %v4538_v48, %s7512_s19  ;;  %v2222_v48 = vsel %vm522_vm9, %v6911_v14, %v4397_v29  ;;  %vm7638_vm9 = vmmov %vm7619_vm1 }
 0x604   : > { %v4593_v52 = vpack.i.bf16 %v2222_v48, %v6922_v55  ;;  %v2225_v34 = vsel %vm550_vm14, %v6690_v30, %v4287_v6  ;;  %vm7639_vm14 = vmmov %vm7619_vm1 }
 0x606   : > { %4544 = vrot.lane.b32.xlu0 %v4543_v18, %s7512_s19  ;;  %v6937_v18 = vpop.f32.mrb[7].mxu0 }
 0x607   : > { %4549 = vrot.lane.b32.xlu1 %v4548_v63, %s7512_s19  ;;  %v1510_v63 = vpop.f32.mrb[7].mxu1 }
 0x60a   : > { %4564 = vrot.lane.b32.xlu0 %v7625_v1, %s7512_s19 }
 0x60b   : > { %4554 = vrot.lane.b32.xlu1 %v4553_v41, %s7512_s19 }
 0x60e   : > { %4569 = vrot.lane.b32.xlu0 %v4568_v58, %s7512_s19  ;;  %v4407_v58 = vunpack.i.h.bf16 %v6769_v37 }
 0x60f   : > { %4559 = vrot.lane.b32.xlu1 %v7629_v61, %s7512_s19 }
 0x612   : > { %4584 = vrot.lane.b32.xlu0 %v4583_v19, %s7512_s19 }
 0x613   : > { %4574 = vrot.lane.b32.xlu1 %v7636_v15, %s7512_s19 }
 0x616   : > { %4589 = vrot.lane.b32.xlu0 %v4588_v50, %s7512_s19 }
 0x617   : > { %4579 = vrot.lane.b32.xlu1 %v4578_v57, %s7512_s19 }
 0x61a   : > { %4599 = vrot.lane.b32.xlu0 %v4598_v49, %s7512_s19 }
 0x61b   : > { %4594 = vrot.lane.b32.xlu1 %v4593_v52, %s7512_s19  ;;  %v4412_v52 = vunpack.i.h.bf16 %v6776_v9 }
 0x61e   : > { %2398 = vrot.lane.b32.xlu0 %v2225_v34, %s7512_s19 }
 0x61f   : > { %2396 = vrot.lane.b32.xlu1 %v6944_v11, %s7512_s19 }
 0x623   : > { %2400 = vrot.lane.b32.xlu1 %v4287_v6, %s7512_s19  ;;  %v4411_v6 = vunpack.i.l.bf16 %v6776_v9 }
 0x63c   : > { %v6950_v62 = vpop.permute.xlu0 %4444 }
 0x63d   : > { %v6952_v38 = vpop.permute.xlu1 %4449  ;;  %v4447_v47 = vunpack.i.h.bf16 %v6950_v62  ;;  %v4446_v41 = vunpack.i.l.bf16 %v6950_v62 }
 0x63e   : > { %v4452_v31 = vunpack.i.h.bf16 %v6952_v38  ;;  %v4451_v44 = vunpack.i.l.bf16 %v6952_v38 }
 0x63f   : > { %v2418_v26 = vsel %vm7638_vm9, %v4437_v10, %v4446_v41  ;;  %v2419_v22 = vsel %vm7640_vm6, %v4446_v41, %v4447_v47  ;;  %vm7649_vm9 = vmmov %vm7648_vm0 }
 0x640   : > { %v2425_v0 = vsel %vm7639_vm14, %v4442_v39, %v4451_v44  ;;  %v2426_v1 = vsel %vm7619_vm1, %v4451_v44, %v4452_v31  ;;  %v4455_v25 = vpop.permute.xlu0 %4454  ;;  %vm7650_vm14 = vmmov %vm7648_vm0 }
 0x641   : > { %v3343_v2 = vpack.c.bf16 %v2425_v0, %v2418_v26  ;;  %v4460_v17 = vpop.permute.xlu1 %4459  ;;  %v3341_v10 = vpack.c.bf16 %v2426_v1, %v2419_v22  ;;  %v4457_v45 = vunpack.i.h.bf16 %v4455_v25  ;;  %v4456_v12 = vunpack.i.l.bf16 %v4455_v25  ;;  %vm7651_vm6 = vmmov %vm7648_vm0 }
 0x642   : > { %v4462_v24 = vunpack.i.h.bf16 %v4460_v17  ;;  %v4461_v39 = vunpack.i.l.bf16 %v4460_v17  ;;  %vm7652_vm1 = vmmov %vm7648_vm0 }
 0x643   : > { %3342 = vmatprep.subr.bf16.mxu1 %v3341_v10  ;;  %v2430_v61 = vsel %vm7641_vm8, %v4406_v35, %v4456_v12  ;;  %v2431_v46 = vsel %vm7643_vm7, %v4456_v12, %v4457_v45  ;;  %vm7653_vm8 = vmmov %vm7648_vm0 }
 0x644   : > { %v2437_v19 = vsel %vm7642_vm2, %v4407_v58, %v4461_v39  ;;  %3344 = vmatpush1.bf16.msra.mxu1 %v3343_v2  ;;  %v2438_v43 = vsel %vm7644_vm5, %v4461_v39, %v4462_v24  ;;  %v6976_v37 = vpop.permute.xlu0 %4469  ;;  %vm7654_vm2 = vmmov %vm7648_vm0 }
 0x645   : > { %v3295_v51 = vpack.c.bf16 %v2437_v19, %v2430_v61  ;;  %v6978_v53 = vpop.permute.xlu1 %4464  ;;  %v3293_v59 = vpack.c.bf16 %v2438_v43, %v2431_v46  ;;  %v4472_v16 = vunpack.i.h.bf16 %v6976_v37  ;;  %v4471_v29 = vunpack.i.l.bf16 %v6976_v37  ;;  %vm7655_vm7 = vmmov %vm7648_vm0 }
 0x646   : > { %v4467_v15 = vunpack.i.h.bf16 %v6978_v53  ;;  %v4466_v57 = vunpack.i.l.bf16 %v6978_v53  ;;  %vm7656_vm5 = vmmov %vm7648_vm0 }
 0x647   : > { %3294 = vmatprep.subr.bf16.mxu0 %v3293_v59  ;;  %v2439_v50 = vsel %vm7645_vm4, %v4462_v24, %v4471_v29  ;;  %v2440_v49 = vsel %vm7648_vm0, %v4471_v29, %v4472_v16  ;;  %v4417_v59 = vunpack.i.h.bf16 %v6784_v33  ;;  %v4416_v29 = vunpack.i.l.bf16 %v6784_v33  ;;  %vm7657_vm4 = vmmov %vm7648_vm0 }
 0x648   : > { %v2432_v7 = vsel %vm7646_vm3, %v4457_v45, %v4466_v57  ;;  %3296 = vmatpush1.bf16.msra.mxu0 %v3295_v51  ;;  %v2433_v48 = vsel %vm7647_vm11, %v4466_v57, %v4467_v15  ;;  %v4480_v34 = vpop.permute.xlu0 %4479  ;;  %vm7658_vm3 = vmmov %vm7648_vm0 }
 0x649   : > { %v3347_v63 = vpack.c.bf16 %v2439_v50, %v2432_v7  ;;  %v4475_v41 = vpop.permute.xlu1 %4474  ;;  %v3345_v44 = vpack.c.bf16 %v2440_v49, %v2433_v48  ;;  %v4482_v26 = vunpack.i.h.bf16 %v4480_v34  ;;  %v4481_v0 = vunpack.i.l.bf16 %v4480_v34  ;;  %vm7659_vm11 = vmmov %vm7648_vm0 }
 0x64a   : > { %v4477_v22 = vunpack.i.h.bf16 %v4475_v41  ;;  %v4476_v1 = vunpack.i.l.bf16 %v4475_v41 }
 0x64b   : > { %3346 = vmatprep.subr.bf16.mxu1 %v3345_v44  ;;  %v2451_v58 = vsel %vm7649_vm9, %v4412_v52, %v4481_v0  ;;  %v2452_v25 = vsel %vm7652_vm1, %v4481_v0, %v4482_v26  ;;  %vm7660_vm9 = vmmov %vm7648_vm0 }
 0x64c   : > { %v2444_v35 = vsel %vm7650_vm14, %v4411_v6, %v4476_v1  ;;  %3348 = vmatpush1.bf16.msra.mxu1 %v3347_v63  ;;  %v2445_v2 = vsel %vm7651_vm6, %v4476_v1, %v4477_v22  ;;  %v6998_v9 = vpop.permute.xlu0 %4484  ;;  %vm7661_vm14 = vmmov %vm7648_vm0 }
 0x64d   : > { %v3299_v17 = vpack.c.bf16 %v2451_v58, %v2444_v35  ;;  %v7000_v10 = vpop.permute.xlu1 %4489  ;;  %v3297_v45 = vpack.c.bf16 %v2452_v25, %v2445_v2  ;;  %v4487_v12 = vunpack.i.h.bf16 %v6998_v9  ;;  %v4486_v24 = vunpack.i.l.bf16 %v6998_v9  ;;  %vm7662_vm6 = vmmov %vm7648_vm0 }
 0x64e   : > { %v4492_v39 = vunpack.i.h.bf16 %v7000_v10  ;;  %v4491_v61 = vunpack.i.l.bf16 %v7000_v10  ;;  %vm7663_vm1 = vmmov %vm7648_vm0 }
 0x64f   : > { %3298 = vmatprep.subr.bf16.mxu0 %v3297_v45  ;;  %v2446_v19 = vsel %vm7653_vm8, %v4477_v22, %v4486_v24  ;;  %v2447_v43 = vsel %vm7655_vm7, %v4486_v24, %v4487_v12  ;;  %vm7664_vm8 = vmmov %vm7648_vm0 }
 0x650   : > { %v2453_v46 = vsel %vm7654_vm2, %v4482_v26, %v4491_v61  ;;  %3300 = vmatpush1.bf16.msra.mxu0 %v3299_v17  ;;  %v2454_v51 = vsel %vm7656_vm5, %v4491_v61, %v4492_v39  ;;  %v4495_v50 = vpop.permute.xlu0 %4494  ;;  %vm7665_vm2 = vmmov %vm7648_vm0 }
 0x651   : > { %v3351_v57 = vpack.c.bf16 %v2453_v46, %v2446_v19  ;;  %v4500_v7 = vpop.permute.xlu1 %4499  ;;  %v3349_v48 = vpack.c.bf16 %v2454_v51, %v2447_v43  ;;  %v4497_v49 = vunpack.i.h.bf16 %v4495_v50  ;;  %v4496_v52 = vunpack.i.l.bf16 %v4495_v50  ;;  %vm7667_vm7 = vmmov %vm7648_vm0 }
 0x652   : > { %v4502_v6 = vunpack.i.h.bf16 %v4500_v7  ;;  %v4501_v63 = vunpack.i.l.bf16 %v4500_v7  ;;  %v3357_v50 = vpack.c.bf16 %v6869_v28, %v6111_v42  ;;  %v7666_v7 = vld [vmem:[#allocation31_spill] sm:$0xff]  ;;  %vm7668_vm5 = vmmov %vm7648_vm0  ;;  %v7673_v42 = vld [vmem:[#allocation29_spill] sm:$0xff] }
 0x653   : > { %3350 = vmatprep.subr.bf16.mxu1 %v3349_v48  ;;  %v2458_v34 = vsel %vm7657_vm4, %v4416_v29, %v4496_v52  ;;  %v2459_v44 = vsel %vm7659_vm11, %v4496_v52, %v4497_v49  ;;  %v3359_v48 = vpack.c.bf16 %v7666_v7, %v6107_v36  ;;  %vm7669_vm4 = vcmask 719872   ;;  %v7693_v7 = vld [vmem:[#allocation42_spill] sm:$0xff] }
 0x654   : > { %v2465_v41 = vsel %vm7658_vm3, %v4417_v59, %v4501_v63  ;;  %3352 = vmatpush1.bf16.msra.mxu1 %v3351_v57  ;;  %v2466_v26 = vsel %vm7648_vm0, %v4501_v63, %v4502_v6  ;;  %v7020_v33 = vpop.permute.xlu0 %4504  ;;  %v7042_v57 = vld [vmem:[%s7276_s3] sm:$0xff]  ;;  %vm7670_vm3 = vcmask 990208   ;;  %vm7671_vm11 = vmmov 1  }
 0x655   : > { %v3303_v0 = vpack.c.bf16 %v2465_v41, %v2458_v34  ;;  %v7022_v22 = vpop.permute.xlu1 %4509  ;;  %v3301_v1 = vpack.c.bf16 %v2466_v26, %v2459_v44  ;;  %v4507_v58 = vunpack.i.h.bf16 %v7020_v33  ;;  %v4506_v35 = vunpack.i.l.bf16 %v7020_v33  ;;  %vm3411_vm0 = vmpackc.low %vm7671_vm11, %vm7670_vm3  ;;  %v7675_v44 = vld [vmem:[#allocation38_spill] sm:$0xff] }
 0x656   : > { %v4512_v2 = vunpack.i.h.bf16 %v7022_v22  ;;  %v4511_v25 = vunpack.i.l.bf16 %v7022_v22  ;;  %v7672_v36 = vpack.c.bf16 %v6720_v13, %v6712_v54  ;;  %v3410_v28 = vpack.c.bf16 %v6856_v27, %v7673_v42  ;;  %v7681_v54 = vld [vmem:[#allocation33_spill] sm:$0xff]  ;;  %v7682_v13 = vld [vmem:[#allocation32_spill] sm:$0xff]  ;;  %vm7722_vm3 = vmmov %vm7665_vm2 }
 0x657   : > { %3302 = vmatprep.subr.bf16.mxu0 %v3301_v1  ;;  %v2460_v17 = vsel %vm7660_vm9, %v4497_v49, %v4506_v35  ;;  %v2461_v24 = vsel %vm7662_vm6, %v4506_v35, %v4507_v58  ;;  %v7674_v41 = vmov 0.0|0.0   ;;  %v7676_v26 = vunpack.i.h.bf16 %v7675_v44  ;;  %v7678_v1 = vld [vmem:[#allocation36_spill] sm:$0xff]  ;;  %vm7685_vm6 = vmmov %vm7669_vm4  ;;  %v7697_v42 = vld [vmem:[#allocation37_spill] sm:$0xff] }
 0x658   : > { %v2467_v45 = vsel %vm7661_vm14, %v4502_v6, %v4511_v25  ;;  %3304 = vmatpush1.bf16.msra.mxu0 %v3303_v0  ;;  %v2468_v61 = vsel %vm7663_vm1, %v4511_v25, %v4512_v2  ;;  %v2389_v46 = vpop.permute.xlu0 %2388  ;;  %vm7677_vm9 = vcmask 875520   ;;  %v7679_v35 = vunpack.i.h.bf16 %v7678_v1  ;;  %vm7723_vm11 = vmmov %vm7665_vm2 }
 0x659   : > { %v3355_v19 = vpack.c.bf16 %v2467_v45, %v2460_v17  ;;  %v2391_v43 = vpop.permute.xlu1 %2390  ;;  %v3353_v51 = vpack.c.bf16 %v2468_v61, %v2461_v24  ;;  %v2472_v59 = vsel %vm7664_vm8, %v6778_v5, %v2389_v46  ;;  %vm7680_vm14 = vcmask 883712  }
 0x65a   : > { %v2473_v29 = vsel %vm7665_vm2, %v2389_v46, %v2391_v43  ;;  %v7683_v17 = vpack.c.bf16 %v7681_v54, %v7682_v13  ;;  %v7684_v45 = vpack.c.bf16 %v6760_v60, %v6747_v21  ;;  %vm7688_vm1 = vcmask 867328  }
 0x65b   : > { %2611 = vmatprep.subr.mxu0 %v2473_v29  ;;  %3354 = vmatprep.subr.bf16.mxu1 %v3353_v51  ;;  %v7689_v51 = vld [vmem:[#allocation35_spill] sm:$0xff]  ;;  %vm7695_vm8 = vcmask 211968  }
 0x65c   : > { %2612 = vmatpush1.msra.mxu0 %v2472_v59  ;;  %3356 = vmatpush1.bf16.msra.mxu1 %v3355_v19  ;;  %v7048_v49 = vpop.permute.xlu0 %2394  ;;  %v7686_v19 = vld [vmem:[#allocation40_spill] sm:$0xff]  ;;  %v7690_v59 = vld [vmem:[#allocation34_spill] sm:$0xff] }
 0x65d   : > { %v2393_v5 = vpop.permute.xlu1 %2392  ;;  %3358 = vmatprep.subr.bf16.mxu0 %v3357_v50  ;;  %2624 = vmatmul.mubr.f32.vlgmr.msra.gmra.mrb[8].mxu0 %v7042_v57  ;;  %v7687_v46 = vunpack.i.h.bf16 %v7686_v19  ;;  %v7691_v29 = vpack.c.bf16 %v7689_v51, %v7690_v59  ;;  %v7692_v50 = vpack.c.bf16 %v6706_v4, %v6704_v32  ;;  %v7699_v32 = vld [vmem:[#allocation50_spill] sm:$0xff]  ;;  %v7705_v19 = vld [vmem:[#allocation43_spill] sm:$0xff]  ;;  %v7708_v51 = vld [vmem:[#allocation45_spill] sm:$0xff] }
 0x65e   : > { %v2474_v52 = vsel %vm7667_vm7, %v2391_v43, %v2393_v5  ;;  %3360 = vmatpush1.bf16.msra.mxu0 %v3359_v48  ;;  %v2475_v6 = vsel %vm7668_vm5, %v2393_v5, %v7048_v49  ;;  %3050 = vmatprep.mubr.msk.f32.mxu0 %vm7669_vm4, %v6737_v8  ;;  %v7694_v48 = vunpack.i.h.bf16 %v7693_v7  ;;  %v7700_v4 = vpack.c.bf16 %v6741_v23, %v7699_v32  ;;  %v7704_v23 = vld [vmem:[#allocation51_spill] sm:$0xff]  ;;  %vm7719_vm7 = vmmov %vm7665_vm2 }
 0x65f   : > { %2682 = vmatprep.subr.mxu1 %v2475_v6  ;;  %3362 = vmatprep.subr.bf16.mxu0 %v7672_v36  ;;  %v7696_v36 = vld [vmem:[#allocation39_spill] sm:$0xff]  ;;  %vm7720_vm5 = vmmov %vm7665_vm2 }
 0x660   : > { %2683 = vmatpush1.msra.mxu1 %v2474_v52  ;;  %v1843_v63 = vpop.permute.xlu0 %1842  ;;  %vm7721_vm4 = vmmov %vm7665_vm2 }
 0x661   : > { %v1816_v34 = vpop.permute.xlu1 %1815  ;;  %3409 = vmatprep.subr.bf16.mxu1 %v7674_v41  ;;  %2695 = vmatmul.mubr.f32.vlgmr.msra.gmra.mrb[8].mxu1 %v7042_v57  ;;  %v1849_v0 = vsel %vm7677_vm9, %v7676_v26, %v1843_v63 }
 0x662   : > { %v1822_v25 = vsel %vm7680_vm14, %v7679_v35, %v1816_v34  ;;  %3364 = vmatpush1.bf16.msra.mxu0 %v7683_v17  ;;  %3412 = vmatpush1.bf16.msk.msra.mxu1 %vm3411_vm0, %v3410_v28  ;;  %v7698_v28 = vpack.c.bf16 %v7696_v36, %v7697_v42  ;;  %v7701_v17 = vld [vmem:[#allocation30_spill] sm:$0xff]  ;;  %vm7724_vm0 = vmmov %vm7665_vm2 }
 0x663   : > { %v3369_v27 = vpack.c.bf16 %v1849_v0, %v1822_v25  ;;  %3366 = vmatprep.subr.bf16.mxu0 %v7684_v45  ;;  %3413 = vmatprep.subr.bf16.mxu1 %v7674_v41  ;;  %vm7725_vm9 = vmmov %vm7724_vm0 }
 0x664   : > { %3052 = vmatprep.mubr.msk.f32.mxu1 %vm7685_vm6, %v6737_v8  ;;  %v1951_v24 = vpop.permute.xlu0 %1950  ;;  %vm7726_vm14 = vmmov %vm7724_vm0 }
 0x665   : > { %v1870_v61 = vpop.permute.xlu1 %1869  ;;  %v1957_v5 = vsel %vm7695_vm8, %v7694_v48, %v1951_v24  ;;  %v7709_v48 = vld [vmem:[#allocation46_spill] sm:$0xff]  ;;  %v3426_v36 = vpack.c.bf16 %v1951_v24, %v6690_v30  ;;  %vm7727_vm6 = vmmov %vm7724_vm0 }
 0x666   : > { %v1876_v43 = vsel %vm7688_vm1, %v7687_v46, %v1870_v61  ;;  %3368 = vmatpush1.bf16.msra.mxu0 %v7691_v29  ;;  %3415 = vmatpush1.bf16.msra.mxu1 %v7692_v50  ;;  %v3377_v44 = vpack.c.bf16 %v1957_v5, %v6944_v11  ;;  %v3379_v46 = vpack.c.bf16 %v7705_v19, %v7704_v23  ;;  %vm7728_vm1 = vmmov %vm7724_vm0 }
 0x667   : > { %3370 = vmatprep.subr.bf16.mxu0 %v3369_v27  ;;  %3416 = vmatprep.subr.bf16.mxu1 %v7674_v41  ;;  %v3373_v21 = vpack.c.bf16 %v6922_v55, %v1876_v43  ;;  %v3420_v55 = vpack.c.bf16 %v1843_v63, %v1816_v34  ;;  %v7702_v27 = vld [vmem:[#allocation41_spill] sm:$0xff]  ;;  %v7706_v63 = vld [vmem:[#allocation44_spill] sm:$0xff]  ;;  %v3423_v43 = vpack.c.bf16 %v6911_v14, %v1870_v61  ;;  %v7710_v14 = vld [vmem:[#allocation47_spill] sm:$0xff] }
 0x668   : > { %v4515_v8 = vpop.permute.xlu0 %4514  ;;  %v7703_v45 = vpack.c.bf16 %v7701_v17, %v7702_v27  ;;  %v7707_v34 = vunpack.i.h.bf16 %v7706_v63  ;;  %vm7729_vm8 = vmmov %vm7724_vm0 }
 0x669   : > { %v1978_v60 = vpop.permute.xlu1 %1977  ;;  %v4517_v52 = vunpack.i.h.bf16 %v4515_v8  ;;  %v4516_v6 = vunpack.i.l.bf16 %v4515_v8 }
 0x66a   : > { %3372 = vmatpush1.bf16.msra.mxu0 %v7698_v28  ;;  %3418 = vmatpush1.bf16.msra.mxu1 %v7700_v4  ;;  %v1984_v11 = vsel %vm606_vm12, %v7707_v34, %v1978_v60  ;;  %vm7714_vm12 = vmmov %vm7665_vm2 }
 0x66b   : > { %3374 = vmatprep.subr.bf16.mxu0 %v3373_v21  ;;  %3419 = vmatprep.subr.bf16.mxu1 %v7674_v41  ;;  %v2011_v26 = vsel %vm634_vm15, %v4516_v6, %v4517_v52  ;;  %v2010_v59 = vsel %vm634_vm15, %v7708_v51, %v4516_v6  ;;  %v7711_v6 = vld [vmem:[#allocation48_spill] sm:$0xff]  ;;  %vm7718_vm15 = vmmov %vm7665_vm2 }
 0x66c   : > { %v4525_v0 = vpop.permute.xlu0 %4524  ;;  %v3381_v29 = vpack.c.bf16 %v2011_v26, %v1984_v11  ;;  %v3383_v5 = vpack.c.bf16 %v2010_v59, %v7709_v48  ;;  %v7717_v11 = vunpack.i.h.bf16 %v6799_v56 }
 0x66d   : > { %v4520_v1 = vpop.permute.xlu1 %4519  ;;  %v4527_v35 = vunpack.i.h.bf16 %v4525_v0  ;;  %v4526_v25 = vunpack.i.l.bf16 %v4525_v0 }
 0x66e   : > { %v4522_v54 = vunpack.i.h.bf16 %v4520_v1  ;;  %v4521_v13 = vunpack.i.l.bf16 %v4520_v1  ;;  %3376 = vmatpush1.bf16.msra.mxu0 %v7703_v45  ;;  %3421 = vmatpush1.bf16.msra.mxu1 %v3420_v55 }
 0x66f   : > { %3378 = vmatprep.subr.bf16.mxu0 %v3377_v44  ;;  %3422 = vmatprep.subr.bf16.mxu1 %v7674_v41  ;;  %v2068_v7 = vsel %vm693_vm10, %v4526_v25, %v4527_v35  ;;  %v2067_v61 = vsel %vm693_vm10, %v7710_v14, %v4526_v25  ;;  %v3429_v44 = vpack.c.bf16 %v4517_v52, %v1978_v60  ;;  %v7712_v60 = vld [vmem:[#allocation49_spill] sm:$0xff] }
 0x670   : > { %v4530_v50 = vpop.permute.xlu0 %4529  ;;  %v2038_v8 = vsel %vm662_vm13, %v4521_v13, %v4522_v54  ;;  %v2037_v42 = vsel %vm662_vm13, %v7711_v6, %v4521_v13  ;;  %v7713_v52 = vunpack.i.h.bf16 %v7712_v60  ;;  %vm7716_vm13 = vmmov %vm7665_vm2 }
 0x671   : > { %v2062_v21 = vpop.permute.xlu1 %2061  ;;  %v3385_v4 = vpack.c.bf16 %v2068_v7, %v2038_v8  ;;  %v3387_v55 = vpack.c.bf16 %v2067_v61, %v2037_v42  ;;  %v4531_v24 = vunpack.i.l.bf16 %v4530_v50  ;;  %v4532_v1 = vunpack.i.h.bf16 %v4530_v50 }
 0x672   : > { %3380 = vmatpush1.bf16.msra.mxu0 %v3379_v46  ;;  %3424 = vmatpush1.bf16.msra.mxu1 %v3423_v43  ;;  %v2069_v30 = vsel %vm693_vm10, %v4527_v35, %v2062_v21  ;;  %vm7715_vm10 = vmmov %vm7665_vm2 }
 0x673   : > { %3382 = vmatprep.subr.bf16.mxu0 %v3381_v29  ;;  %3425 = vmatprep.subr.bf16.mxu1 %v7674_v41  ;;  %v3432_v13 = vpack.c.bf16 %v2069_v30, %v4522_v54  ;;  %v2406_v46 = vsel %vm7714_vm12, %v7713_v52, %v4531_v24  ;;  %v2407_v54 = vsel %vm7665_vm2, %v4531_v24, %v4532_v1  ;;  %vm7730_vm12 = vmmov %vm7724_vm0 }
 0x674   : > { %v4535_v28 = vpop.permute.xlu0 %4534  ;;  %vm7734_vm2 = vmmov %vm7724_vm0 }
 0x675   : > { %v4540_v32 = vpop.permute.xlu1 %4539  ;;  %v4536_v25 = vunpack.i.l.bf16 %v4535_v28  ;;  %v4537_v45 = vunpack.i.h.bf16 %v4535_v28 }
 0x676   : > { %3384 = vmatpush1.bf16.msra.mxu0 %v3383_v5  ;;  %3427 = vmatpush1.bf16.msra.mxu1 %v3426_v36  ;;  %v4542_v51 = vunpack.i.h.bf16 %v4540_v32  ;;  %v4541_v7 = vunpack.i.l.bf16 %v4540_v32 }
 0x677   : > { %3386 = vmatprep.subr.bf16.mxu0 %v3385_v4  ;;  %3428 = vmatprep.subr.bf16.mxu1 %v7674_v41  ;;  %v2408_v35 = vsel %vm7715_vm10, %v4532_v1, %v4536_v25  ;;  %vm7731_vm10 = vmmov %vm7724_vm0 }
 0x678   : > { %v7125_v26 = vpop.permute.xlu0 %4544 }
 0x679   : > { %v7127_v0 = vpop.permute.xlu1 %4549  ;;  %v4547_v14 = vunpack.i.h.bf16 %v7125_v26  ;;  %v4546_v56 = vunpack.i.l.bf16 %v7125_v26 }
 0x67a   : > { %3388 = vmatpush1.bf16.msra.mxu0 %v3387_v55  ;;  %3430 = vmatpush1.bf16.msra.mxu1 %v3429_v44  ;;  %v4551_v60 = vunpack.i.l.bf16 %v7127_v0 }
 0x67b   : > { %3431 = vmatprep.subr.bf16.mxu1 %v7674_v41 }
 0x67c   : > { %v4565_v17 = vpop.permute.xlu0 %4564 }
 0x67d   : > { %v4555_v27 = vpop.permute.xlu1 %4554  ;;  %v4567_v63 = vunpack.i.h.bf16 %v4565_v17  ;;  %v4566_v59 = vunpack.i.l.bf16 %v4565_v17  ;;  %v4552_v17 = vunpack.i.h.bf16 %v7127_v0 }
 0x67e   : > { %v4557_v23 = vunpack.i.h.bf16 %v4555_v27  ;;  %v4556_v19 = vunpack.i.l.bf16 %v4555_v27  ;;  %3433 = vmatpush1.bf16.msra.mxu1 %v3432_v13 }
 0x67f   : > { %3434 = vmatprep.subr.bf16.mxu1 %v7674_v41  ;;  %v2429_v61 = vsel %vm7720_vm5, %v4567_v63, %v4542_v51  ;;  %v2427_v32 = vsel %vm7723_vm11, %v4452_v31, %v4566_v59  ;;  %v2428_v1 = vsel %vm7725_vm9, %v4566_v59, %v4567_v63  ;;  %vm7736_vm5 = vmmov %vm7724_vm0 }
 0x680   : > { %v2415_v34 = vsel %vm7716_vm13, %v4557_v23, %v4537_v45  ;;  %v2413_v43 = vsel %vm7718_vm15, %v7717_v11, %v4556_v19  ;;  %v4570_v50 = vpop.permute.xlu0 %4569  ;;  %v2414_v8 = vsel %vm7719_vm7, %v4556_v19, %v4557_v23  ;;  %vm7732_vm13 = vmmov %vm7724_vm0 }
 0x681   : > { %v3435_v29 = vpack.c.bf16 %v2415_v34, %v2408_v35  ;;  %v4560_v21 = vpop.permute.xlu1 %4559  ;;  %v3391_v48 = vpack.c.bf16 %v2413_v43, %v2406_v46  ;;  %v3389_v6 = vpack.c.bf16 %v2414_v8, %v2407_v54  ;;  %v4572_v42 = vunpack.i.h.bf16 %v4570_v50  ;;  %vm7733_vm15 = vmmov %vm7724_vm0 }
 0x682   : > { %v4562_v5 = vunpack.i.h.bf16 %v4560_v21  ;;  %v4561_v36 = vunpack.i.l.bf16 %v4560_v21  ;;  %v4571_v28 = vunpack.i.l.bf16 %v4570_v50  ;;  %vm7735_vm7 = vmmov %vm7724_vm0 }
 0x683   : > { %3436 = vmatpush1.bf16.msra.mxu1 %v3435_v29  ;;  %3390 = vmatprep.subr.bf16.mxu0 %v3389_v6  ;;  %v2436_v31 = vsel %vm7727_vm6, %v4572_v42, %v4546_v56  ;;  %vm7739_vm11 = vmmov %vm7724_vm0 }
 0x684   : > { %v2420_v4 = vsel %vm7721_vm4, %v4447_v47, %v4561_v36  ;;  %v2422_v55 = vsel %vm7722_vm3, %v4562_v5, %v4541_v7  ;;  %3437 = vmatprep.subr.bf16.mxu1 %v7674_v41  ;;  %v4585_v26 = vpop.permute.xlu0 %4584  ;;  %v2421_v24 = vsel %vm7724_vm0, %v4561_v36, %v4562_v5  ;;  %3392 = vmatpush1.bf16.msra.mxu0 %v3391_v48  ;;  %vm7737_vm4 = vmmov %vm7724_vm0 }
 0x685   : > { %v3438_v44 = vpack.c.bf16 %v2429_v61, %v2422_v55  ;;  %v4575_v30 = vpop.permute.xlu1 %4574  ;;  %v3395_v25 = vpack.c.bf16 %v2427_v32, %v2420_v4  ;;  %v4586_v62 = vunpack.i.l.bf16 %v4585_v26  ;;  %v4587_v27 = vunpack.i.h.bf16 %v4585_v26  ;;  %vm7738_vm3 = vmmov %vm7724_vm0 }
 0x686   : > { %v4577_v47 = vunpack.i.h.bf16 %v4575_v30  ;;  %v4576_v13 = vunpack.i.l.bf16 %v4575_v30  ;;  %v3393_v45 = vpack.c.bf16 %v2428_v1, %v2421_v24  ;;  %v2434_v38 = vsel %vm7726_vm14, %v4467_v15, %v4571_v28  ;;  %vm7740_vm9 = vmmov %vm7724_vm0  ;;  %v7747_v1 = vld [vmem:[#allocation19_spill] sm:$0xff] }
 0x687   : > { %3439 = vmatpush1.bf16.msra.mxu1 %v3438_v44  ;;  %v2455_v15 = vsel %vm7731_vm10, %v4492_v39, %v4586_v62  ;;  %v2457_v11 = vsel %vm7733_vm15, %v4587_v27, %v4552_v17  ;;  %v2456_v39 = vsel %vm7737_vm4, %v4586_v62, %v4587_v27  ;;  %vm7741_vm14 = vmmov %vm7724_vm0  ;;  %vm7753_vm10 = vcmask 80896  }
 0x688   : > { %v2443_v23 = vsel %vm7728_vm1, %v4577_v47, %v4547_v14  ;;  %v2441_v19 = vsel %vm7729_vm8, %v4472_v16, %v4576_v13  ;;  %3440 = vmatprep.subr.bf16.mxu1 %v7674_v41  ;;  %3394 = vmatprep.subr.bf16.mxu0 %v3393_v45  ;;  %v4590_v63 = vpop.permute.xlu0 %4589  ;;  %v2442_v53 = vsel %vm7730_vm12, %v4576_v13, %v4577_v47  ;;  %vm7742_vm6 = vmmov %vm7724_vm0  ;;  %v7748_v13 = vld [vmem:[#allocation20_spill] sm:$0xff]  ;;  %v7749_v45 = vld [vmem:[#allocation21_spill] sm:$0xff] }
 0x689   : > { %v3441_v52 = vpack.c.bf16 %v2443_v23, %v2436_v31  ;;  %v3399_v46 = vpack.c.bf16 %v2441_v19, %v2434_v38  ;;  %v4580_v35 = vpop.permute.xlu1 %4579  ;;  %3396 = vmatpush1.bf16.msra.mxu0 %v3395_v25  ;;  %v2435_v16 = vsel %vm7732_vm13, %v4571_v28, %v4572_v42  ;;  %v4592_v43 = vunpack.i.h.bf16 %v4590_v63  ;;  %vm7743_vm1 = vmmov %vm7724_vm0 }
 0x68a   : > { %v4582_v34 = vunpack.i.h.bf16 %v4580_v35  ;;  %v4581_v37 = vunpack.i.l.bf16 %v4580_v35  ;;  %v4591_v0 = vunpack.i.l.bf16 %v4590_v63  ;;  %v3397_v54 = vpack.c.bf16 %v2442_v53, %v2435_v16  ;;  %vm7744_vm8 = vmmov %vm7724_vm0  ;;  %v7752_v53 = vld [vmem:[#allocation27_spill] sm:$0xff] }
 0x68b   : > { %3442 = vmatpush1.bf16.msra.mxu1 %v3441_v52  ;;  %vm7745_vm12 = vmmov %vm7724_vm0 }
 0x68c   : > { %v2448_v51 = vsel %vm7734_vm2, %v4487_v12, %v4581_v37  ;;  %v2450_v59 = vsel %vm7735_vm7, %v4582_v34, %v4551_v60  ;;  %3443 = vmatprep.subr.bf16.mxu1 %v7674_v41  ;;  %v2449_v10 = vsel %vm7736_vm5, %v4581_v37, %v4582_v34  ;;  %3398 = vmatprep.subr.bf16.mxu0 %v3397_v54  ;;  %v4600_v21 = vpop.permute.xlu0 %4599  ;;  %v7750_v60 = vld [vmem:[#allocation28_spill] sm:$0xff]  ;;  %vm7754_vm13 = vmmov %vm7753_vm10 }
 0x68d   : > { %v3403_v29 = vpack.c.bf16 %v2455_v15, %v2448_v51  ;;  %v3444_v50 = vpack.c.bf16 %v2457_v11, %v2450_v59  ;;  %v4595_v8 = vpop.permute.xlu1 %4594  ;;  %v3401_v7 = vpack.c.bf16 %v2456_v39, %v2449_v10  ;;  %3400 = vmatpush1.bf16.msra.mxu0 %v3399_v46  ;;  %v4602_v48 = vunpack.i.h.bf16 %v4600_v21  ;;  %v7751_v46 = vld [vmem:[#allocation26_spill] sm:$0xff]  ;;  %vm7759_vm15 = vmmov %vm7753_vm10 }
 0x68e   : > { %v4601_v5 = vunpack.i.l.bf16 %v4600_v21  ;;  %v4597_v9 = vunpack.i.h.bf16 %v4595_v8  ;;  %v4596_v36 = vunpack.i.l.bf16 %v4595_v8  ;;  %v2463_v12 = vsel %vm7738_vm3, %v4591_v0, %v4592_v43 }
 0x68f   : > { %3402 = vmatprep.subr.bf16.mxu0 %v3401_v7  ;;  %3445 = vmatpush1.bf16.msra.mxu1 %v3444_v50  ;;  %v2462_v42 = vsel %vm7742_vm6, %v4507_v58, %v4591_v0  ;;  %v4805_v58 = vmov 0  }
 0x690   : > { %v2464_v14 = vsel %vm7739_vm11, %v4592_v43, %v4601_v5  ;;  %v2471_v56 = vsel %vm7724_vm0, %v4597_v9, %v4602_v48  ;;  %v2469_v61 = vsel %vm7740_vm9, %v4512_v2, %v4596_v36  ;;  %3446 = vmatprep.subr.bf16.mxu1 %v7674_v41  ;;  %v2470_v6 = vsel %vm7741_vm14, %v4596_v36, %v4597_v9  ;;  %v2399_v44 = vpop.permute.xlu0 %2398  ;;  %v1512_v43 = vld [vmem:[%s7277_s4] sm:$0xff] }
 0x691   : > { %v3447_v28 = vpack.c.bf16 %v2471_v56, %v2464_v14  ;;  %v2397_v4 = vpop.permute.xlu1 %2396  ;;  %v3405_v55 = vpack.c.bf16 %v2470_v6, %v2463_v12  ;;  %v3407_v32 = vpack.c.bf16 %v2469_v61, %v2462_v42  ;;  %3404 = vmatpush1.bf16.msra.mxu0 %v3403_v29  ;;  %4603 = vset.pattern.permute.xlu0 %v4805_v58 }
 0x692   : > { %v2477_v41 = vsel %vm7744_vm8, %v2397_v4, %v2399_v44  ;;  %v2476_v33 = vsel %vm7745_vm12, %v7048_v49, %v2397_v4 }
 0x693   : > { %3406 = vmatprep.subr.bf16.mxu0 %v3405_v55  ;;  %3448 = vmatpush1.bf16.msra.mxu1 %v3447_v28 }
 0x694   : > { %2824 = vmatprep.subr.mxu1 %v7620_v40  ;;  %v7746_v40 = vld [vmem:[#allocation18_spill] sm:$0xff] }
 0x695   : > { %v2401_v22 = vpop.permute.xlu1 %2400  ;;  %3408 = vmatpush1.bf16.msra.mxu0 %v3407_v32 }
 0x696   : > { %v2478_v2 = vsel %vm7743_vm1, %v2399_v44, %v2401_v22  ;;  %2753 = vmatprep.subr.mxu0 %v2477_v41 }
 0x697   : > { %2825 = vmatpush1.msra.mxu1 %v2478_v2 }
 0x698   : > { %2837 = vmatmul.mubr.f32.vlgmr.msra.gmra.mrb[10].mxu1 %v7042_v57 }
 0x699   : > { %2754 = vmatpush1.msra.mxu0 %v2476_v33 }
 0x69a   : > { %2766 = vmatmul.mubr.f32.vlgmr.msra.gmra.mrb[10].mxu0 %v7042_v57 }
 0x730   : > { %v2625_v26 = vpop.f32.mrb[8].mxu0 }
 0x731   : > { %v2842_v30 = vmul.f32 %v2625_v26, %v7746_v40  ;;  %v2627_v24 = vpop.f32.mrb[9].mxu0 }
 0x732   : > { %v2843_v25 = vmul.f32 %v2627_v24, %v7747_v1 }
 0x734   : > { %v2849_v62 = vadd.f32 %v2843_v25, %v2842_v30  ;;  %v2696_v47 = vpop.f32.mrb[8].mxu1  ;;  %v7756_v25 = vld [vmem:[#allocation23_spill] sm:$0xff] }
 0x735   : > { %v2844_v17 = vmul.f32 %v2696_v47, %v7748_v13  ;;  %v2698_v27 = vpop.f32.mrb[9].mxu1 }
 0x736   : > { %v2845_v38 = vmul.f32 %v2698_v27, %v7749_v45 }
 0x737   : > { %v2850_v31 = vadd.f32 %v2849_v62, %v2844_v17 }
 0x739   : > { %v2851_v49 = vadd.f32 %v2850_v31, %v2845_v38 }
 0x76b   : > { %v2838_v23 = vpop.f32.mrb[10].mxu1 }
 0x76c   : > { %v2840_v19 = vpop.f32.mrb[11].mxu1  ;;  %v2848_v52 = vmul.f32 %v2838_v23, %v7750_v60 }
 0x76d   : > { %v2767_v57 = vpop.f32.mrb[10].mxu0 }
 0x76e   : > { %v2846_v63 = vmul.f32 %v2767_v57, %v7751_v46  ;;  %v2769_v35 = vpop.f32.mrb[11].mxu0  ;;  %v2854_v37 = vsel %vm7753_vm10, %v2848_v52, 0.0 }
 0x76f   : > { %v2847_v15 = vmul.f32 %v2769_v35, %v7752_v53 }
 0x770   : > { %v2852_v34 = vadd.f32 %v2851_v49, %v2846_v63 }
 0x772   : > { %v2853_v16 = vadd.f32 %v2852_v34, %v2847_v15 }
 0x774   : > { %v2855_v11 = vadd.f32 %v2854_v37, %v2853_v16 }
 0x776   : > { %2856 = vadd.xlane.f32.xlu0 %v2855_v11 }
 0x78c   : > { %1515 = vperm.xlu0 %4603, %v1512_v43  }
 0x803   : > { %v2857_v0 = vpop.xlane.xlu0 %2856 }
 0x804   : > { %v2858_v54 = vmul.f32 0.001953125, %v2857_v0 }
 0x806   : > { %v2859_v51 = vsub.f32 %v2625_v26, %v2858_v54  ;;  %v2860_v59 = vsub.f32 %v2627_v24, %v2858_v54  ;;  %v2861_v10 = vsub.f32 %v2696_v47, %v2858_v54  ;;  %v2862_v39 = vsub.f32 %v2698_v27, %v2858_v54  ;;  %v7755_v24 = vld [vmem:[#allocation22_spill] sm:$0xff]  ;;  %v7758_v27 = vld [vmem:[#allocation25_spill] sm:$0xff] }
 0x807   : > { %v2863_v21 = vsub.f32 %v2767_v57, %v2858_v54  ;;  %v2865_v7 = vsub.f32 %v2838_v23, %v2858_v54  ;;  %v2864_v9 = vsub.f32 %v2769_v35, %v2858_v54 }
 0x808   : > { %v2866_v29 = vmul.f32 %v2859_v51, %v7746_v40  ;;  %v2867_v50 = vmul.f32 %v2860_v59, %v7747_v1  ;;  %v2868_v8 = vmul.f32 %v2861_v10, %v7748_v13  ;;  %v2869_v36 = vmul.f32 %v2862_v39, %v7749_v45  ;;  %v7757_v13 = vld [vmem:[#allocation24_spill] sm:$0xff] }
 0x809   : > { %v2870_v12 = vmul.f32 %v2863_v21, %v7751_v46  ;;  %v2872_v61 = vmul.f32 %v2865_v7, %v7750_v60  ;;  %v2871_v6 = vmul.f32 %v2864_v9, %v7752_v53 }
 0x80a   : > { %v2873_v48 = vmul.f32 %v2866_v29, %v2866_v29  ;;  %v2874_v5 = vmul.f32 %v2867_v50, %v2867_v50  ;;  %v2875_v14 = vmul.f32 %v2868_v8, %v2868_v8  ;;  %v2876_v42 = vmul.f32 %v2869_v36, %v2869_v36 }
 0x80b   : > { %v2877_v4 = vmul.f32 %v2870_v12, %v2870_v12  ;;  %v2879_v32 = vmul.f32 %v2872_v61, %v2872_v61  ;;  %v2878_v44 = vmul.f32 %v2871_v6, %v2871_v6  ;;  %v1516_v30 = vpop.permute.xlu0 %1515 }
 0x80c   : > { %v2880_v56 = vadd.f32 %v2874_v5, %v2873_v48  ;;  %v1518_v1 = vadd.f32 %v1516_v30, %v7755_v24  ;;  %v1519_v62 = vadd.f32 %v1516_v30, %v7756_v25  ;;  %v1520_v17 = vadd.f32 %v1516_v30, %v7757_v13 }
 0x80d   : > { %v2885_v41 = vsel %vm7754_vm13, %v2879_v32, 0.0  ;;  %v1521_v45 = vadd.f32 %v1516_v30, %v7758_v27  ;;  %v1522_v38 = vadd.f32 %v1516_v30, %v6932_v20  ;;  %v1523_v31 = vadd.f32 %v1516_v30, %v6937_v18 }
 0x80e   : > { %v2881_v28 = vadd.f32 %v2880_v56, %v2875_v14  ;;  %v1524_v60 = vadd.f32 %v1516_v30, %v6934_v3 }
 0x810   : > { %v2882_v55 = vadd.f32 %v2881_v28, %v2876_v42 }
 0x812   : > { %v2883_v22 = vadd.f32 %v2882_v55, %v2877_v4 }
 0x814   : > { %v2884_v2 = vadd.f32 %v2883_v22, %v2878_v44 }
 0x816   : > { %v2886_v33 = vadd.f32 %v2885_v41, %v2884_v2 }
 0x818   : > { %2887 = vadd.xlane.f32.xlu1 %v2886_v33 }
 0x8a5   : > { %v2888_v58 = vpop.xlane.xlu1 %2887 }
 0x8a6   : > { %v2889_v26 = vmul.f32 0.001953125, %v2888_v58 }
 0x8a8   : > { %v2890_v40 = vadd.f32 1e-05, %v2889_v26 }
 0x8aa   : > { %4606 = vrsqrt.f32 %v2890_v40 }
 0x8b4   : > { %v4607_v47 = vpop.eup %4606 }
 0x8b5   : > { %v2892_v49 = vmul.f32 %v4607_v47, %v2866_v29  ;;  %v2893_v23 = vmul.f32 %v4607_v47, %v2867_v50  ;;  %v2894_v19 = vmul.f32 %v4607_v47, %v2868_v8  ;;  %v2895_v57 = vmul.f32 %v4607_v47, %v2869_v36 }
 0x8b6   : > { %v2896_v52 = vmul.f32 %v4607_v47, %v2870_v12  ;;  %v2897_v46 = vmul.f32 %v4607_v47, %v2871_v6  ;;  %v2898_v63 = vmul.f32 %v4607_v47, %v2872_v61 }
 0x8b7   : > { %v2899_v35 = vadd.f32 %v2892_v49, %v1518_v1  ;;  %v2900_v53 = vadd.f32 %v2893_v23, %v1519_v62  ;;  %v2901_v15 = vadd.f32 %v2894_v19, %v1520_v17  ;;  %v2902_v34 = vadd.f32 %v2895_v57, %v1521_v45 }
 0x8b8   : > { %v2903_v37 = vadd.f32 %v2896_v52, %v1522_v38  ;;  %v2904_v20 = vadd.f32 %v2897_v46, %v1523_v31  ;;  %v2905_v16 = vadd.f32 %v2898_v63, %v1524_v60 }
 0x8b9   : > { %v2906_v18 = vmax.f32 %v2899_v35, 0.0  ;;  %v2907_v11 = vmax.f32 %v2900_v53, 0.0  ;;  %v2908_v43 = vmax.f32 %v2901_v15, 0.0  ;;  %v2909_v0 = vmax.f32 %v2902_v34, 0.0 }
 0x8ba   : > { %v2910_v3 = vmax.f32 %v2903_v37, 0.0  ;;  %v2911_v54 = vmax.f32 %v2904_v20, 0.0  ;;  %v2912_v51 = vmax.f32 %v2905_v16, 0.0 }
 0x8bb   : > { %2913 = vst [vmem:[%s267_s24] sm:$0xff] %v2906_v18  ;;  %2914 = vst [vmem:[%s267_s24 + $0x8] sm:$0xff] %v2907_v11 }
 0x8bc   : > { %2915 = vst [vmem:[%s267_s24 + $0x10] sm:$0xff] %v2908_v43  ;;  %2916 = vst [vmem:[%s267_s24 + $0x18] sm:$0xff] %v2909_v0 }
 0x8bd   : > { %2917 = vst [vmem:[%s267_s24 + $0x20] sm:$0xff] %v2910_v3  ;;  %2918 = vst [vmem:[%s267_s24 + $0x28] sm:$0xff] %v2911_v54 }
 0x8be   : > { %2919 = vst.msk [vmem:[%s267_s24 + $0x30] sm:$0xff] %vm7759_vm15, %v2912_v51 }
 0x8bf   : > { %4710 = shalt.err (!%p4707_p6)
}
 0x8c0   : > { %s4711_s29 = scalar_lea.hbm %s7228_s28, 896  ;;  %s4715_s12 = scalar_lea.hbm %s7278_s5, 1792 }
 0x8c1   : > { %p4712_p10 = scmp.ne.s32.totalorder %s7228_s28, %s4711_s29  ;;  %p4716_p4 = scmp.lt.u32.totalorder %s7228_s28, %s7278_s5 }
 0x8c2   : > { %p4717_p8 = scmp.lt.u32.totalorder %s4715_s12, %s4711_s29  ;;  %p4719_p11 = scmp.lt.u32.totalorder %s4711_s29, %s7228_s28 }
 0x8c3   : > { %p4713_p0 = pnand %p4712_p10, %p7760_p3 }
 0x8c4   : > { %p4718_p5 = por %p4717_p8, %p4716_p4 }
 0x8c5   : > { %p4714_p1 = pneg %p4713_p0 }
 0x8c6   : > { %p4720_p7 = por %p4719_p11, %p4718_p5 }
 0x8c8   : > { %p4721_p9 = pnand %p4720_p7, %p4714_p1 }
 0x8ca   : > { %4724 = shalt.err (!%p4721_p9)
}
 0x8cb   : > { %3461 = dma.vmem_to_hbm [thread:$0]  (%p7760_p3), %s7230_s26, 896, %s7228_s28, %s2921_s13  }
 0x8cc PF: > { %s7761_s6 = sld [smem:[#allocation15_spill]]  ;;  %s2947_s0 = sand.u32 1, %s4759_s18  }
 0x8cd   : > { %p7762_p12 = scmp.ne.s32.totalorder %s7432_s25, 0  ;;  %s2948_s21 = scalar_lea.sflag [#allocation4], %s2947_s0 }
 0x8d2   : > { %p7763_p2 = scmp.ge.s32.totalorder %s7761_s6, 2 }
 0x8d4   : > { %p3475_p13 = pnand %p7763_p2, %p7762_p12 }
 0x8d6   : > { %4754 = dma.done.wait (!%p3475_p13), %s2948_s21, 896  }
 0x8d7   : > { %4756 = vsyncadd (!%p3475_p13), %s2948_s21, 4294966400  ;;  %s7764_s21 = sld [smem:[#allocation16_spill]]  ;;  %s7765_s18 = sld [smem:[#allocation13_spill]] }
 0x8d8   : > { %s7766_s19 = sld [smem:[#allocation14_spill]]  ;;  %s7767_s20 = sld [smem:[#allocation17_spill]] }
 0x8dd   : > { %p19_p6 = scmp.ge.s32.totalorder %s7764_s21, 4  }
 0x8df   :  { %21 = sbr.rel (!%p19_p6) target bundleno = 10 (0xa), region = 94 }
 0x8e6   :  { %2953 = vsyncpa [#allocation3], 1 }
 0x8e7   :  { %2955 = vsyncpa [#allocation3 + $0x1], 1 }
 0x8e8   :  { %2956 = vsyncpa [#allocation6], 1 }
 0x8e9   :  { %2958 = vsyncpa [#allocation6 + $0x1], 1 }
 0x8ea   :  { %2959 = vsyncpa [#allocation4], 1 }
 0x8eb   :  { %2961 = vsyncpa [#allocation4 + $0x1], 1 }

</bundles_post_ra>
